<compile_context>
chip_gen: v7x
topology: tpu7x:2x2x1
jax: 0.10.0
libtpu: 0.0.40
codegen_flags: <defaults>
</compile_context>

<pallas_src>
import math
from functools import partial

import jax
import jax.numpy as jnp
from jax.experimental import pallas as pl
from jax.experimental.pallas import tpu as pltpu

_LANE = 128

_PARAM_ORDER = (
    "wqkv_tr", "wqkv_ti", "wo_mix",            # MixAttention       (bf16)
    "wqkv_x", "wo_ord",                        # OrdinaryAttention  (bf16)
    "conv1_w", "conv2_w", "fc1_w", "fc2_w",    # FFN / output head  (bf16)
    "vec_d", "vec_f", "fc2_b",                 # packed f32 bias / LN vectors
)


def _round_up(x, m):
    return (x + m - 1) // m * m


# ----------------------------- in-kernel helpers -----------------------------

def _gelu(x):
    # TODO(synk): torch F.gelu defaults to the erf-exact form; the tanh
    # approximation is used for robust Mosaic lowering (~1e-3 max deviation).
    return jax.nn.gelu(x, approximate=True)


def _attention(qkv, wo_ref, head_num, dh_pad, TB, L):
    """Multi-head attention on a fused, head-padded QKV projection.

    qkv: (TB*L, 3*H*dh_pad) f32 laid out [Q heads | K heads | V heads]; the
    1/sqrt(head_dim) scale is already folded into the Q weights.  The output
    projection is accumulated per head (no concat) and every slice offset is a
    multiple of 128, so slicing is a zero-cost view.
    """
    R = TB * L
    hdp = head_num * dh_pad
    qkv3 = qkv.reshape(TB, L, 3 * hdp).astype(jnp.bfloat16)     # cast once
    out = None
    for h in range(head_num):                                   # tiny static unroll
        q = qkv3[..., h * dh_pad:(h + 1) * dh_pad]
        k = qkv3[..., hdp + h * dh_pad:hdp + (h + 1) * dh_pad]
        v = qkv3[..., 2 * hdp + h * dh_pad:2 * hdp + (h + 1) * dh_pad]
        s = jnp.einsum("bld,bmd->blm", q, k,
                       preferred_element_type=jnp.float32)
        s = s - jnp.max(s, axis=-1, keepdims=True)
        p = jnp.exp(s)
        p = p * pl.reciprocal(jnp.sum(p, axis=-1, keepdims=True), approx=True)
        o = jnp.einsum("blm,bmd->bld", p.astype(jnp.bfloat16), v,
                       preferred_element_type=jnp.float32)
        contrib = jnp.dot(o.reshape(R, dh_pad).astype(jnp.bfloat16), wo_ref[h],
                          preferred_element_type=jnp.float32)
        out = contrib if out is None else out + contrib
    return out                                                   # (R, Dp) f32


# --------------------------------- the kernel --------------------------------

def _decomposition_kernel(model_dim, head_num, dh_pad,
                          trend_ref, time_ref,
                          wqkv_tr, wqkv_ti, wo_mix, wqkv_x, wo_ord,
                          conv1_w, conv2_w, fc1_w, fc2_w,
                          vec_d, vec_f, fc2_b,
                          stable_ref, trend_out_ref):
    TB, L, Dp = trend_ref.shape
    R = TB * L

    trend = trend_ref[...].reshape(R, Dp)               # f32, zero-padded lanes
    trend_bf = trend.astype(jnp.bfloat16)
    time_bf = time_ref[...].reshape(R, Dp)               # already bf16

    vd = vec_d[...]    # (5, Dp): conv2_b, norm1_g, norm1_b, norm2_g, norm2_b
    vf = vec_f[...]    # (2, Fp): conv1_b, fc1_b

    # Lane mask / divisor so the zero-padded model_dim lanes stay exact.
    d_mask = (jax.lax.broadcasted_iota(jnp.int32, (1, Dp), 1)
              < model_dim).astype(jnp.float32)
    inv_d = 1.0 / model_dim

    def layer_norm(x, g, b, eps=1e-5):
        mu = jnp.sum(x, axis=-1, keepdims=True) * inv_d
        xc = (x - mu) * d_mask
        var = jnp.sum(xc * xc, axis=-1, keepdims=True) * inv_d
        return xc * jax.lax.rsqrt(var + eps) * g + b

    # ---- MixAttention(trend, time): fused QKV projection, no residual -------
    qkv = (jnp.dot(trend_bf, wqkv_tr[...], preferred_element_type=jnp.float32)
           + jnp.dot(time_bf, wqkv_ti[...], preferred_element_type=jnp.float32))
    x = _attention(qkv, wo_mix, head_num, dh_pad, TB, L)             # (R, Dp)

    # ---- OrdinaryAttention(x): self-attention + residual ---------------------
    qkv2 = jnp.dot(x.astype(jnp.bfloat16), wqkv_x[...],
                   preferred_element_type=jnp.float32)
    stable = x + _attention(qkv2, wo_ord, head_num, dh_pad, TB, L)   # (R, Dp)

    # ---- conv1d(k=1) feed-forward, residual, layer norms ----------------------
    y = _gelu(jnp.dot(stable.astype(jnp.bfloat16), conv1_w[...],
                      preferred_element_type=jnp.float32) + vf[0:1, :])
    y = jnp.dot(y.astype(jnp.bfloat16), conv2_w[...],
                preferred_element_type=jnp.float32) + vd[0:1, :]
    stable = layer_norm(y + stable, vd[1:2, :], vd[2:3, :])
    trend_new = layer_norm(trend - stable, vd[3:4, :], vd[4:5, :])

    # ---- stable head: fc2(gelu(fc1(stable))), lane-dense padded width --------
    out = _gelu(jnp.dot(stable.astype(jnp.bfloat16), fc1_w[...],
                        preferred_element_type=jnp.float32) + vf[1:2, :])
    out = jnp.dot(out.astype(jnp.bfloat16), fc2_w[...],
                  preferred_element_type=jnp.float32) + fc2_b[...]

    stable_ref[...] = out.reshape(TB, L, -1).astype(stable_ref.dtype)
    trend_out_ref[...] = trend_new.reshape(TB, L, Dp).astype(trend_out_ref.dtype)


# ------------------------------ params & packing ------------------------------

def init_logical_params(key, model_dim, ff_dim, atten_dim, feature_num, head_num):
    """Unpadded f32 parameters mirroring the PyTorch module (eval mode)."""
    inner = head_num * atten_dim
    keys = iter(jax.random.split(key, 24))

    def w(shape):
        return (jax.random.normal(next(keys), shape, jnp.float32)
                * math.sqrt(2.0 / shape[0]))

    def small(shape):
        return 0.05 * jax.random.normal(next(keys), shape, jnp.float32)

    return {
        "wq_tr": w((model_dim, inner)), "wq_ti": w((model_dim, inner)),
        "wk_tr": w((model_dim, inner)), "wk_ti": w((model_dim, inner)),
        "wv_tr": w((model_dim, inner)), "wv_ti": w((model_dim, inner)),
        "wo_mix": w((inner, model_dim)),
        "wq2": w((model_dim, inner)), "wk2": w((model_dim, inner)),
        "wv2": w((model_dim, inner)), "wo2": w((inner, model_dim)),
        "conv1_w": w((model_dim, ff_dim)), "conv1_b": small((ff_dim,)),
        "conv2_w": w((ff_dim, model_dim)), "conv2_b": small((model_dim,)),
        "fc1_w": w((model_dim, ff_dim)), "fc1_b": small((ff_dim,)),
        "fc2_w": w((ff_dim, feature_num)), "fc2_b": small((feature_num,)),
        "norm1_g": 1.0 + small((model_dim,)), "norm1_b": small((model_dim,)),
        "norm2_g": 1.0 + small((model_dim,)), "norm2_b": small((model_dim,)),
    }


def pack_kernel_params(lp, *, model_dim, ff_dim, atten_dim, feature_num,
                       head_num):
    """Pad to lane-dense shapes, fold the softmax scale into Q, cast matmul
    weights to bf16, and row-pack the small bias / LayerNorm vectors."""
    D, F, dh, H = model_dim, ff_dim, atten_dim, head_num
    Dp, Fp = _round_up(D, _LANE), _round_up(F, _LANE)
    dhp, Pout = _round_up(dh, _LANE), _round_up(feature_num, _LANE)
    q_scale = 1.0 / math.sqrt(dh)

    def pad2(w, rows, cols):
        z = jnp.zeros((rows, cols), jnp.float32)
        return z.at[:w.shape[0], :w.shape[1]].set(w)

    def pack_qkv(wq, wk, wv):
        def seg(w, s):
            w = (w * s).reshape(D, H, dh)
            z = jnp.zeros((Dp, H, dhp), jnp.float32)
            return z.at[:D, :, :dh].set(w).reshape(Dp, H * dhp)
        return jnp.concatenate([seg(wq, q_scale), seg(wk, 1.0), seg(wv, 1.0)],
                               axis=-1).astype(jnp.bfloat16)

    def pack_wo(wo):
        z = jnp.zeros((H, dhp, Dp), jnp.float32)
        return z.at[:, :dh, :D].set(wo.reshape(H, dh, D)).astype(jnp.bfloat16)

    def row(v, width):
        return jnp.zeros((width,), jnp.float32).at[:v.shape[0]].set(v)

    return {
        "wqkv_tr": pack_qkv(lp["wq_tr"], lp["wk_tr"], lp["wv_tr"]),
        "wqkv_ti": pack_qkv(lp["wq_ti"], lp["wk_ti"], lp["wv_ti"]),
        "wo_mix": pack_wo(lp["wo_mix"]),
        "wqkv_x": pack_qkv(lp["wq2"], lp["wk2"], lp["wv2"]),
        "wo_ord": pack_wo(lp["wo2"]),
        "conv1_w": pad2(lp["conv1_w"], Dp, Fp).astype(jnp.bfloat16),
        "conv2_w": pad2(lp["conv2_w"], Fp, Dp).astype(jnp.bfloat16),
        "fc1_w": pad2(lp["fc1_w"], Dp, Fp).astype(jnp.bfloat16),
        "fc2_w": pad2(lp["fc2_w"], Fp, Pout).astype(jnp.bfloat16),
        # Padded LayerNorm gammas/betas are zero, so padded lanes stay zero.
        "vec_d": jnp.stack([row(lp["conv2_b"], Dp), row(lp["norm1_g"], Dp),
                            row(lp["norm1_b"], Dp), row(lp["norm2_g"], Dp),
                            row(lp["norm2_b"], Dp)]),
        "vec_f": jnp.stack([row(lp["conv1_b"], Fp), row(lp["fc1_b"], Fp)]),
        "fc2_b": row(lp["fc2_b"], Pout)[None, :],
    }


# --------------------------------- the wrapper --------------------------------

def _cores_per_chip():
    """Best-effort TensorCore count per chip (v4/v5p/v7x expose 2 per device)."""
    try:
        kind = jax.devices()[0].device_kind.lower()
    except Exception:
        return 1
    return 2 if any(t in kind for t in ("v7", "7x", "v4", "v5p")) else 1


def _vmem_capacity_bytes():
    try:
        return int(pltpu.get_tpu_info().vmem_capacity_bytes)
    except Exception:
        return 64 * 1024 * 1024          # conservative (v7x per-core) fallback


def decomposition_block(trend, time_feats, params, *, feature_num,
                        batch_block=None):
    B, L, D = trend.shape
    Dp = params["wqkv_tr"].shape[0]
    head_num, dh_pad = params["wo_mix"].shape[0], params["wo_mix"].shape[1]
    Fp = params["conv1_w"].shape[1]
    Pout = params["fc2_w"].shape[1]
    qkv_w = params["wqkv_tr"].shape[1]

    # Lane-pad the activations.  `time` only feeds bf16 matmuls -> ship it bf16;
    # `trend` stays f32 (it feeds the f32 residual / LayerNorm path).
    pad = ((0, 0), (0, 0), (0, Dp - D))
    trend_p = jnp.pad(trend.astype(jnp.float32), pad)
    time_p = jnp.pad(time_feats.astype(jnp.float32), pad).astype(jnp.bfloat16)

    vmem_cap = _vmem_capacity_bytes()
    weight_bytes = sum(int(params[n].size) * params[n].dtype.itemsize
                       for n in _PARAM_ORDER)

    def act_tile_bytes(tb):
        # double-buffered activation tiles (trend f32, time bf16) + output tiles
        return 2 * tb * L * (4 * Dp + 2 * Dp + 4 * Pout + 4 * Dp)

    if batch_block is None:
        batch_block = B
        # Multi-TensorCore chips (v4/v5p/v7x): always give the second core a
        # grid step as long as each step keeps >= one (8, 128) sublane tile.
        if _cores_per_chip() > 1 and B % 2 == 0 and (B // 2) * L >= 8:
            batch_block = B // 2
        # Shrink only when the tiles would blow the VMEM budget.
        while (batch_block % 2 == 0 and
               act_tile_bytes(batch_block) + 2 * weight_bytes > 0.6 * vmem_cap):
            batch_block //= 2
    assert B % batch_block == 0
    grid = (B // batch_block,)

    footprint = act_tile_bytes(batch_block) + 2 * weight_bytes
    vmem_limit = int(min(max(2 * footprint, 16 * 1024 * 1024),
                         int(0.8 * vmem_cap)))

    # Advisory cost estimate (weights are DMA'd once -> no grid multiplier).
    R = B * L
    matmul_flops = 2 * R * (3 * Dp * qkv_w + 2 * head_num * dh_pad * Dp
                            + 3 * Dp * Fp + Fp * Pout)
    attn_flops = 2 * 4 * B * head_num * L * L * dh_pad
    transcendentals = 2 * B * head_num * L * L + 2 * R * Fp
    bytes_accessed = (trend_p.size * 4 + time_p.size * 2
                      + B * L * (Pout + Dp) * 4 + weight_bytes)
    cost = pl.CostEstimate(flops=int(matmul_flops + attn_flops),
                           transcendentals=int(transcendentals),
                           bytes_accessed=int(bytes_accessed))

    kernel = partial(_decomposition_kernel, D, head_num, dh_pad)

    def act_spec(width):
        return pl.BlockSpec((batch_block, L, width), lambda b: (b, 0, 0))

    out_shape = (jax.ShapeDtypeStruct((B, L, Pout), trend.dtype),   # stable
                 jax.ShapeDtypeStruct((B, L, Dp), trend.dtype))     # trend
    out_specs = (act_spec(Pout), act_spec(Dp))

    def make_call(weight_mode):
        in_specs = [act_spec(Dp), act_spec(Dp)]
        for name in _PARAM_ORDER:
            w = params[name]
            kwargs = {} if weight_mode is None else {"pipeline_mode": weight_mode}
            in_specs.append(
                pl.BlockSpec(w.shape, lambda b, _n=w.ndim: (0,) * _n, **kwargs))
        return pl.pallas_call(
            kernel,
            out_shape=out_shape,
            grid=grid,
            in_specs=in_specs,
            out_specs=out_specs,
            compiler_params=pltpu.CompilerParams(
                dimension_semantics=("parallel",),
                vmem_limit_bytes=vmem_limit),
            cost_estimate=cost)

    args = (trend_p, time_p) + tuple(params[n] for n in _PARAM_ORDER)
    try:
        # Grid-invariant weights only need a single VMEM buffer.
        stable_pad, trend_pad = make_call(pl.Buffered(1))(*args)
    except Exception:
        # Fall back to default double-buffering if this Pallas build rejects
        # buffer_count=1 for pipeline_mode.
        stable_pad, trend_pad = make_call(None)(*args)

    return stable_pad[..., :feature_num], trend_pad[..., :D]


# --------------------------- pure-JAX reference check -------------------------

def _reference(trend, time_feats, lp, head_num, head_dim):
    """Same math in plain JAX.  Matmul weights are rounded to bf16 to mirror
    what the kernel feeds the MXU; everything else stays f32."""
    bf = lambda n: lp[n].astype(jnp.bfloat16).astype(jnp.float32)

    def mha(q, k, v, wo):
        outs = []
        for h in range(head_num):
            sl = slice(h * head_dim, (h + 1) * head_dim)
            s = jnp.einsum("bld,bmd->blm", q[..., sl], k[..., sl])
            p = jax.nn.softmax(s / math.sqrt(head_dim), axis=-1)
            outs.append(jnp.einsum("blm,bmd->bld", p, v[..., sl]))
        return jnp.concatenate(outs, axis=-1) @ wo

    def ln(x, g, b, eps=1e-5):
        mu = jnp.mean(x, -1, keepdims=True)
        var = jnp.mean((x - mu) ** 2, -1, keepdims=True)
        return (x - mu) * jax.lax.rsqrt(var + eps) * g + b

    q = trend @ bf("wq_tr") + time_feats @ bf("wq_ti")
    k = trend @ bf("wk_tr") + time_feats @ bf("wk_ti")
    v = trend @ bf("wv_tr") + time_feats @ bf("wv_ti")
    x = mha(q, k, v, bf("wo_mix"))
    stable = x + mha(x @ bf("wq2"), x @ bf("wk2"), x @ bf("wv2"), bf("wo2"))
    y = jax.nn.gelu(stable @ bf("conv1_w") + lp["conv1_b"], approximate=True)
    y = y @ bf("conv2_w") + lp["conv2_b"]
    stable = ln(y + stable, lp["norm1_g"], lp["norm1_b"])
    trend_new = ln(trend - stable, lp["norm2_g"], lp["norm2_b"])
    out = jax.nn.gelu(stable @ bf("fc1_w") + lp["fc1_b"], approximate=True)
    out = out @ bf("fc2_w") + lp["fc2_b"]
    return out, trend_new


# ------------------------------------ main ------------------------------------

if __name__ == "__main__":
    B, L = 2, 8
    model_dim, ff_dim, atten_dim, feature_num, head_num = 32, 64, 16, 4, 2

    root = jax.random.PRNGKey(0)
    k_params, k_trend, k_time = jax.random.split(root, 3)

    logical = init_logical_params(
        k_params, model_dim, ff_dim, atten_dim, feature_num, head_num)
    packed = pack_kernel_params(
        logical, model_dim=model_dim, ff_dim=ff_dim, atten_dim=atten_dim,
        feature_num=feature_num, head_num=head_num)

    trend = jax.random.normal(k_trend, (B, L, model_dim), jnp.float32)
    time_feats = jax.random.normal(k_time, (B, L, model_dim), jnp.float32)

    stable_out, trend_out = decomposition_block(
        trend, time_feats, packed, feature_num=feature_num)
    jax.block_until_ready((stable_out, trend_out))

    assert stable_out.shape == (B, L, feature_num)
    assert trend_out.shape == (B, L, model_dim)
    assert bool(jnp.all(jnp.isfinite(stable_out)))
    assert bool(jnp.all(jnp.isfinite(trend_out)))

    # Loose check vs. the pure-JAX reference (bf16 matmul activations and the
    # approximate softmax reciprocal introduce small deviations).
    stable_ref, trend_ref = _reference(trend, time_feats, logical,
                                       head_num, atten_dim)
    err_s = float(jnp.max(jnp.abs(stable_out - stable_ref)))
    err_t = float(jnp.max(jnp.abs(trend_out - trend_ref)))
    assert err_s < 0.3 and err_t < 0.3, (err_s, err_t)

    print("KERNEL_OK")
</pallas_src>

<mosaic_0001>
module attributes {stable_mosaic.version = 11 : i64} {
  func.func @_decomposition_kernel(%arg0: i32, %arg1: memref<2x8x128xf32, #tpu.memory_space<vmem>>, %arg2: memref<2x8x128xbf16, #tpu.memory_space<vmem>>, %arg3: memref<128x768xbf16, #tpu.memory_space<vmem>>, %arg4: memref<128x768xbf16, #tpu.memory_space<vmem>>, %arg5: memref<2x128x128xbf16, #tpu.memory_space<vmem>>, %arg6: memref<128x768xbf16, #tpu.memory_space<vmem>>, %arg7: memref<2x128x128xbf16, #tpu.memory_space<vmem>>, %arg8: memref<128x128xbf16, #tpu.memory_space<vmem>>, %arg9: memref<128x128xbf16, #tpu.memory_space<vmem>>, %arg10: memref<128x128xbf16, #tpu.memory_space<vmem>>, %arg11: memref<128x128xbf16, #tpu.memory_space<vmem>>, %arg12: memref<5x128xf32, #tpu.memory_space<vmem>>, %arg13: memref<2x128xf32, #tpu.memory_space<vmem>>, %arg14: memref<1x128xf32, #tpu.memory_space<vmem>>, %arg15: memref<2x8x128xf32, #tpu.memory_space<vmem>>, %arg16: memref<2x8x128xf32, #tpu.memory_space<vmem>>) attributes {dimension_semantics = [#tpu.dimension_semantics<parallel>], iteration_bounds = array<i64: 1>, scalar_prefetch = 0 : i64, scratch_operands = 0 : i64, tpu.core_type = #tpu.core_type<tc>, window_params = [{transform_indices = @transform_0, window_bounds = array<i64: 2, 8, 128>}, {transform_indices = @transform_1, window_bounds = array<i64: 2, 8, 128>}, {pipeline_mode = #tpu.pipeline_mode<synchronous>, transform_indices = @transform_2, window_bounds = array<i64: 128, 768>}, {pipeline_mode = #tpu.pipeline_mode<synchronous>, transform_indices = @transform_3, window_bounds = array<i64: 128, 768>}, {pipeline_mode = #tpu.pipeline_mode<synchronous>, transform_indices = @transform_4, window_bounds = array<i64: 2, 128, 128>}, {pipeline_mode = #tpu.pipeline_mode<synchronous>, transform_indices = @transform_5, window_bounds = array<i64: 128, 768>}, {pipeline_mode = #tpu.pipeline_mode<synchronous>, transform_indices = @transform_6, window_bounds = array<i64: 2, 128, 128>}, {pipeline_mode = #tpu.pipeline_mode<synchronous>, transform_indices = @transform_7, window_bounds = array<i64: 128, 128>}, {pipeline_mode = #tpu.pipeline_mode<synchronous>, transform_indices = @transform_8, window_bounds = array<i64: 128, 128>}, {pipeline_mode = #tpu.pipeline_mode<synchronous>, transform_indices = @transform_9, window_bounds = array<i64: 128, 128>}, {pipeline_mode = #tpu.pipeline_mode<synchronous>, transform_indices = @transform_10, window_bounds = array<i64: 128, 128>}, {pipeline_mode = #tpu.pipeline_mode<synchronous>, transform_indices = @transform_11, window_bounds = array<i64: 5, 128>}, {pipeline_mode = #tpu.pipeline_mode<synchronous>, transform_indices = @transform_12, window_bounds = array<i64: 2, 128>}, {pipeline_mode = #tpu.pipeline_mode<synchronous>, transform_indices = @transform_13, window_bounds = array<i64: 1, 128>}, {transform_indices = @transform_14, window_bounds = array<i64: 2, 8, 128>}, {transform_indices = @transform_15, window_bounds = array<i64: 2, 8, 128>}]} {
    %c0 = arith.constant 0 : index
    %c0_0 = arith.constant 0 : index
    %c0_1 = arith.constant 0 : index
    %0 = vector.load %arg1[%c0, %c0_0, %c0_1] : memref<2x8x128xf32, #tpu.memory_space<vmem>>, vector<2x8x128xf32>
    %1 = vector.shape_cast %0 : vector<2x8x128xf32> to vector<16x128xf32>
    %2 = arith.truncf %1 : vector<16x128xf32> to vector<16x128xbf16>
    %c0_2 = arith.constant 0 : index
    %c0_3 = arith.constant 0 : index
    %c0_4 = arith.constant 0 : index
    %3 = vector.load %arg2[%c0_2, %c0_3, %c0_4] : memref<2x8x128xbf16, #tpu.memory_space<vmem>>, vector<2x8x128xbf16>
    %4 = vector.shape_cast %3 : vector<2x8x128xbf16> to vector<16x128xbf16>
    %c0_5 = arith.constant 0 : index
    %c0_6 = arith.constant 0 : index
    %5 = vector.load %arg12[%c0_5, %c0_6] : memref<5x128xf32, #tpu.memory_space<vmem>>, vector<5x128xf32>
    %c0_7 = arith.constant 0 : index
    %c0_8 = arith.constant 0 : index
    %6 = vector.load %arg13[%c0_7, %c0_8] : memref<2x128xf32, #tpu.memory_space<vmem>>, vector<2x128xf32>
    %7 = tpu.iota {dimensions = array<i32: 1>} : vector<1x128xi32>
    %c32_i32 = arith.constant 32 : i32
    %8 = vector.broadcast %c32_i32 : i32 to vector<1x128xi32>
    %9 = arith.cmpi slt, %7, %8 : vector<1x128xi32>
    %10 = arith.extui %9 : vector<1x128xi1> to vector<1x128xi32>
    %11 = arith.sitofp %10 : vector<1x128xi32> to vector<1x128xf32>
    %c0_9 = arith.constant 0 : index
    %c0_10 = arith.constant 0 : index
    %12 = vector.load %arg3[%c0_9, %c0_10] : memref<128x768xbf16, #tpu.memory_space<vmem>>, vector<128x768xbf16>
    %cst = arith.constant dense<0.000000e+00> : vector<16x768xf32>
    %13 = tpu.matmul %2, %12, %cst {dimension_numbers = #tpu.dot_dimension_numbers<[1], [0], [0], [1], [0, 0, 1, 1], [], []>} : vector<16x128xbf16>, vector<128x768xbf16>, vector<16x768xf32> -> vector<16x768xf32>
    %c0_11 = arith.constant 0 : index
    %c0_12 = arith.constant 0 : index
    %14 = vector.load %arg4[%c0_11, %c0_12] : memref<128x768xbf16, #tpu.memory_space<vmem>>, vector<128x768xbf16>
    %cst_13 = arith.constant dense<0.000000e+00> : vector<16x768xf32>
    %15 = tpu.matmul %4, %14, %cst_13 {dimension_numbers = #tpu.dot_dimension_numbers<[1], [0], [0], [1], [0, 0, 1, 1], [], []>} : vector<16x128xbf16>, vector<128x768xbf16>, vector<16x768xf32> -> vector<16x768xf32>
    %16 = arith.addf %13, %15 : vector<16x768xf32>
    %17 = vector.shape_cast %16 : vector<16x768xf32> to vector<2x8x768xf32>
    %18 = arith.truncf %17 : vector<2x8x768xf32> to vector<2x8x768xbf16>
    %19 = vector.extract_strided_slice %18 {offsets = [0, 0, 0], sizes = [2, 8, 128], strides = [1, 1, 1]} : vector<2x8x768xbf16> to vector<2x8x128xbf16>
    %20 = vector.extract_strided_slice %18 {offsets = [0, 0, 256], sizes = [2, 8, 128], strides = [1, 1, 1]} : vector<2x8x768xbf16> to vector<2x8x128xbf16>
    %21 = vector.extract_strided_slice %18 {offsets = [0, 0, 512], sizes = [2, 8, 128], strides = [1, 1, 1]} : vector<2x8x768xbf16> to vector<2x8x128xbf16>
    "tpu.trace_start"() <{level = 10 : i32, message = "bld,bmd->blm"}> : () -> ()
    %cst_14 = arith.constant dense<0.000000e+00> : vector<2x8x8xf32>
    %22 = tpu.matmul %19, %20, %cst_14 {dimension_numbers = #tpu.dot_dimension_numbers<[2], [2], [1], [1], [0, 0, 0, 1, 1, 1], [0], [0]>} : vector<2x8x128xbf16>, vector<2x8x128xbf16>, vector<2x8x8xf32> -> vector<2x8x8xf32>
    "tpu.trace_stop"() : () -> ()
    %cst_15 = arith.constant dense<0xFF800000> : vector<2x8xf32>
    %23 = vector.multi_reduction <maximumf>, %22, %cst_15 [2] : vector<2x8x8xf32> to vector<2x8xf32>
    %24 = vector.shape_cast %23 : vector<2x8xf32> to vector<2x8x1xf32>
    %25 = vector.broadcast %24 : vector<2x8x1xf32> to vector<2x8x8xf32>
    %26 = arith.subf %22, %25 : vector<2x8x8xf32>
    %27 = math.exp %26 : vector<2x8x8xf32>
    %cst_16 = arith.constant dense<0.000000e+00> : vector<2x8xf32>
    %28 = vector.multi_reduction <add>, %27, %cst_16 [2] : vector<2x8x8xf32> to vector<2x8xf32>
    %29 = vector.shape_cast %28 : vector<2x8xf32> to vector<2x8x1xf32>
    %30 = tpu.reciprocal %29 {approx = true} : vector<2x8x1xf32> -> vector<2x8x1xf32>
    %31 = vector.broadcast %30 : vector<2x8x1xf32> to vector<2x8x8xf32>
    %32 = arith.mulf %27, %31 : vector<2x8x8xf32>
    %33 = arith.truncf %32 : vector<2x8x8xf32> to vector<2x8x8xbf16>
    "tpu.trace_start"() <{level = 10 : i32, message = "blm,bmd->bld"}> : () -> ()
    %cst_17 = arith.constant dense<0.000000e+00> : vector<2x8x128xf32>
    %34 = tpu.matmul %33, %21, %cst_17 {dimension_numbers = #tpu.dot_dimension_numbers<[2], [1], [1], [2], [0, 0, 0, 1, 1, 2], [0], [0]>} : vector<2x8x8xbf16>, vector<2x8x128xbf16>, vector<2x8x128xf32> -> vector<2x8x128xf32>
    "tpu.trace_stop"() : () -> ()
    %35 = vector.shape_cast %34 : vector<2x8x128xf32> to vector<16x128xf32>
    %36 = arith.truncf %35 : vector<16x128xf32> to vector<16x128xbf16>
    %c0_18 = arith.constant 0 : index
    %c0_19 = arith.constant 0 : index
    %c0_20 = arith.constant 0 : index
    %37 = vector.load %arg5[%c0_18, %c0_19, %c0_20] : memref<2x128x128xbf16, #tpu.memory_space<vmem>>, vector<1x128x128xbf16>
    %38 = vector.shape_cast %37 : vector<1x128x128xbf16> to vector<128x128xbf16>
    %cst_21 = arith.constant dense<0.000000e+00> : vector<16x128xf32>
    %39 = tpu.matmul %36, %38, %cst_21 {dimension_numbers = #tpu.dot_dimension_numbers<[1], [0], [0], [1], [0, 0, 1, 1], [], []>} : vector<16x128xbf16>, vector<128x128xbf16>, vector<16x128xf32> -> vector<16x128xf32>
    %40 = vector.extract_strided_slice %18 {offsets = [0, 0, 128], sizes = [2, 8, 128], strides = [1, 1, 1]} : vector<2x8x768xbf16> to vector<2x8x128xbf16>
    %41 = vector.extract_strided_slice %18 {offsets = [0, 0, 384], sizes = [2, 8, 128], strides = [1, 1, 1]} : vector<2x8x768xbf16> to vector<2x8x128xbf16>
    %42 = vector.extract_strided_slice %18 {offsets = [0, 0, 640], sizes = [2, 8, 128], strides = [1, 1, 1]} : vector<2x8x768xbf16> to vector<2x8x128xbf16>
    "tpu.trace_start"() <{level = 10 : i32, message = "bld,bmd->blm"}> : () -> ()
    %cst_22 = arith.constant dense<0.000000e+00> : vector<2x8x8xf32>
    %43 = tpu.matmul %40, %41, %cst_22 {dimension_numbers = #tpu.dot_dimension_numbers<[2], [2], [1], [1], [0, 0, 0, 1, 1, 1], [0], [0]>} : vector<2x8x128xbf16>, vector<2x8x128xbf16>, vector<2x8x8xf32> -> vector<2x8x8xf32>
    "tpu.trace_stop"() : () -> ()
    %cst_23 = arith.constant dense<0xFF800000> : vector<2x8xf32>
    %44 = vector.multi_reduction <maximumf>, %43, %cst_23 [2] : vector<2x8x8xf32> to vector<2x8xf32>
    %45 = vector.shape_cast %44 : vector<2x8xf32> to vector<2x8x1xf32>
    %46 = vector.broadcast %45 : vector<2x8x1xf32> to vector<2x8x8xf32>
    %47 = arith.subf %43, %46 : vector<2x8x8xf32>
    %48 = math.exp %47 : vector<2x8x8xf32>
    %cst_24 = arith.constant dense<0.000000e+00> : vector<2x8xf32>
    %49 = vector.multi_reduction <add>, %48, %cst_24 [2] : vector<2x8x8xf32> to vector<2x8xf32>
    %50 = vector.shape_cast %49 : vector<2x8xf32> to vector<2x8x1xf32>
    %51 = tpu.reciprocal %50 {approx = true} : vector<2x8x1xf32> -> vector<2x8x1xf32>
    %52 = vector.broadcast %51 : vector<2x8x1xf32> to vector<2x8x8xf32>
    %53 = arith.mulf %48, %52 : vector<2x8x8xf32>
    %54 = arith.truncf %53 : vector<2x8x8xf32> to vector<2x8x8xbf16>
    "tpu.trace_start"() <{level = 10 : i32, message = "blm,bmd->bld"}> : () -> ()
    %cst_25 = arith.constant dense<0.000000e+00> : vector<2x8x128xf32>
    %55 = tpu.matmul %54, %42, %cst_25 {dimension_numbers = #tpu.dot_dimension_numbers<[2], [1], [1], [2], [0, 0, 0, 1, 1, 2], [0], [0]>} : vector<2x8x8xbf16>, vector<2x8x128xbf16>, vector<2x8x128xf32> -> vector<2x8x128xf32>
    "tpu.trace_stop"() : () -> ()
    %56 = vector.shape_cast %55 : vector<2x8x128xf32> to vector<16x128xf32>
    %57 = arith.truncf %56 : vector<16x128xf32> to vector<16x128xbf16>
    %c1 = arith.constant 1 : index
    %c0_26 = arith.constant 0 : index
    %c0_27 = arith.constant 0 : index
    %58 = vector.load %arg5[%c1, %c0_26, %c0_27] : memref<2x128x128xbf16, #tpu.memory_space<vmem>>, vector<1x128x128xbf16>
    %59 = vector.shape_cast %58 : vector<1x128x128xbf16> to vector<128x128xbf16>
    %cst_28 = arith.constant dense<0.000000e+00> : vector<16x128xf32>
    %60 = tpu.matmul %57, %59, %cst_28 {dimension_numbers = #tpu.dot_dimension_numbers<[1], [0], [0], [1], [0, 0, 1, 1], [], []>} : vector<16x128xbf16>, vector<128x128xbf16>, vector<16x128xf32> -> vector<16x128xf32>
    %61 = arith.addf %39, %60 : vector<16x128xf32>
    %62 = arith.truncf %61 : vector<16x128xf32> to vector<16x128xbf16>
    %c0_29 = arith.constant 0 : index
    %c0_30 = arith.constant 0 : index
    %63 = vector.load %arg6[%c0_29, %c0_30] : memref<128x768xbf16, #tpu.memory_space<vmem>>, vector<128x768xbf16>
    %cst_31 = arith.constant dense<0.000000e+00> : vector<16x768xf32>
    %64 = tpu.matmul %62, %63, %cst_31 {dimension_numbers = #tpu.dot_dimension_numbers<[1], [0], [0], [1], [0, 0, 1, 1], [], []>} : vector<16x128xbf16>, vector<128x768xbf16>, vector<16x768xf32> -> vector<16x768xf32>
    %65 = vector.shape_cast %64 : vector<16x768xf32> to vector<2x8x768xf32>
    %66 = arith.truncf %65 : vector<2x8x768xf32> to vector<2x8x768xbf16>
    %67 = vector.extract_strided_slice %66 {offsets = [0, 0, 0], sizes = [2, 8, 128], strides = [1, 1, 1]} : vector<2x8x768xbf16> to vector<2x8x128xbf16>
    %68 = vector.extract_strided_slice %66 {offsets = [0, 0, 256], sizes = [2, 8, 128], strides = [1, 1, 1]} : vector<2x8x768xbf16> to vector<2x8x128xbf16>
    %69 = vector.extract_strided_slice %66 {offsets = [0, 0, 512], sizes = [2, 8, 128], strides = [1, 1, 1]} : vector<2x8x768xbf16> to vector<2x8x128xbf16>
    "tpu.trace_start"() <{level = 10 : i32, message = "bld,bmd->blm"}> : () -> ()
    %cst_32 = arith.constant dense<0.000000e+00> : vector<2x8x8xf32>
    %70 = tpu.matmul %67, %68, %cst_32 {dimension_numbers = #tpu.dot_dimension_numbers<[2], [2], [1], [1], [0, 0, 0, 1, 1, 1], [0], [0]>} : vector<2x8x128xbf16>, vector<2x8x128xbf16>, vector<2x8x8xf32> -> vector<2x8x8xf32>
    "tpu.trace_stop"() : () -> ()
    %cst_33 = arith.constant dense<0xFF800000> : vector<2x8xf32>
    %71 = vector.multi_reduction <maximumf>, %70, %cst_33 [2] : vector<2x8x8xf32> to vector<2x8xf32>
    %72 = vector.shape_cast %71 : vector<2x8xf32> to vector<2x8x1xf32>
    %73 = vector.broadcast %72 : vector<2x8x1xf32> to vector<2x8x8xf32>
    %74 = arith.subf %70, %73 : vector<2x8x8xf32>
    %75 = math.exp %74 : vector<2x8x8xf32>
    %cst_34 = arith.constant dense<0.000000e+00> : vector<2x8xf32>
    %76 = vector.multi_reduction <add>, %75, %cst_34 [2] : vector<2x8x8xf32> to vector<2x8xf32>
    %77 = vector.shape_cast %76 : vector<2x8xf32> to vector<2x8x1xf32>
    %78 = tpu.reciprocal %77 {approx = true} : vector<2x8x1xf32> -> vector<2x8x1xf32>
    %79 = vector.broadcast %78 : vector<2x8x1xf32> to vector<2x8x8xf32>
    %80 = arith.mulf %75, %79 : vector<2x8x8xf32>
    %81 = arith.truncf %80 : vector<2x8x8xf32> to vector<2x8x8xbf16>
    "tpu.trace_start"() <{level = 10 : i32, message = "blm,bmd->bld"}> : () -> ()
    %cst_35 = arith.constant dense<0.000000e+00> : vector<2x8x128xf32>
    %82 = tpu.matmul %81, %69, %cst_35 {dimension_numbers = #tpu.dot_dimension_numbers<[2], [1], [1], [2], [0, 0, 0, 1, 1, 2], [0], [0]>} : vector<2x8x8xbf16>, vector<2x8x128xbf16>, vector<2x8x128xf32> -> vector<2x8x128xf32>
    "tpu.trace_stop"() : () -> ()
    %83 = vector.shape_cast %82 : vector<2x8x128xf32> to vector<16x128xf32>
    %84 = arith.truncf %83 : vector<16x128xf32> to vector<16x128xbf16>
    %c0_36 = arith.constant 0 : index
    %c0_37 = arith.constant 0 : index
    %c0_38 = arith.constant 0 : index
    %85 = vector.load %arg7[%c0_36, %c0_37, %c0_38] : memref<2x128x128xbf16, #tpu.memory_space<vmem>>, vector<1x128x128xbf16>
    %86 = vector.shape_cast %85 : vector<1x128x128xbf16> to vector<128x128xbf16>
    %cst_39 = arith.constant dense<0.000000e+00> : vector<16x128xf32>
    %87 = tpu.matmul %84, %86, %cst_39 {dimension_numbers = #tpu.dot_dimension_numbers<[1], [0], [0], [1], [0, 0, 1, 1], [], []>} : vector<16x128xbf16>, vector<128x128xbf16>, vector<16x128xf32> -> vector<16x128xf32>
    %88 = vector.extract_strided_slice %66 {offsets = [0, 0, 128], sizes = [2, 8, 128], strides = [1, 1, 1]} : vector<2x8x768xbf16> to vector<2x8x128xbf16>
    %89 = vector.extract_strided_slice %66 {offsets = [0, 0, 384], sizes = [2, 8, 128], strides = [1, 1, 1]} : vector<2x8x768xbf16> to vector<2x8x128xbf16>
    %90 = vector.extract_strided_slice %66 {offsets = [0, 0, 640], sizes = [2, 8, 128], strides = [1, 1, 1]} : vector<2x8x768xbf16> to vector<2x8x128xbf16>
    "tpu.trace_start"() <{level = 10 : i32, message = "bld,bmd->blm"}> : () -> ()
    %cst_40 = arith.constant dense<0.000000e+00> : vector<2x8x8xf32>
    %91 = tpu.matmul %88, %89, %cst_40 {dimension_numbers = #tpu.dot_dimension_numbers<[2], [2], [1], [1], [0, 0, 0, 1, 1, 1], [0], [0]>} : vector<2x8x128xbf16>, vector<2x8x128xbf16>, vector<2x8x8xf32> -> vector<2x8x8xf32>
    "tpu.trace_stop"() : () -> ()
    %cst_41 = arith.constant dense<0xFF800000> : vector<2x8xf32>
    %92 = vector.multi_reduction <maximumf>, %91, %cst_41 [2] : vector<2x8x8xf32> to vector<2x8xf32>
    %93 = vector.shape_cast %92 : vector<2x8xf32> to vector<2x8x1xf32>
    %94 = vector.broadcast %93 : vector<2x8x1xf32> to vector<2x8x8xf32>
    %95 = arith.subf %91, %94 : vector<2x8x8xf32>
    %96 = math.exp %95 : vector<2x8x8xf32>
    %cst_42 = arith.constant dense<0.000000e+00> : vector<2x8xf32>
    %97 = vector.multi_reduction <add>, %96, %cst_42 [2] : vector<2x8x8xf32> to vector<2x8xf32>
    %98 = vector.shape_cast %97 : vector<2x8xf32> to vector<2x8x1xf32>
    %99 = tpu.reciprocal %98 {approx = true} : vector<2x8x1xf32> -> vector<2x8x1xf32>
    %100 = vector.broadcast %99 : vector<2x8x1xf32> to vector<2x8x8xf32>
    %101 = arith.mulf %96, %100 : vector<2x8x8xf32>
    %102 = arith.truncf %101 : vector<2x8x8xf32> to vector<2x8x8xbf16>
    "tpu.trace_start"() <{level = 10 : i32, message = "blm,bmd->bld"}> : () -> ()
    %cst_43 = arith.constant dense<0.000000e+00> : vector<2x8x128xf32>
    %103 = tpu.matmul %102, %90, %cst_43 {dimension_numbers = #tpu.dot_dimension_numbers<[2], [1], [1], [2], [0, 0, 0, 1, 1, 2], [0], [0]>} : vector<2x8x8xbf16>, vector<2x8x128xbf16>, vector<2x8x128xf32> -> vector<2x8x128xf32>
    "tpu.trace_stop"() : () -> ()
    %104 = vector.shape_cast %103 : vector<2x8x128xf32> to vector<16x128xf32>
    %105 = arith.truncf %104 : vector<16x128xf32> to vector<16x128xbf16>
    %c1_44 = arith.constant 1 : index
    %c0_45 = arith.constant 0 : index
    %c0_46 = arith.constant 0 : index
    %106 = vector.load %arg7[%c1_44, %c0_45, %c0_46] : memref<2x128x128xbf16, #tpu.memory_space<vmem>>, vector<1x128x128xbf16>
    %107 = vector.shape_cast %106 : vector<1x128x128xbf16> to vector<128x128xbf16>
    %cst_47 = arith.constant dense<0.000000e+00> : vector<16x128xf32>
    %108 = tpu.matmul %105, %107, %cst_47 {dimension_numbers = #tpu.dot_dimension_numbers<[1], [0], [0], [1], [0, 0, 1, 1], [], []>} : vector<16x128xbf16>, vector<128x128xbf16>, vector<16x128xf32> -> vector<16x128xf32>
    %109 = arith.addf %87, %108 : vector<16x128xf32>
    %110 = arith.addf %61, %109 : vector<16x128xf32>
    %111 = arith.truncf %110 : vector<16x128xf32> to vector<16x128xbf16>
    %c0_48 = arith.constant 0 : index
    %c0_49 = arith.constant 0 : index
    %112 = vector.load %arg8[%c0_48, %c0_49] : memref<128x128xbf16, #tpu.memory_space<vmem>>, vector<128x128xbf16>
    %cst_50 = arith.constant dense<0.000000e+00> : vector<16x128xf32>
    %113 = tpu.matmul %111, %112, %cst_50 {dimension_numbers = #tpu.dot_dimension_numbers<[1], [0], [0], [1], [0, 0, 1, 1], [], []>} : vector<16x128xbf16>, vector<128x128xbf16>, vector<16x128xf32> -> vector<16x128xf32>
    %114 = vector.extract_strided_slice %6 {offsets = [0, 0], sizes = [1, 128], strides = [1, 1]} : vector<2x128xf32> to vector<1x128xf32>
    %115 = vector.broadcast %114 : vector<1x128xf32> to vector<16x128xf32>
    %116 = arith.addf %113, %115 : vector<16x128xf32>
    %117 = arith.mulf %116, %116 : vector<16x128xf32>
    %118 = arith.mulf %116, %117 : vector<16x128xf32>
    %cst_51 = arith.constant 4.471500e-02 : f32
    %119 = vector.broadcast %cst_51 : f32 to vector<16x128xf32>
    %120 = arith.mulf %119, %118 : vector<16x128xf32>
    %121 = arith.addf %116, %120 : vector<16x128xf32>
    %cst_52 = arith.constant 0.797884583 : f32
    %122 = vector.broadcast %cst_52 : f32 to vector<16x128xf32>
    %123 = arith.mulf %122, %121 : vector<16x128xf32>
    %124 = math.tanh %123 : vector<16x128xf32>
    %cst_53 = arith.constant 1.000000e+00 : f32
    %125 = vector.broadcast %cst_53 : f32 to vector<16x128xf32>
    %126 = arith.addf %125, %124 : vector<16x128xf32>
    %cst_54 = arith.constant 5.000000e-01 : f32
    %127 = vector.broadcast %cst_54 : f32 to vector<16x128xf32>
    %128 = arith.mulf %127, %126 : vector<16x128xf32>
    %129 = arith.mulf %116, %128 : vector<16x128xf32>
    %130 = arith.truncf %129 : vector<16x128xf32> to vector<16x128xbf16>
    %c0_55 = arith.constant 0 : index
    %c0_56 = arith.constant 0 : index
    %131 = vector.load %arg9[%c0_55, %c0_56] : memref<128x128xbf16, #tpu.memory_space<vmem>>, vector<128x128xbf16>
    %cst_57 = arith.constant dense<0.000000e+00> : vector<16x128xf32>
    %132 = tpu.matmul %130, %131, %cst_57 {dimension_numbers = #tpu.dot_dimension_numbers<[1], [0], [0], [1], [0, 0, 1, 1], [], []>} : vector<16x128xbf16>, vector<128x128xbf16>, vector<16x128xf32> -> vector<16x128xf32>
    %133 = vector.extract_strided_slice %5 {offsets = [0, 0], sizes = [1, 128], strides = [1, 1]} : vector<5x128xf32> to vector<1x128xf32>
    %134 = vector.broadcast %133 : vector<1x128xf32> to vector<16x128xf32>
    %135 = arith.addf %132, %134 : vector<16x128xf32>
    %136 = arith.addf %135, %110 : vector<16x128xf32>
    %137 = vector.extract_strided_slice %5 {offsets = [1, 0], sizes = [1, 128], strides = [1, 1]} : vector<5x128xf32> to vector<1x128xf32>
    %138 = vector.extract_strided_slice %5 {offsets = [2, 0], sizes = [1, 128], strides = [1, 1]} : vector<5x128xf32> to vector<1x128xf32>
    %cst_58 = arith.constant dense<0.000000e+00> : vector<16xf32>
    %139 = vector.multi_reduction <add>, %136, %cst_58 [1] : vector<16x128xf32> to vector<16xf32>
    %140 = vector.shape_cast %139 : vector<16xf32> to vector<16x1xf32>
    %cst_59 = arith.constant 3.125000e-02 : f32
    %141 = vector.broadcast %cst_59 : f32 to vector<16x1xf32>
    %142 = arith.mulf %140, %141 : vector<16x1xf32>
    %143 = vector.broadcast %142 : vector<16x1xf32> to vector<16x128xf32>
    %144 = arith.subf %136, %143 : vector<16x128xf32>
    %145 = vector.broadcast %11 : vector<1x128xf32> to vector<16x128xf32>
    %146 = arith.mulf %144, %145 : vector<16x128xf32>
    %147 = arith.mulf %146, %146 : vector<16x128xf32>
    %cst_60 = arith.constant dense<0.000000e+00> : vector<16xf32>
    %148 = vector.multi_reduction <add>, %147, %cst_60 [1] : vector<16x128xf32> to vector<16xf32>
    %149 = vector.shape_cast %148 : vector<16xf32> to vector<16x1xf32>
    %cst_61 = arith.constant 3.125000e-02 : f32
    %150 = vector.broadcast %cst_61 : f32 to vector<16x1xf32>
    %151 = arith.mulf %149, %150 : vector<16x1xf32>
    %cst_62 = arith.constant 9.99999974E-6 : f32
    %152 = vector.broadcast %cst_62 : f32 to vector<16x1xf32>
    %153 = arith.addf %151, %152 : vector<16x1xf32>
    %154 = math.rsqrt %153 : vector<16x1xf32>
    %155 = vector.broadcast %154 : vector<16x1xf32> to vector<16x128xf32>
    %156 = arith.mulf %146, %155 : vector<16x128xf32>
    %157 = vector.broadcast %137 : vector<1x128xf32> to vector<16x128xf32>
    %158 = arith.mulf %156, %157 : vector<16x128xf32>
    %159 = vector.broadcast %138 : vector<1x128xf32> to vector<16x128xf32>
    %160 = arith.addf %158, %159 : vector<16x128xf32>
    %161 = arith.subf %1, %160 : vector<16x128xf32>
    %162 = vector.extract_strided_slice %5 {offsets = [3, 0], sizes = [1, 128], strides = [1, 1]} : vector<5x128xf32> to vector<1x128xf32>
    %163 = vector.extract_strided_slice %5 {offsets = [4, 0], sizes = [1, 128], strides = [1, 1]} : vector<5x128xf32> to vector<1x128xf32>
    %cst_63 = arith.constant dense<0.000000e+00> : vector<16xf32>
    %164 = vector.multi_reduction <add>, %161, %cst_63 [1] : vector<16x128xf32> to vector<16xf32>
    %165 = vector.shape_cast %164 : vector<16xf32> to vector<16x1xf32>
    %cst_64 = arith.constant 3.125000e-02 : f32
    %166 = vector.broadcast %cst_64 : f32 to vector<16x1xf32>
    %167 = arith.mulf %165, %166 : vector<16x1xf32>
    %168 = vector.broadcast %167 : vector<16x1xf32> to vector<16x128xf32>
    %169 = arith.subf %161, %168 : vector<16x128xf32>
    %170 = vector.broadcast %11 : vector<1x128xf32> to vector<16x128xf32>
    %171 = arith.mulf %169, %170 : vector<16x128xf32>
    %172 = arith.mulf %171, %171 : vector<16x128xf32>
    %cst_65 = arith.constant dense<0.000000e+00> : vector<16xf32>
    %173 = vector.multi_reduction <add>, %172, %cst_65 [1] : vector<16x128xf32> to vector<16xf32>
    %174 = vector.shape_cast %173 : vector<16xf32> to vector<16x1xf32>
    %cst_66 = arith.constant 3.125000e-02 : f32
    %175 = vector.broadcast %cst_66 : f32 to vector<16x1xf32>
    %176 = arith.mulf %174, %175 : vector<16x1xf32>
    %cst_67 = arith.constant 9.99999974E-6 : f32
    %177 = vector.broadcast %cst_67 : f32 to vector<16x1xf32>
    %178 = arith.addf %176, %177 : vector<16x1xf32>
    %179 = math.rsqrt %178 : vector<16x1xf32>
    %180 = vector.broadcast %179 : vector<16x1xf32> to vector<16x128xf32>
    %181 = arith.mulf %171, %180 : vector<16x128xf32>
    %182 = vector.broadcast %162 : vector<1x128xf32> to vector<16x128xf32>
    %183 = arith.mulf %181, %182 : vector<16x128xf32>
    %184 = vector.broadcast %163 : vector<1x128xf32> to vector<16x128xf32>
    %185 = arith.addf %183, %184 : vector<16x128xf32>
    %186 = arith.truncf %160 : vector<16x128xf32> to vector<16x128xbf16>
    %c0_68 = arith.constant 0 : index
    %c0_69 = arith.constant 0 : index
    %187 = vector.load %arg10[%c0_68, %c0_69] : memref<128x128xbf16, #tpu.memory_space<vmem>>, vector<128x128xbf16>
    %cst_70 = arith.constant dense<0.000000e+00> : vector<16x128xf32>
    %188 = tpu.matmul %186, %187, %cst_70 {dimension_numbers = #tpu.dot_dimension_numbers<[1], [0], [0], [1], [0, 0, 1, 1], [], []>} : vector<16x128xbf16>, vector<128x128xbf16>, vector<16x128xf32> -> vector<16x128xf32>
    %189 = vector.extract_strided_slice %6 {offsets = [1, 0], sizes = [1, 128], strides = [1, 1]} : vector<2x128xf32> to vector<1x128xf32>
    %190 = vector.broadcast %189 : vector<1x128xf32> to vector<16x128xf32>
    %191 = arith.addf %188, %190 : vector<16x128xf32>
    %192 = arith.mulf %191, %191 : vector<16x128xf32>
    %193 = arith.mulf %191, %192 : vector<16x128xf32>
    %cst_71 = arith.constant 4.471500e-02 : f32
    %194 = vector.broadcast %cst_71 : f32 to vector<16x128xf32>
    %195 = arith.mulf %194, %193 : vector<16x128xf32>
    %196 = arith.addf %191, %195 : vector<16x128xf32>
    %cst_72 = arith.constant 0.797884583 : f32
    %197 = vector.broadcast %cst_72 : f32 to vector<16x128xf32>
    %198 = arith.mulf %197, %196 : vector<16x128xf32>
    %199 = math.tanh %198 : vector<16x128xf32>
    %cst_73 = arith.constant 1.000000e+00 : f32
    %200 = vector.broadcast %cst_73 : f32 to vector<16x128xf32>
    %201 = arith.addf %200, %199 : vector<16x128xf32>
    %cst_74 = arith.constant 5.000000e-01 : f32
    %202 = vector.broadcast %cst_74 : f32 to vector<16x128xf32>
    %203 = arith.mulf %202, %201 : vector<16x128xf32>
    %204 = arith.mulf %191, %203 : vector<16x128xf32>
    %205 = arith.truncf %204 : vector<16x128xf32> to vector<16x128xbf16>
    %c0_75 = arith.constant 0 : index
    %c0_76 = arith.constant 0 : index
    %206 = vector.load %arg11[%c0_75, %c0_76] : memref<128x128xbf16, #tpu.memory_space<vmem>>, vector<128x128xbf16>
    %cst_77 = arith.constant dense<0.000000e+00> : vector<16x128xf32>
    %207 = tpu.matmul %205, %206, %cst_77 {dimension_numbers = #tpu.dot_dimension_numbers<[1], [0], [0], [1], [0, 0, 1, 1], [], []>} : vector<16x128xbf16>, vector<128x128xbf16>, vector<16x128xf32> -> vector<16x128xf32>
    %c0_78 = arith.constant 0 : index
    %c0_79 = arith.constant 0 : index
    %208 = vector.load %arg14[%c0_78, %c0_79] : memref<1x128xf32, #tpu.memory_space<vmem>>, vector<1x128xf32>
    %209 = vector.broadcast %208 : vector<1x128xf32> to vector<16x128xf32>
    %210 = arith.addf %207, %209 : vector<16x128xf32>
    %211 = vector.shape_cast %210 : vector<16x128xf32> to vector<2x8x128xf32>
    %c0_80 = arith.constant 0 : index
    %c0_81 = arith.constant 0 : index
    %c0_82 = arith.constant 0 : index
    %212 = vector.load %arg15[%c0_80, %c0_81, %c0_82] : memref<2x8x128xf32, #tpu.memory_space<vmem>>, vector<2x8x128xf32>
    tpu.vector_store %arg15[%c0_80, %c0_81, %c0_82], %211 {strides = array<i32>} : memref<2x8x128xf32, #tpu.memory_space<vmem>>, vector<2x8x128xf32>,
    %213 = vector.shape_cast %185 : vector<16x128xf32> to vector<2x8x128xf32>
    %c0_83 = arith.constant 0 : index
    %c0_84 = arith.constant 0 : index
    %c0_85 = arith.constant 0 : index
    %214 = vector.load %arg16[%c0_83, %c0_84, %c0_85] : memref<2x8x128xf32, #tpu.memory_space<vmem>>, vector<2x8x128xf32>
    tpu.vector_store %arg16[%c0_83, %c0_84, %c0_85], %213 {strides = array<i32>} : memref<2x8x128xf32, #tpu.memory_space<vmem>>, vector<2x8x128xf32>,
    return
  }
  func.func @transform_0(%arg0: i32) -> (i32, i32, i32) {
    %c0_i32 = arith.constant 0 : i32
    %c0_i32_0 = arith.constant 0 : i32
    %c0_i32_1 = arith.constant 0 : i32
    return %arg0, %c0_i32, %c0_i32_0 : i32, i32, i32
  }
  func.func @transform_1(%arg0: i32) -> (i32, i32, i32) {
    %c0_i32 = arith.constant 0 : i32
    %c0_i32_0 = arith.constant 0 : i32
    %c0_i32_1 = arith.constant 0 : i32
    return %arg0, %c0_i32, %c0_i32_0 : i32, i32, i32
  }
  func.func @transform_2(%arg0: i32) -> (i32, i32) {
    %c0_i32 = arith.constant 0 : i32
    %c0_i32_0 = arith.constant 0 : i32
    %c0_i32_1 = arith.constant 0 : i32
    return %c0_i32, %c0_i32_0 : i32, i32
  }
  func.func @transform_3(%arg0: i32) -> (i32, i32) {
    %c0_i32 = arith.constant 0 : i32
    %c0_i32_0 = arith.constant 0 : i32
    %c0_i32_1 = arith.constant 0 : i32
    return %c0_i32, %c0_i32_0 : i32, i32
  }
  func.func @transform_4(%arg0: i32) -> (i32, i32, i32) {
    %c0_i32 = arith.constant 0 : i32
    %c0_i32_0 = arith.constant 0 : i32
    %c0_i32_1 = arith.constant 0 : i32
    %c0_i32_2 = arith.constant 0 : i32
    return %c0_i32, %c0_i32_0, %c0_i32_1 : i32, i32, i32
  }
  func.func @transform_5(%arg0: i32) -> (i32, i32) {
    %c0_i32 = arith.constant 0 : i32
    %c0_i32_0 = arith.constant 0 : i32
    %c0_i32_1 = arith.constant 0 : i32
    return %c0_i32, %c0_i32_0 : i32, i32
  }
  func.func @transform_6(%arg0: i32) -> (i32, i32, i32) {
    %c0_i32 = arith.constant 0 : i32
    %c0_i32_0 = arith.constant 0 : i32
    %c0_i32_1 = arith.constant 0 : i32
    %c0_i32_2 = arith.constant 0 : i32
    return %c0_i32, %c0_i32_0, %c0_i32_1 : i32, i32, i32
  }
  func.func @transform_7(%arg0: i32) -> (i32, i32) {
    %c0_i32 = arith.constant 0 : i32
    %c0_i32_0 = arith.constant 0 : i32
    %c0_i32_1 = arith.constant 0 : i32
    return %c0_i32, %c0_i32_0 : i32, i32
  }
  func.func @transform_8(%arg0: i32) -> (i32, i32) {
    %c0_i32 = arith.constant 0 : i32
    %c0_i32_0 = arith.constant 0 : i32
    %c0_i32_1 = arith.constant 0 : i32
    return %c0_i32, %c0_i32_0 : i32, i32
  }
  func.func @transform_9(%arg0: i32) -> (i32, i32) {
    %c0_i32 = arith.constant 0 : i32
    %c0_i32_0 = arith.constant 0 : i32
    %c0_i32_1 = arith.constant 0 : i32
    return %c0_i32, %c0_i32_0 : i32, i32
  }
  func.func @transform_10(%arg0: i32) -> (i32, i32) {
    %c0_i32 = arith.constant 0 : i32
    %c0_i32_0 = arith.constant 0 : i32
    %c0_i32_1 = arith.constant 0 : i32
    return %c0_i32, %c0_i32_0 : i32, i32
  }
  func.func @transform_11(%arg0: i32) -> (i32, i32) {
    %c0_i32 = arith.constant 0 : i32
    %c0_i32_0 = arith.constant 0 : i32
    %c0_i32_1 = arith.constant 0 : i32
    return %c0_i32, %c0_i32_0 : i32, i32
  }
  func.func @transform_12(%arg0: i32) -> (i32, i32) {
    %c0_i32 = arith.constant 0 : i32
    %c0_i32_0 = arith.constant 0 : i32
    %c0_i32_1 = arith.constant 0 : i32
    return %c0_i32, %c0_i32_0 : i32, i32
  }
  func.func @transform_13(%arg0: i32) -> (i32, i32) {
    %c0_i32 = arith.constant 0 : i32
    %c0_i32_0 = arith.constant 0 : i32
    %c0_i32_1 = arith.constant 0 : i32
    return %c0_i32, %c0_i32_0 : i32, i32
  }
  func.func @transform_14(%arg0: i32) -> (i32, i32, i32) {
    %c0_i32 = arith.constant 0 : i32
    %c0_i32_0 = arith.constant 0 : i32
    %c0_i32_1 = arith.constant 0 : i32
    return %arg0, %c0_i32, %c0_i32_0 : i32, i32, i32
  }
  func.func @transform_15(%arg0: i32) -> (i32, i32, i32) {
    %c0_i32 = arith.constant 0 : i32
    %c0_i32_0 = arith.constant 0 : i32
    %c0_i32_1 = arith.constant 0 : i32
    return %arg0, %c0_i32, %c0_i32_0 : i32, i32, i32
  }
}

module attributes {stable_mosaic.version = 11 : i64} {
  func.func @_decomposition_kernel(%arg0: i32, %arg1: memref<2x8x128xf32, #tpu.memory_space<vmem>>, %arg2: memref<2x8x128xbf16, #tpu.memory_space<vmem>>, %arg3: memref<128x768xbf16, #tpu.memory_space<vmem>>, %arg4: memref<128x768xbf16, #tpu.memory_space<vmem>>, %arg5: memref<2x128x128xbf16, #tpu.memory_space<vmem>>, %arg6: memref<128x768xbf16, #tpu.memory_space<vmem>>, %arg7: memref<2x128x128xbf16, #tpu.memory_space<vmem>>, %arg8: memref<128x128xbf16, #tpu.memory_space<vmem>>, %arg9: memref<128x128xbf16, #tpu.memory_space<vmem>>, %arg10: memref<128x128xbf16, #tpu.memory_space<vmem>>, %arg11: memref<128x128xbf16, #tpu.memory_space<vmem>>, %arg12: memref<5x128xf32, #tpu.memory_space<vmem>>, %arg13: memref<2x128xf32, #tpu.memory_space<vmem>>, %arg14: memref<1x128xf32, #tpu.memory_space<vmem>>, %arg15: memref<2x8x128xf32, #tpu.memory_space<vmem>>, %arg16: memref<2x8x128xf32, #tpu.memory_space<vmem>>) attributes {dimension_semantics = [#tpu.dimension_semantics<parallel>], iteration_bounds = array<i64: 1>, scalar_prefetch = 0 : i64, scratch_operands = 0 : i64, tpu.core_type = #tpu.core_type<tc>, window_params = [{transform_indices = @transform_0, window_bounds = array<i64: 2, 8, 128>}, {transform_indices = @transform_1, window_bounds = array<i64: 2, 8, 128>}, {pipeline_mode = #tpu.pipeline_mode<synchronous>, transform_indices = @transform_2, window_bounds = array<i64: 128, 768>}, {pipeline_mode = #tpu.pipeline_mode<synchronous>, transform_indices = @transform_3, window_bounds = array<i64: 128, 768>}, {pipeline_mode = #tpu.pipeline_mode<synchronous>, transform_indices = @transform_4, window_bounds = array<i64: 2, 128, 128>}, {pipeline_mode = #tpu.pipeline_mode<synchronous>, transform_indices = @transform_5, window_bounds = array<i64: 128, 768>}, {pipeline_mode = #tpu.pipeline_mode<synchronous>, transform_indices = @transform_6, window_bounds = array<i64: 2, 128, 128>}, {pipeline_mode = #tpu.pipeline_mode<synchronous>, transform_indices = @transform_7, window_bounds = array<i64: 128, 128>}, {pipeline_mode = #tpu.pipeline_mode<synchronous>, transform_indices = @transform_8, window_bounds = array<i64: 128, 128>}, {pipeline_mode = #tpu.pipeline_mode<synchronous>, transform_indices = @transform_9, window_bounds = array<i64: 128, 128>}, {pipeline_mode = #tpu.pipeline_mode<synchronous>, transform_indices = @transform_10, window_bounds = array<i64: 128, 128>}, {pipeline_mode = #tpu.pipeline_mode<synchronous>, transform_indices = @transform_11, window_bounds = array<i64: 5, 128>}, {pipeline_mode = #tpu.pipeline_mode<synchronous>, transform_indices = @transform_12, window_bounds = array<i64: 2, 128>}, {pipeline_mode = #tpu.pipeline_mode<synchronous>, transform_indices = @transform_13, window_bounds = array<i64: 1, 128>}, {transform_indices = @transform_14, window_bounds = array<i64: 2, 8, 128>}, {transform_indices = @transform_15, window_bounds = array<i64: 2, 8, 128>}]} {
    %c0 = arith.constant 0 : index
    %c0_0 = arith.constant 0 : index
    %c0_1 = arith.constant 0 : index
    %0 = vector.load %arg1[%c0, %c0_0, %c0_1] : memref<2x8x128xf32, #tpu.memory_space<vmem>>, vector<2x8x128xf32>
    %1 = vector.shape_cast %0 : vector<2x8x128xf32> to vector<16x128xf32>
    %2 = arith.truncf %1 : vector<16x128xf32> to vector<16x128xbf16>
    %c0_2 = arith.constant 0 : index
    %c0_3 = arith.constant 0 : index
    %c0_4 = arith.constant 0 : index
    %3 = vector.load %arg2[%c0_2, %c0_3, %c0_4] : memref<2x8x128xbf16, #tpu.memory_space<vmem>>, vector<2x8x128xbf16>
    %4 = vector.shape_cast %3 : vector<2x8x128xbf16> to vector<16x128xbf16>
    %c0_5 = arith.constant 0 : index
    %c0_6 = arith.constant 0 : index
    %5 = vector.load %arg12[%c0_5, %c0_6] : memref<5x128xf32, #tpu.memory_space<vmem>>, vector<5x128xf32>
    %c0_7 = arith.constant 0 : index
    %c0_8 = arith.constant 0 : index
    %6 = vector.load %arg13[%c0_7, %c0_8] : memref<2x128xf32, #tpu.memory_space<vmem>>, vector<2x128xf32>
    %7 = tpu.iota {dimensions = array<i32: 1>} : vector<1x128xi32>
    %c32_i32 = arith.constant 32 : i32
    %8 = vector.broadcast %c32_i32 : i32 to vector<1x128xi32>
    %9 = arith.cmpi slt, %7, %8 : vector<1x128xi32>
    %10 = arith.extui %9 : vector<1x128xi1> to vector<1x128xi32>
    %11 = arith.sitofp %10 : vector<1x128xi32> to vector<1x128xf32>
    %c0_9 = arith.constant 0 : index
    %c0_10 = arith.constant 0 : index
    %12 = vector.load %arg3[%c0_9, %c0_10] : memref<128x768xbf16, #tpu.memory_space<vmem>>, vector<128x768xbf16>
    %cst = arith.constant dense<0.000000e+00> : vector<16x768xf32>
    %13 = tpu.matmul %2, %12, %cst {dimension_numbers = #tpu.dot_dimension_numbers<[1], [0], [0], [1], [0, 0, 1, 1], [], []>} : vector<16x128xbf16>, vector<128x768xbf16>, vector<16x768xf32> -> vector<16x768xf32>
    %c0_11 = arith.constant 0 : index
    %c0_12 = arith.constant 0 : index
    %14 = vector.load %arg4[%c0_11, %c0_12] : memref<128x768xbf16, #tpu.memory_space<vmem>>, vector<128x768xbf16>
    %cst_13 = arith.constant dense<0.000000e+00> : vector<16x768xf32>
    %15 = tpu.matmul %4, %14, %cst_13 {dimension_numbers = #tpu.dot_dimension_numbers<[1], [0], [0], [1], [0, 0, 1, 1], [], []>} : vector<16x128xbf16>, vector<128x768xbf16>, vector<16x768xf32> -> vector<16x768xf32>
    %16 = arith.addf %13, %15 : vector<16x768xf32>
    %17 = vector.shape_cast %16 : vector<16x768xf32> to vector<2x8x768xf32>
    %18 = arith.truncf %17 : vector<2x8x768xf32> to vector<2x8x768xbf16>
    %19 = vector.extract_strided_slice %18 {offsets = [0, 0, 0], sizes = [2, 8, 128], strides = [1, 1, 1]} : vector<2x8x768xbf16> to vector<2x8x128xbf16>
    %20 = vector.extract_strided_slice %18 {offsets = [0, 0, 256], sizes = [2, 8, 128], strides = [1, 1, 1]} : vector<2x8x768xbf16> to vector<2x8x128xbf16>
    %21 = vector.extract_strided_slice %18 {offsets = [0, 0, 512], sizes = [2, 8, 128], strides = [1, 1, 1]} : vector<2x8x768xbf16> to vector<2x8x128xbf16>
    "tpu.trace_start"() <{level = 10 : i32, message = "bld,bmd->blm"}> : () -> ()
    %cst_14 = arith.constant dense<0.000000e+00> : vector<2x8x8xf32>
    %22 = tpu.matmul %19, %20, %cst_14 {dimension_numbers = #tpu.dot_dimension_numbers<[2], [2], [1], [1], [0, 0, 0, 1, 1, 1], [0], [0]>} : vector<2x8x128xbf16>, vector<2x8x128xbf16>, vector<2x8x8xf32> -> vector<2x8x8xf32>
    "tpu.trace_stop"() : () -> ()
    %cst_15 = arith.constant dense<0xFF800000> : vector<2x8xf32>
    %23 = vector.multi_reduction <maximumf>, %22, %cst_15 [2] : vector<2x8x8xf32> to vector<2x8xf32>
    %24 = vector.shape_cast %23 : vector<2x8xf32> to vector<2x8x1xf32>
    %25 = vector.broadcast %24 : vector<2x8x1xf32> to vector<2x8x8xf32>
    %26 = arith.subf %22, %25 : vector<2x8x8xf32>
    %27 = math.exp %26 : vector<2x8x8xf32>
    %cst_16 = arith.constant dense<0.000000e+00> : vector<2x8xf32>
    %28 = vector.multi_reduction <add>, %27, %cst_16 [2] : vector<2x8x8xf32> to vector<2x8xf32>
    %29 = vector.shape_cast %28 : vector<2x8xf32> to vector<2x8x1xf32>
    %30 = tpu.reciprocal %29 {approx = true} : vector<2x8x1xf32> -> vector<2x8x1xf32>
    %31 = vector.broadcast %30 : vector<2x8x1xf32> to vector<2x8x8xf32>
    %32 = arith.mulf %27, %31 : vector<2x8x8xf32>
    %33 = arith.truncf %32 : vector<2x8x8xf32> to vector<2x8x8xbf16>
    "tpu.trace_start"() <{level = 10 : i32, message = "blm,bmd->bld"}> : () -> ()
    %cst_17 = arith.constant dense<0.000000e+00> : vector<2x8x128xf32>
    %34 = tpu.matmul %33, %21, %cst_17 {dimension_numbers = #tpu.dot_dimension_numbers<[2], [1], [1], [2], [0, 0, 0, 1, 1, 2], [0], [0]>} : vector<2x8x8xbf16>, vector<2x8x128xbf16>, vector<2x8x128xf32> -> vector<2x8x128xf32>
    "tpu.trace_stop"() : () -> ()
    %35 = vector.shape_cast %34 : vector<2x8x128xf32> to vector<16x128xf32>
    %36 = arith.truncf %35 : vector<16x128xf32> to vector<16x128xbf16>
    %c0_18 = arith.constant 0 : index
    %c0_19 = arith.constant 0 : index
    %c0_20 = arith.constant 0 : index
    %37 = vector.load %arg5[%c0_18, %c0_19, %c0_20] : memref<2x128x128xbf16, #tpu.memory_space<vmem>>, vector<1x128x128xbf16>
    %38 = vector.shape_cast %37 : vector<1x128x128xbf16> to vector<128x128xbf16>
    %cst_21 = arith.constant dense<0.000000e+00> : vector<16x128xf32>
    %39 = tpu.matmul %36, %38, %cst_21 {dimension_numbers = #tpu.dot_dimension_numbers<[1], [0], [0], [1], [0, 0, 1, 1], [], []>} : vector<16x128xbf16>, vector<128x128xbf16>, vector<16x128xf32> -> vector<16x128xf32>
    %40 = vector.extract_strided_slice %18 {offsets = [0, 0, 128], sizes = [2, 8, 128], strides = [1, 1, 1]} : vector<2x8x768xbf16> to vector<2x8x128xbf16>
    %41 = vector.extract_strided_slice %18 {offsets = [0, 0, 384], sizes = [2, 8, 128], strides = [1, 1, 1]} : vector<2x8x768xbf16> to vector<2x8x128xbf16>
    %42 = vector.extract_strided_slice %18 {offsets = [0, 0, 640], sizes = [2, 8, 128], strides = [1, 1, 1]} : vector<2x8x768xbf16> to vector<2x8x128xbf16>
    "tpu.trace_start"() <{level = 10 : i32, message = "bld,bmd->blm"}> : () -> ()
    %cst_22 = arith.constant dense<0.000000e+00> : vector<2x8x8xf32>
    %43 = tpu.matmul %40, %41, %cst_22 {dimension_numbers = #tpu.dot_dimension_numbers<[2], [2], [1], [1], [0, 0, 0, 1, 1, 1], [0], [0]>} : vector<2x8x128xbf16>, vector<2x8x128xbf16>, vector<2x8x8xf32> -> vector<2x8x8xf32>
    "tpu.trace_stop"() : () -> ()
    %cst_23 = arith.constant dense<0xFF800000> : vector<2x8xf32>
    %44 = vector.multi_reduction <maximumf>, %43, %cst_23 [2] : vector<2x8x8xf32> to vector<2x8xf32>
    %45 = vector.shape_cast %44 : vector<2x8xf32> to vector<2x8x1xf32>
    %46 = vector.broadcast %45 : vector<2x8x1xf32> to vector<2x8x8xf32>
    %47 = arith.subf %43, %46 : vector<2x8x8xf32>
    %48 = math.exp %47 : vector<2x8x8xf32>
    %cst_24 = arith.constant dense<0.000000e+00> : vector<2x8xf32>
    %49 = vector.multi_reduction <add>, %48, %cst_24 [2] : vector<2x8x8xf32> to vector<2x8xf32>
    %50 = vector.shape_cast %49 : vector<2x8xf32> to vector<2x8x1xf32>
    %51 = tpu.reciprocal %50 {approx = true} : vector<2x8x1xf32> -> vector<2x8x1xf32>
    %52 = vector.broadcast %51 : vector<2x8x1xf32> to vector<2x8x8xf32>
    %53 = arith.mulf %48, %52 : vector<2x8x8xf32>
    %54 = arith.truncf %53 : vector<2x8x8xf32> to vector<2x8x8xbf16>
    "tpu.trace_start"() <{level = 10 : i32, message = "blm,bmd->bld"}> : () -> ()
    %cst_25 = arith.constant dense<0.000000e+00> : vector<2x8x128xf32>
    %55 = tpu.matmul %54, %42, %cst_25 {dimension_numbers = #tpu.dot_dimension_numbers<[2], [1], [1], [2], [0, 0, 0, 1, 1, 2], [0], [0]>} : vector<2x8x8xbf16>, vector<2x8x128xbf16>, vector<2x8x128xf32> -> vector<2x8x128xf32>
    "tpu.trace_stop"() : () -> ()
    %56 = vector.shape_cast %55 : vector<2x8x128xf32> to vector<16x128xf32>
    %57 = arith.truncf %56 : vector<16x128xf32> to vector<16x128xbf16>
    %c1 = arith.constant 1 : index
    %c0_26 = arith.constant 0 : index
    %c0_27 = arith.constant 0 : index
    %58 = vector.load %arg5[%c1, %c0_26, %c0_27] : memref<2x128x128xbf16, #tpu.memory_space<vmem>>, vector<1x128x128xbf16>
    %59 = vector.shape_cast %58 : vector<1x128x128xbf16> to vector<128x128xbf16>
    %cst_28 = arith.constant dense<0.000000e+00> : vector<16x128xf32>
    %60 = tpu.matmul %57, %59, %cst_28 {dimension_numbers = #tpu.dot_dimension_numbers<[1], [0], [0], [1], [0, 0, 1, 1], [], []>} : vector<16x128xbf16>, vector<128x128xbf16>, vector<16x128xf32> -> vector<16x128xf32>
    %61 = arith.addf %39, %60 : vector<16x128xf32>
    %62 = arith.truncf %61 : vector<16x128xf32> to vector<16x128xbf16>
    %c0_29 = arith.constant 0 : index
    %c0_30 = arith.constant 0 : index
    %63 = vector.load %arg6[%c0_29, %c0_30] : memref<128x768xbf16, #tpu.memory_space<vmem>>, vector<128x768xbf16>
    %cst_31 = arith.constant dense<0.000000e+00> : vector<16x768xf32>
    %64 = tpu.matmul %62, %63, %cst_31 {dimension_numbers = #tpu.dot_dimension_numbers<[1], [0], [0], [1], [0, 0, 1, 1], [], []>} : vector<16x128xbf16>, vector<128x768xbf16>, vector<16x768xf32> -> vector<16x768xf32>
    %65 = vector.shape_cast %64 : vector<16x768xf32> to vector<2x8x768xf32>
    %66 = arith.truncf %65 : vector<2x8x768xf32> to vector<2x8x768xbf16>
    %67 = vector.extract_strided_slice %66 {offsets = [0, 0, 0], sizes = [2, 8, 128], strides = [1, 1, 1]} : vector<2x8x768xbf16> to vector<2x8x128xbf16>
    %68 = vector.extract_strided_slice %66 {offsets = [0, 0, 256], sizes = [2, 8, 128], strides = [1, 1, 1]} : vector<2x8x768xbf16> to vector<2x8x128xbf16>
    %69 = vector.extract_strided_slice %66 {offsets = [0, 0, 512], sizes = [2, 8, 128], strides = [1, 1, 1]} : vector<2x8x768xbf16> to vector<2x8x128xbf16>
    "tpu.trace_start"() <{level = 10 : i32, message = "bld,bmd->blm"}> : () -> ()
    %cst_32 = arith.constant dense<0.000000e+00> : vector<2x8x8xf32>
    %70 = tpu.matmul %67, %68, %cst_32 {dimension_numbers = #tpu.dot_dimension_numbers<[2], [2], [1], [1], [0, 0, 0, 1, 1, 1], [0], [0]>} : vector<2x8x128xbf16>, vector<2x8x128xbf16>, vector<2x8x8xf32> -> vector<2x8x8xf32>
    "tpu.trace_stop"() : () -> ()
    %cst_33 = arith.constant dense<0xFF800000> : vector<2x8xf32>
    %71 = vector.multi_reduction <maximumf>, %70, %cst_33 [2] : vector<2x8x8xf32> to vector<2x8xf32>
    %72 = vector.shape_cast %71 : vector<2x8xf32> to vector<2x8x1xf32>
    %73 = vector.broadcast %72 : vector<2x8x1xf32> to vector<2x8x8xf32>
    %74 = arith.subf %70, %73 : vector<2x8x8xf32>
    %75 = math.exp %74 : vector<2x8x8xf32>
    %cst_34 = arith.constant dense<0.000000e+00> : vector<2x8xf32>
    %76 = vector.multi_reduction <add>, %75, %cst_34 [2] : vector<2x8x8xf32> to vector<2x8xf32>
    %77 = vector.shape_cast %76 : vector<2x8xf32> to vector<2x8x1xf32>
    %78 = tpu.reciprocal %77 {approx = true} : vector<2x8x1xf32> -> vector<2x8x1xf32>
    %79 = vector.broadcast %78 : vector<2x8x1xf32> to vector<2x8x8xf32>
    %80 = arith.mulf %75, %79 : vector<2x8x8xf32>
    %81 = arith.truncf %80 : vector<2x8x8xf32> to vector<2x8x8xbf16>
    "tpu.trace_start"() <{level = 10 : i32, message = "blm,bmd->bld"}> : () -> ()
    %cst_35 = arith.constant dense<0.000000e+00> : vector<2x8x128xf32>
    %82 = tpu.matmul %81, %69, %cst_35 {dimension_numbers = #tpu.dot_dimension_numbers<[2], [1], [1], [2], [0, 0, 0, 1, 1, 2], [0], [0]>} : vector<2x8x8xbf16>, vector<2x8x128xbf16>, vector<2x8x128xf32> -> vector<2x8x128xf32>
    "tpu.trace_stop"() : () -> ()
    %83 = vector.shape_cast %82 : vector<2x8x128xf32> to vector<16x128xf32>
    %84 = arith.truncf %83 : vector<16x128xf32> to vector<16x128xbf16>
    %c0_36 = arith.constant 0 : index
    %c0_37 = arith.constant 0 : index
    %c0_38 = arith.constant 0 : index
    %85 = vector.load %arg7[%c0_36, %c0_37, %c0_38] : memref<2x128x128xbf16, #tpu.memory_space<vmem>>, vector<1x128x128xbf16>
    %86 = vector.shape_cast %85 : vector<1x128x128xbf16> to vector<128x128xbf16>
    %cst_39 = arith.constant dense<0.000000e+00> : vector<16x128xf32>
    %87 = tpu.matmul %84, %86, %cst_39 {dimension_numbers = #tpu.dot_dimension_numbers<[1], [0], [0], [1], [0, 0, 1, 1], [], []>} : vector<16x128xbf16>, vector<128x128xbf16>, vector<16x128xf32> -> vector<16x128xf32>
    %88 = vector.extract_strided_slice %66 {offsets = [0, 0, 128], sizes = [2, 8, 128], strides = [1, 1, 1]} : vector<2x8x768xbf16> to vector<2x8x128xbf16>
    %89 = vector.extract_strided_slice %66 {offsets = [0, 0, 384], sizes = [2, 8, 128], strides = [1, 1, 1]} : vector<2x8x768xbf16> to vector<2x8x128xbf16>
    %90 = vector.extract_strided_slice %66 {offsets = [0, 0, 640], sizes = [2, 8, 128], strides = [1, 1, 1]} : vector<2x8x768xbf16> to vector<2x8x128xbf16>
    "tpu.trace_start"() <{level = 10 : i32, message = "bld,bmd->blm"}> : () -> ()
    %cst_40 = arith.constant dense<0.000000e+00> : vector<2x8x8xf32>
    %91 = tpu.matmul %88, %89, %cst_40 {dimension_numbers = #tpu.dot_dimension_numbers<[2], [2], [1], [1], [0, 0, 0, 1, 1, 1], [0], [0]>} : vector<2x8x128xbf16>, vector<2x8x128xbf16>, vector<2x8x8xf32> -> vector<2x8x8xf32>
    "tpu.trace_stop"() : () -> ()
    %cst_41 = arith.constant dense<0xFF800000> : vector<2x8xf32>
    %92 = vector.multi_reduction <maximumf>, %91, %cst_41 [2] : vector<2x8x8xf32> to vector<2x8xf32>
    %93 = vector.shape_cast %92 : vector<2x8xf32> to vector<2x8x1xf32>
    %94 = vector.broadcast %93 : vector<2x8x1xf32> to vector<2x8x8xf32>
    %95 = arith.subf %91, %94 : vector<2x8x8xf32>
    %96 = math.exp %95 : vector<2x8x8xf32>
    %cst_42 = arith.constant dense<0.000000e+00> : vector<2x8xf32>
    %97 = vector.multi_reduction <add>, %96, %cst_42 [2] : vector<2x8x8xf32> to vector<2x8xf32>
    %98 = vector.shape_cast %97 : vector<2x8xf32> to vector<2x8x1xf32>
    %99 = tpu.reciprocal %98 {approx = true} : vector<2x8x1xf32> -> vector<2x8x1xf32>
    %100 = vector.broadcast %99 : vector<2x8x1xf32> to vector<2x8x8xf32>
    %101 = arith.mulf %96, %100 : vector<2x8x8xf32>
    %102 = arith.truncf %101 : vector<2x8x8xf32> to vector<2x8x8xbf16>
    "tpu.trace_start"() <{level = 10 : i32, message = "blm,bmd->bld"}> : () -> ()
    %cst_43 = arith.constant dense<0.000000e+00> : vector<2x8x128xf32>
    %103 = tpu.matmul %102, %90, %cst_43 {dimension_numbers = #tpu.dot_dimension_numbers<[2], [1], [1], [2], [0, 0, 0, 1, 1, 2], [0], [0]>} : vector<2x8x8xbf16>, vector<2x8x128xbf16>, vector<2x8x128xf32> -> vector<2x8x128xf32>
    "tpu.trace_stop"() : () -> ()
    %104 = vector.shape_cast %103 : vector<2x8x128xf32> to vector<16x128xf32>
    %105 = arith.truncf %104 : vector<16x128xf32> to vector<16x128xbf16>
    %c1_44 = arith.constant 1 : index
    %c0_45 = arith.constant 0 : index
    %c0_46 = arith.constant 0 : index
    %106 = vector.load %arg7[%c1_44, %c0_45, %c0_46] : memref<2x128x128xbf16, #tpu.memory_space<vmem>>, vector<1x128x128xbf16>
    %107 = vector.shape_cast %106 : vector<1x128x128xbf16> to vector<128x128xbf16>
    %cst_47 = arith.constant dense<0.000000e+00> : vector<16x128xf32>
    %108 = tpu.matmul %105, %107, %cst_47 {dimension_numbers = #tpu.dot_dimension_numbers<[1], [0], [0], [1], [0, 0, 1, 1], [], []>} : vector<16x128xbf16>, vector<128x128xbf16>, vector<16x128xf32> -> vector<16x128xf32>
    %109 = arith.addf %87, %108 : vector<16x128xf32>
    %110 = arith.addf %61, %109 : vector<16x128xf32>
    %111 = arith.truncf %110 : vector<16x128xf32> to vector<16x128xbf16>
    %c0_48 = arith.constant 0 : index
    %c0_49 = arith.constant 0 : index
    %112 = vector.load %arg8[%c0_48, %c0_49] : memref<128x128xbf16, #tpu.memory_space<vmem>>, vector<128x128xbf16>
    %cst_50 = arith.constant dense<0.000000e+00> : vector<16x128xf32>
    %113 = tpu.matmul %111, %112, %cst_50 {dimension_numbers = #tpu.dot_dimension_numbers<[1], [0], [0], [1], [0, 0, 1, 1], [], []>} : vector<16x128xbf16>, vector<128x128xbf16>, vector<16x128xf32> -> vector<16x128xf32>
    %114 = vector.extract_strided_slice %6 {offsets = [0, 0], sizes = [1, 128], strides = [1, 1]} : vector<2x128xf32> to vector<1x128xf32>
    %115 = vector.broadcast %114 : vector<1x128xf32> to vector<16x128xf32>
    %116 = arith.addf %113, %115 : vector<16x128xf32>
    %117 = arith.mulf %116, %116 : vector<16x128xf32>
    %118 = arith.mulf %116, %117 : vector<16x128xf32>
    %cst_51 = arith.constant 4.471500e-02 : f32
    %119 = vector.broadcast %cst_51 : f32 to vector<16x128xf32>
    %120 = arith.mulf %119, %118 : vector<16x128xf32>
    %121 = arith.addf %116, %120 : vector<16x128xf32>
    %cst_52 = arith.constant 0.797884583 : f32
    %122 = vector.broadcast %cst_52 : f32 to vector<16x128xf32>
    %123 = arith.mulf %122, %121 : vector<16x128xf32>
    %124 = math.tanh %123 : vector<16x128xf32>
    %cst_53 = arith.constant 1.000000e+00 : f32
    %125 = vector.broadcast %cst_53 : f32 to vector<16x128xf32>
    %126 = arith.addf %125, %124 : vector<16x128xf32>
    %cst_54 = arith.constant 5.000000e-01 : f32
    %127 = vector.broadcast %cst_54 : f32 to vector<16x128xf32>
    %128 = arith.mulf %127, %126 : vector<16x128xf32>
    %129 = arith.mulf %116, %128 : vector<16x128xf32>
    %130 = arith.truncf %129 : vector<16x128xf32> to vector<16x128xbf16>
    %c0_55 = arith.constant 0 : index
    %c0_56 = arith.constant 0 : index
    %131 = vector.load %arg9[%c0_55, %c0_56] : memref<128x128xbf16, #tpu.memory_space<vmem>>, vector<128x128xbf16>
    %cst_57 = arith.constant dense<0.000000e+00> : vector<16x128xf32>
    %132 = tpu.matmul %130, %131, %cst_57 {dimension_numbers = #tpu.dot_dimension_numbers<[1], [0], [0], [1], [0, 0, 1, 1], [], []>} : vector<16x128xbf16>, vector<128x128xbf16>, vector<16x128xf32> -> vector<16x128xf32>
    %133 = vector.extract_strided_slice %5 {offsets = [0, 0], sizes = [1, 128], strides = [1, 1]} : vector<5x128xf32> to vector<1x128xf32>
    %134 = vector.broadcast %133 : vector<1x128xf32> to vector<16x128xf32>
    %135 = arith.addf %132, %134 : vector<16x128xf32>
    %136 = arith.addf %135, %110 : vector<16x128xf32>
    %137 = vector.extract_strided_slice %5 {offsets = [1, 0], sizes = [1, 128], strides = [1, 1]} : vector<5x128xf32> to vector<1x128xf32>
    %138 = vector.extract_strided_slice %5 {offsets = [2, 0], sizes = [1, 128], strides = [1, 1]} : vector<5x128xf32> to vector<1x128xf32>
    %cst_58 = arith.constant dense<0.000000e+00> : vector<16xf32>
    %139 = vector.multi_reduction <add>, %136, %cst_58 [1] : vector<16x128xf32> to vector<16xf32>
    %140 = vector.shape_cast %139 : vector<16xf32> to vector<16x1xf32>
    %cst_59 = arith.constant 3.125000e-02 : f32
    %141 = vector.broadcast %cst_59 : f32 to vector<16x1xf32>
    %142 = arith.mulf %140, %141 : vector<16x1xf32>
    %143 = vector.broadcast %142 : vector<16x1xf32> to vector<16x128xf32>
    %144 = arith.subf %136, %143 : vector<16x128xf32>
    %145 = vector.broadcast %11 : vector<1x128xf32> to vector<16x128xf32>
    %146 = arith.mulf %144, %145 : vector<16x128xf32>
    %147 = arith.mulf %146, %146 : vector<16x128xf32>
    %cst_60 = arith.constant dense<0.000000e+00> : vector<16xf32>
    %148 = vector.multi_reduction <add>, %147, %cst_60 [1] : vector<16x128xf32> to vector<16xf32>
    %149 = vector.shape_cast %148 : vector<16xf32> to vector<16x1xf32>
    %cst_61 = arith.constant 3.125000e-02 : f32
    %150 = vector.broadcast %cst_61 : f32 to vector<16x1xf32>
    %151 = arith.mulf %149, %150 : vector<16x1xf32>
    %cst_62 = arith.constant 9.99999974E-6 : f32
    %152 = vector.broadcast %cst_62 : f32 to vector<16x1xf32>
    %153 = arith.addf %151, %152 : vector<16x1xf32>
    %154 = math.rsqrt %153 : vector<16x1xf32>
    %155 = vector.broadcast %154 : vector<16x1xf32> to vector<16x128xf32>
    %156 = arith.mulf %146, %155 : vector<16x128xf32>
    %157 = vector.broadcast %137 : vector<1x128xf32> to vector<16x128xf32>
    %158 = arith.mulf %156, %157 : vector<16x128xf32>
    %159 = vector.broadcast %138 : vector<1x128xf32> to vector<16x128xf32>
    %160 = arith.addf %158, %159 : vector<16x128xf32>
    %161 = arith.subf %1, %160 : vector<16x128xf32>
    %162 = vector.extract_strided_slice %5 {offsets = [3, 0], sizes = [1, 128], strides = [1, 1]} : vector<5x128xf32> to vector<1x128xf32>
    %163 = vector.extract_strided_slice %5 {offsets = [4, 0], sizes = [1, 128], strides = [1, 1]} : vector<5x128xf32> to vector<1x128xf32>
    %cst_63 = arith.constant dense<0.000000e+00> : vector<16xf32>
    %164 = vector.multi_reduction <add>, %161, %cst_63 [1] : vector<16x128xf32> to vector<16xf32>
    %165 = vector.shape_cast %164 : vector<16xf32> to vector<16x1xf32>
    %cst_64 = arith.constant 3.125000e-02 : f32
    %166 = vector.broadcast %cst_64 : f32 to vector<16x1xf32>
    %167 = arith.mulf %165, %166 : vector<16x1xf32>
    %168 = vector.broadcast %167 : vector<16x1xf32> to vector<16x128xf32>
    %169 = arith.subf %161, %168 : vector<16x128xf32>
    %170 = vector.broadcast %11 : vector<1x128xf32> to vector<16x128xf32>
    %171 = arith.mulf %169, %170 : vector<16x128xf32>
    %172 = arith.mulf %171, %171 : vector<16x128xf32>
    %cst_65 = arith.constant dense<0.000000e+00> : vector<16xf32>
    %173 = vector.multi_reduction <add>, %172, %cst_65 [1] : vector<16x128xf32> to vector<16xf32>
    %174 = vector.shape_cast %173 : vector<16xf32> to vector<16x1xf32>
    %cst_66 = arith.constant 3.125000e-02 : f32
    %175 = vector.broadcast %cst_66 : f32 to vector<16x1xf32>
    %176 = arith.mulf %174, %175 : vector<16x1xf32>
    %cst_67 = arith.constant 9.99999974E-6 : f32
    %177 = vector.broadcast %cst_67 : f32 to vector<16x1xf32>
    %178 = arith.addf %176, %177 : vector<16x1xf32>
    %179 = math.rsqrt %178 : vector<16x1xf32>
    %180 = vector.broadcast %179 : vector<16x1xf32> to vector<16x128xf32>
    %181 = arith.mulf %171, %180 : vector<16x128xf32>
    %182 = vector.broadcast %162 : vector<1x128xf32> to vector<16x128xf32>
    %183 = arith.mulf %181, %182 : vector<16x128xf32>
    %184 = vector.broadcast %163 : vector<1x128xf32> to vector<16x128xf32>
    %185 = arith.addf %183, %184 : vector<16x128xf32>
    %186 = arith.truncf %160 : vector<16x128xf32> to vector<16x128xbf16>
    %c0_68 = arith.constant 0 : index
    %c0_69 = arith.constant 0 : index
    %187 = vector.load %arg10[%c0_68, %c0_69] : memref<128x128xbf16, #tpu.memory_space<vmem>>, vector<128x128xbf16>
    %cst_70 = arith.constant dense<0.000000e+00> : vector<16x128xf32>
    %188 = tpu.matmul %186, %187, %cst_70 {dimension_numbers = #tpu.dot_dimension_numbers<[1], [0], [0], [1], [0, 0, 1, 1], [], []>} : vector<16x128xbf16>, vector<128x128xbf16>, vector<16x128xf32> -> vector<16x128xf32>
    %189 = vector.extract_strided_slice %6 {offsets = [1, 0], sizes = [1, 128], strides = [1, 1]} : vector<2x128xf32> to vector<1x128xf32>
    %190 = vector.broadcast %189 : vector<1x128xf32> to vector<16x128xf32>
    %191 = arith.addf %188, %190 : vector<16x128xf32>
    %192 = arith.mulf %191, %191 : vector<16x128xf32>
    %193 = arith.mulf %191, %192 : vector<16x128xf32>
    %cst_71 = arith.constant 4.471500e-02 : f32
    %194 = vector.broadcast %cst_71 : f32 to vector<16x128xf32>
    %195 = arith.mulf %194, %193 : vector<16x128xf32>
    %196 = arith.addf %191, %195 : vector<16x128xf32>
    %cst_72 = arith.constant 0.797884583 : f32
    %197 = vector.broadcast %cst_72 : f32 to vector<16x128xf32>
    %198 = arith.mulf %197, %196 : vector<16x128xf32>
    %199 = math.tanh %198 : vector<16x128xf32>
    %cst_73 = arith.constant 1.000000e+00 : f32
    %200 = vector.broadcast %cst_73 : f32 to vector<16x128xf32>
    %201 = arith.addf %200, %199 : vector<16x128xf32>
    %cst_74 = arith.constant 5.000000e-01 : f32
    %202 = vector.broadcast %cst_74 : f32 to vector<16x128xf32>
    %203 = arith.mulf %202, %201 : vector<16x128xf32>
    %204 = arith.mulf %191, %203 : vector<16x128xf32>
    %205 = arith.truncf %204 : vector<16x128xf32> to vector<16x128xbf16>
    %c0_75 = arith.constant 0 : index
    %c0_76 = arith.constant 0 : index
    %206 = vector.load %arg11[%c0_75, %c0_76] : memref<128x128xbf16, #tpu.memory_space<vmem>>, vector<128x128xbf16>
    %cst_77 = arith.constant dense<0.000000e+00> : vector<16x128xf32>
    %207 = tpu.matmul %205, %206, %cst_77 {dimension_numbers = #tpu.dot_dimension_numbers<[1], [0], [0], [1], [0, 0, 1, 1], [], []>} : vector<16x128xbf16>, vector<128x128xbf16>, vector<16x128xf32> -> vector<16x128xf32>
    %c0_78 = arith.constant 0 : index
    %c0_79 = arith.constant 0 : index
    %208 = vector.load %arg14[%c0_78, %c0_79] : memref<1x128xf32, #tpu.memory_space<vmem>>, vector<1x128xf32>
    %209 = vector.broadcast %208 : vector<1x128xf32> to vector<16x128xf32>
    %210 = arith.addf %207, %209 : vector<16x128xf32>
    %211 = vector.shape_cast %210 : vector<16x128xf32> to vector<2x8x128xf32>
    %c0_80 = arith.constant 0 : index
    %c0_81 = arith.constant 0 : index
    %c0_82 = arith.constant 0 : index
    %212 = vector.load %arg15[%c0_80, %c0_81, %c0_82] : memref<2x8x128xf32, #tpu.memory_space<vmem>>, vector<2x8x128xf32>
    tpu.vector_store %arg15[%c0_80, %c0_81, %c0_82], %211 {strides = array<i32>} : memref<2x8x128xf32, #tpu.memory_space<vmem>>, vector<2x8x128xf32>,
    %213 = vector.shape_cast %185 : vector<16x128xf32> to vector<2x8x128xf32>
    %c0_83 = arith.constant 0 : index
    %c0_84 = arith.constant 0 : index
    %c0_85 = arith.constant 0 : index
    %214 = vector.load %arg16[%c0_83, %c0_84, %c0_85] : memref<2x8x128xf32, #tpu.memory_space<vmem>>, vector<2x8x128xf32>
    tpu.vector_store %arg16[%c0_83, %c0_84, %c0_85], %213 {strides = array<i32>} : memref<2x8x128xf32, #tpu.memory_space<vmem>>, vector<2x8x128xf32>,
    return
  }
  func.func @transform_0(%arg0: i32) -> (i32, i32, i32) {
    %c0_i32 = arith.constant 0 : i32
    %c0_i32_0 = arith.constant 0 : i32
    %c0_i32_1 = arith.constant 0 : i32
    return %arg0, %c0_i32, %c0_i32_0 : i32, i32, i32
  }
  func.func @transform_1(%arg0: i32) -> (i32, i32, i32) {
    %c0_i32 = arith.constant 0 : i32
    %c0_i32_0 = arith.constant 0 : i32
    %c0_i32_1 = arith.constant 0 : i32
    return %arg0, %c0_i32, %c0_i32_0 : i32, i32, i32
  }
  func.func @transform_2(%arg0: i32) -> (i32, i32) {
    %c0_i32 = arith.constant 0 : i32
    %c0_i32_0 = arith.constant 0 : i32
    %c0_i32_1 = arith.constant 0 : i32
    return %c0_i32, %c0_i32_0 : i32, i32
  }
  func.func @transform_3(%arg0: i32) -> (i32, i32) {
    %c0_i32 = arith.constant 0 : i32
    %c0_i32_0 = arith.constant 0 : i32
    %c0_i32_1 = arith.constant 0 : i32
    return %c0_i32, %c0_i32_0 : i32, i32
  }
  func.func @transform_4(%arg0: i32) -> (i32, i32, i32) {
    %c0_i32 = arith.constant 0 : i32
    %c0_i32_0 = arith.constant 0 : i32
    %c0_i32_1 = arith.constant 0 : i32
    %c0_i32_2 = arith.constant 0 : i32
    return %c0_i32, %c0_i32_0, %c0_i32_1 : i32, i32, i32
  }
  func.func @transform_5(%arg0: i32) -> (i32, i32) {
    %c0_i32 = arith.constant 0 : i32
    %c0_i32_0 = arith.constant 0 : i32
    %c0_i32_1 = arith.constant 0 : i32
    return %c0_i32, %c0_i32_0 : i32, i32
  }
  func.func @transform_6(%arg0: i32) -> (i32, i32, i32) {
    %c0_i32 = arith.constant 0 : i32
    %c0_i32_0 = arith.constant 0 : i32
    %c0_i32_1 = arith.constant 0 : i32
    %c0_i32_2 = arith.constant 0 : i32
    return %c0_i32, %c0_i32_0, %c0_i32_1 : i32, i32, i32
  }
  func.func @transform_7(%arg0: i32) -> (i32, i32) {
    %c0_i32 = arith.constant 0 : i32
    %c0_i32_0 = arith.constant 0 : i32
    %c0_i32_1 = arith.constant 0 : i32
    return %c0_i32, %c0_i32_0 : i32, i32
  }
  func.func @transform_8(%arg0: i32) -> (i32, i32) {
    %c0_i32 = arith.constant 0 : i32
    %c0_i32_0 = arith.constant 0 : i32
    %c0_i32_1 = arith.constant 0 : i32
    return %c0_i32, %c0_i32_0 : i32, i32
  }
  func.func @transform_9(%arg0: i32) -> (i32, i32) {
    %c0_i32 = arith.constant 0 : i32
    %c0_i32_0 = arith.constant 0 : i32
    %c0_i32_1 = arith.constant 0 : i32
    return %c0_i32, %c0_i32_0 : i32, i32
  }
  func.func @transform_10(%arg0: i32) -> (i32, i32) {
    %c0_i32 = arith.constant 0 : i32
    %c0_i32_0 = arith.constant 0 : i32
    %c0_i32_1 = arith.constant 0 : i32
    return %c0_i32, %c0_i32_0 : i32, i32
  }
  func.func @transform_11(%arg0: i32) -> (i32, i32) {
    %c0_i32 = arith.constant 0 : i32
    %c0_i32_0 = arith.constant 0 : i32
    %c0_i32_1 = arith.constant 0 : i32
    return %c0_i32, %c0_i32_0 : i32, i32
  }
  func.func @transform_12(%arg0: i32) -> (i32, i32) {
    %c0_i32 = arith.constant 0 : i32
    %c0_i32_0 = arith.constant 0 : i32
    %c0_i32_1 = arith.constant 0 : i32
    return %c0_i32, %c0_i32_0 : i32, i32
  }
  func.func @transform_13(%arg0: i32) -> (i32, i32) {
    %c0_i32 = arith.constant 0 : i32
    %c0_i32_0 = arith.constant 0 : i32
    %c0_i32_1 = arith.constant 0 : i32
    return %c0_i32, %c0_i32_0 : i32, i32
  }
  func.func @transform_14(%arg0: i32) -> (i32, i32, i32) {
    %c0_i32 = arith.constant 0 : i32
    %c0_i32_0 = arith.constant 0 : i32
    %c0_i32_1 = arith.constant 0 : i32
    return %arg0, %c0_i32, %c0_i32_0 : i32, i32, i32
  }
  func.func @transform_15(%arg0: i32) -> (i32, i32, i32) {
    %c0_i32 = arith.constant 0 : i32
    %c0_i32_0 = arith.constant 0 : i32
    %c0_i32_1 = arith.constant 0 : i32
    return %arg0, %c0_i32, %c0_i32_0 : i32, i32, i32
  }
}

</mosaic_0001>

<bundles_post_ra>
// kernel: tpu_custom_call.1
= control target key start
LH: loop header
LB: loop body
LE: loop exit
PB: predicated region body
PF: predicated region fallthrough
CT: control target
= control target key end

     0   :  { %s5157_s0 = inlined_call_operand.hbm [shape: f32[2,8,128], index: 0, kind: input, shape index: {}]   ;;  %s5158_s1 = inlined_call_operand.hbm [shape: bf16[2,8,128], index: 1, kind: input, shape index: {}]   ;;  %s5159_s2 = inlined_call_operand.hbm [shape: bf16[128,768], index: 2, kind: input, shape index: {}]   ;;  %s5160_s3 = inlined_call_operand.hbm [shape: bf16[128,768], index: 3, kind: input, shape index: {}]   ;;  %s5161_s4 = inlined_call_operand.hbm [shape: bf16[2,128,128], index: 4, kind: input, shape index: {}]   ;;  %s5162_s5 = inlined_call_operand.hbm [shape: bf16[128,768], index: 5, kind: input, shape index: {}]   ;;  %s5163_s6 = inlined_call_operand.hbm [shape: bf16[2,128,128], index: 6, kind: input, shape index: {}]   ;;  %s5164_s7 = inlined_call_operand.hbm [shape: bf16[128,128], index: 7, kind: input, shape index: {}]   ;;  %s5165_s8 = inlined_call_operand.hbm [shape: bf16[128,128], index: 8, kind: input, shape index: {}]   ;;  %s5166_s9 = inlined_call_operand.hbm [shape: bf16[128,128], index: 9, kind: input, shape index: {}]   ;;  %s5167_s10 = inlined_call_operand.hbm [shape: bf16[128,128], index: 10, kind: input, shape index: {}]   ;;  %s5168_s11 = inlined_call_operand.vmem [shape: f32[5,128], index: 11, kind: input, shape index: {}]   ;;  %s5169_s12 = inlined_call_operand.vmem [shape: f32[2,128], index: 12, kind: input, shape index: {}]   ;;  %s5170_s13 = inlined_call_operand.vmem [shape: f32[1,128], index: 13, kind: input, shape index: {}]   ;;  %s5171_s14 = inlined_call_operand.hbm [shape: f32[2,8,128], index: 14, kind: output, shape index: {0}]   ;;  %s5172_s15 = inlined_call_operand.hbm [shape: f32[2,8,128], index: 15, kind: output, shape index: {1}]  }
   0x1   :  { %5174 = sst [smem:[#allocation31_spill]] %s5171_s14 }
   0x2   :  { %21 = vsyncpa [#allocation3], 0 }
   0x3   :  { %22 = vsyncpa [#allocation6], 0 }
   0x4   :  { %23 = vsyncpa [#allocation9], 0 }
   0x5   :  { %24 = vsyncpa [#allocation12], 0 }
   0x6   :  { %25 = vsyncpa [#allocation15], 0 }
   0x7   :  { %26 = vsyncpa [#allocation18], 0 }
   0x8   :  { %27 = vsyncpa [#allocation4], 0 }
   0x9   :  { %28 = vsyncpa [#allocation22], 0  ;;  %s4556_s18 = smov [#allocation5]   ;;  %s4254_s22 = scalar_lea.hbm %s5158_s1, 128 }
   0xa   :  { %s46_s19 = sshll.u32 %s4556_s18, 4  ;;  %p4255_p0 = scmp.ne.s32.totalorder %s5158_s1, %s4254_s22  ;;  %s47_s19 = int_to_ptr.vmem [resolvable:$true] %s46_s19 }
   0xb   :  { %p4258_p1 = scmp.lt.u32.totalorder %s4254_s22, %s5158_s1 }
   0xd   :  { %p4260_p2 = pnand %p4258_p1, %p4255_p0 }
   0xf   :  { %4263 = shalt.err (!%p4260_p2)
}
  0x10   :  { %s4264_s27 = scalar_lea.vmem %s47_s19, 128  ;;  %p4269_p4 = scmp.lt.s32.totalorder %s47_s19, %s47_s19 }
  0x11   :  { %p4265_p3 = scmp.ne.s32.totalorder %s47_s19, %s4264_s27  ;;  %p4270_p5 = scmp.lt.s32.totalorder %s4264_s27, %s4264_s27 }
  0x13   :  { %p4271_p6 = por %p4270_p5, %p4269_p4 }
  0x15   :  { %p4272_p7 = pnand %p4271_p6, %p4265_p3 }
  0x17   :  { %4275 = shalt.err (!%p4272_p7)
}
  0x18   :  { %s4557_s28 = smov 64   ;;  %s4558_s29 = smov 4  }
  0x19   :  { %52 = dma.hbm_to_vmem [thread:$0]  %s5158_s1, 128, %s47_s19, [#allocation6], %s4557_s28, %s4557_s28, %s4558_s29  }
  0x1a   :  { %s4559_s17 = smov [#allocation8]   ;;  %s4560_s20 = smov [#allocation11]  }
  0x1b   :  { %s70_s18 = sshll.u32 %s4559_s17, 4  ;;  %s94_s21 = sshll.u32 %s4560_s20, 4  ;;  %s71_s18 = int_to_ptr.vmem [resolvable:$true] %s70_s18  ;;  %s95_s21 = int_to_ptr.vmem [resolvable:$true] %s94_s21 }
  0x1c   :  { %s4276_s24 = scalar_lea.hbm %s5160_s3, 6144 }
  0x1d   :  { %p4277_p8 = scmp.ne.s32.totalorder %s5160_s3, %s4276_s24  ;;  %p4280_p9 = scmp.lt.u32.totalorder %s4276_s24, %s5160_s3 }
  0x1f   :  { %p4282_p10 = pnand %p4280_p9, %p4277_p8 }
  0x21   :  { %4285 = shalt.err (!%p4282_p10)
}
  0x22   :  { %s4286_s1 = scalar_lea.vmem %s71_s18, 6144  ;;  %p4291_p12 = scmp.lt.s32.totalorder %s71_s18, %s71_s18 }
  0x23   :  { %p4287_p11 = scmp.ne.s32.totalorder %s71_s18, %s4286_s1  ;;  %p4292_p13 = scmp.lt.s32.totalorder %s4286_s1, %s4286_s1 }
  0x25   :  { %p4293_p0 = por %p4292_p13, %p4291_p12 }
  0x27   :  { %p4294_p1 = pnand %p4293_p0, %p4287_p11 }
  0x29   :  { %4297 = shalt.err (!%p4294_p1)
}
  0x2a   :  { %s4561_s19 = smov 384   ;;  %s4562_s30 = smov 24  }
  0x2b   :  { %76 = dma.hbm_to_vmem [thread:$0]  %s5160_s3, 6144, %s71_s18, [#allocation9], %s4561_s19, %s4561_s19, %s4562_s30  }
  0x2c   :  { %s4298_s22 = scalar_lea.hbm %s5162_s5, 6144 }
  0x2d   :  { %p4299_p2 = scmp.ne.s32.totalorder %s5162_s5, %s4298_s22  ;;  %p4302_p3 = scmp.lt.u32.totalorder %s4298_s22, %s5162_s5 }
  0x2f   :  { %p4304_p4 = pnand %p4302_p3, %p4299_p2 }
  0x31   :  { %4307 = shalt.err (!%p4304_p4)
}
  0x32   :  { %s4308_s27 = scalar_lea.vmem %s95_s21, 6144  ;;  %p4313_p6 = scmp.lt.s32.totalorder %s95_s21, %s95_s21 }
  0x33   :  { %p4309_p5 = scmp.ne.s32.totalorder %s95_s21, %s4308_s27  ;;  %p4314_p7 = scmp.lt.s32.totalorder %s4308_s27, %s4308_s27 }
  0x35   :  { %p4315_p8 = por %p4314_p7, %p4313_p6 }
  0x37   :  { %p4316_p9 = pnand %p4315_p8, %p4309_p5 }
  0x39   :  { %4319 = shalt.err (!%p4316_p9)
}
  0x3a   :  { %100 = dma.hbm_to_vmem [thread:$0]  %s5162_s5, 6144, %s95_s21, [#allocation12], %s4561_s19, %s4561_s19, %s4562_s30  }
  0x3b   :  { %s4563_s1 = smov [#allocation14]   ;;  %s4564_s17 = smov [#allocation17]  }
  0x3c   :  { %s118_s16 = sshll.u32 %s4563_s1, 4  ;;  %s142_s14 = sshll.u32 %s4564_s17, 4  ;;  %s119_s16 = int_to_ptr.vmem [resolvable:$true] %s118_s16  ;;  %s143_s14 = int_to_ptr.vmem [resolvable:$true] %s142_s14 }
  0x3d   :  { %s4320_s23 = scalar_lea.hbm %s5164_s7, 1024 }
  0x3e   :  { %p4321_p10 = scmp.ne.s32.totalorder %s5164_s7, %s4320_s23  ;;  %p4324_p11 = scmp.lt.u32.totalorder %s4320_s23, %s5164_s7 }
  0x40   :  { %p4326_p12 = pnand %p4324_p11, %p4321_p10 }
  0x42   :  { %4329 = shalt.err (!%p4326_p12)
}
  0x43   :  { %s4330_s5 = scalar_lea.vmem %s119_s16, 1024  ;;  %p4335_p0 = scmp.lt.s32.totalorder %s119_s16, %s119_s16 }
  0x44   :  { %p4331_p13 = scmp.ne.s32.totalorder %s119_s16, %s4330_s5  ;;  %p4336_p1 = scmp.lt.s32.totalorder %s4330_s5, %s4330_s5 }
  0x46   :  { %p4337_p2 = por %p4336_p1, %p4335_p0 }
  0x48   :  { %p4338_p3 = pnand %p4337_p2, %p4331_p13 }
  0x4a   :  { %4341 = shalt.err (!%p4338_p3)
}
  0x4b   :  { %124 = dma.hbm_to_vmem [thread:$0]  %s5164_s7, 1024, %s119_s16, [#allocation15], %s4557_s28, %s4557_s28, %s4558_s29  }
  0x4c   :  { %s4342_s17 = scalar_lea.hbm %s5166_s9, 1024 }
  0x4d   :  { %p4343_p4 = scmp.ne.s32.totalorder %s5166_s9, %s4342_s17  ;;  %p4346_p5 = scmp.lt.u32.totalorder %s4342_s17, %s5166_s9 }
  0x4f   :  { %p4348_p6 = pnand %p4346_p5, %p4343_p4 }
  0x51   :  { %4351 = shalt.err (!%p4348_p6)
}
  0x52   :  { %s4352_s25 = scalar_lea.vmem %s143_s14, 1024  ;;  %p4357_p8 = scmp.lt.s32.totalorder %s143_s14, %s143_s14 }
  0x53   :  { %p4353_p7 = scmp.ne.s32.totalorder %s143_s14, %s4352_s25  ;;  %p4358_p9 = scmp.lt.s32.totalorder %s4352_s25, %s4352_s25 }
  0x55   :  { %p4359_p10 = por %p4358_p9, %p4357_p8 }
  0x57   :  { %p4360_p11 = pnand %p4359_p10, %p4353_p7 }
  0x59   :  { %4363 = shalt.err (!%p4360_p11)
}
  0x5a   :  { %148 = dma.hbm_to_vmem [thread:$0]  %s5166_s9, 1024, %s143_s14, [#allocation18], %s4557_s28, %s4557_s28, %s4558_s29  }
  0x5b   :  { %s4565_s26 = smov [#allocation2]   ;;  %s4364_s3 = scalar_lea.hbm %s5157_s0, 256 }
  0x5c   :  { %s34_s27 = sshll.u32 %s4565_s26, 4  ;;  %p4365_p12 = scmp.ne.s32.totalorder %s5157_s0, %s4364_s3  ;;  %s35_s27 = int_to_ptr.vmem [resolvable:$true] %s34_s27 }
  0x5d   :  { %p4368_p13 = scmp.lt.u32.totalorder %s4364_s3, %s5157_s0 }
  0x5f   :  { %p4370_p0 = pnand %p4368_p13, %p4365_p12 }
  0x61   :  { %4373 = shalt.err (!%p4370_p0)
}
  0x62   :  { %s4374_s22 = scalar_lea.vmem %s35_s27, 256  ;;  %p4379_p2 = scmp.lt.s32.totalorder %s35_s27, %s35_s27 }
  0x63   :  { %p4375_p1 = scmp.ne.s32.totalorder %s35_s27, %s4374_s22  ;;  %p4380_p3 = scmp.lt.s32.totalorder %s4374_s22, %s4374_s22 }
  0x65   :  { %p4381_p4 = por %p4380_p3, %p4379_p2 }
  0x67   :  { %p4382_p5 = pnand %p4381_p4, %p4375_p1 }
  0x69   :  { %4385 = shalt.err (!%p4382_p5)
}
  0x6a   :  { %s4566_s9 = smov 128   ;;  %s4567_s14 = smov 8  }
  0x6b   :  { %40 = dma.hbm_to_vmem [thread:$0]  %s5157_s0, 256, %s35_s27, [#allocation3], %s4566_s9, %s4566_s9, %s4567_s14  }
  0x6c   :  { %s4568_s25 = smov [#allocation7]   ;;  %s4569_s16 = smov [#allocation10]  }
  0x6d   :  { %s58_s7 = sshll.u32 %s4568_s25, 4  ;;  %s82_s26 = sshll.u32 %s4569_s16, 4  ;;  %s59_s7 = int_to_ptr.vmem [resolvable:$true] %s58_s7  ;;  %s4748_s26 = int_to_ptr.vmem [resolvable:$true] %s82_s26 }
  0x6e   :  { %s4386_s3 = scalar_lea.hbm %s5159_s2, 6144 }
  0x6f   :  { %p4387_p6 = scmp.ne.s32.totalorder %s5159_s2, %s4386_s3  ;;  %p4390_p7 = scmp.lt.u32.totalorder %s4386_s3, %s5159_s2 }
  0x71   :  { %p4392_p8 = pnand %p4390_p7, %p4387_p6 }
  0x73   :  { %4395 = shalt.err (!%p4392_p8)
}
  0x74   :  { %s4396_s0 = scalar_lea.vmem %s59_s7, 6144  ;;  %p4401_p10 = scmp.lt.s32.totalorder %s59_s7, %s59_s7 }
  0x75   :  { %p4397_p9 = scmp.ne.s32.totalorder %s59_s7, %s4396_s0  ;;  %p4402_p11 = scmp.lt.s32.totalorder %s4396_s0, %s4396_s0 }
  0x77   :  { %p4403_p12 = por %p4402_p11, %p4401_p10 }
  0x79   :  { %p4404_p13 = pnand %p4403_p12, %p4397_p9 }
  0x7b   :  { %4407 = shalt.err (!%p4404_p13)
}
  0x7c   :  { %64 = dma.hbm_to_vmem [thread:$0]  %s5159_s2, 6144, %s59_s7, [#allocation6], %s4561_s19, %s4561_s19, %s4562_s30  }
  0x7d   :  { %s4408_s25 = scalar_lea.hbm %s5161_s4, 2048 }
  0x7e   :  { %p4409_p0 = scmp.ne.s32.totalorder %s5161_s4, %s4408_s25  ;;  %p4412_p1 = scmp.lt.u32.totalorder %s4408_s25, %s5161_s4 }
  0x80   :  { %p4414_p2 = pnand %p4412_p1, %p4409_p0 }
  0x82   :  { %4417 = shalt.err (!%p4414_p2)
}
  0x83   :  { %s4418_s18 = scalar_lea.vmem %s4748_s26, 2048  ;;  %p4423_p4 = scmp.lt.s32.totalorder %s4748_s26, %s4748_s26 }
  0x84   :  { %p4419_p3 = scmp.ne.s32.totalorder %s4748_s26, %s4418_s18  ;;  %p4424_p5 = scmp.lt.s32.totalorder %s4418_s18, %s4418_s18 }
  0x86   :  { %p4425_p6 = por %p4424_p5, %p4423_p4 }
  0x88   :  { %p4426_p7 = pnand %p4425_p6, %p4419_p3 }
  0x8a   :  { %4429 = shalt.err (!%p4426_p7)
}
  0x8b   :  { %88 = dma.hbm_to_vmem [thread:$0]  %s5161_s4, 2048, %s4748_s26, [#allocation9], %s4557_s28, %s4557_s28, %s4558_s29  }
  0x8c   :  { %s4570_s30 = smov [#allocation13]   ;;  %s4571_s1 = smov [#allocation16]  }
  0x8d   :  { %s106_s7 = sshll.u32 %s4570_s30, 4  ;;  %s130_s17 = sshll.u32 %s4571_s1, 4  ;;  %s107_s7 = int_to_ptr.vmem [resolvable:$true] %s106_s7  ;;  %s4785_s17 = int_to_ptr.vmem [resolvable:$true] %s130_s17 }
  0x8e   :  { %s4430_s27 = scalar_lea.hbm %s5163_s6, 2048 }
  0x8f   :  { %p4431_p8 = scmp.ne.s32.totalorder %s5163_s6, %s4430_s27  ;;  %p4434_p9 = scmp.lt.u32.totalorder %s4430_s27, %s5163_s6 }
  0x91   :  { %p4436_p10 = pnand %p4434_p9, %p4431_p8 }
  0x93   :  { %4439 = shalt.err (!%p4436_p10)
}
  0x94   :  { %s4440_s4 = scalar_lea.vmem %s107_s7, 2048  ;;  %p4445_p12 = scmp.lt.s32.totalorder %s107_s7, %s107_s7 }
  0x95   :  { %p4441_p11 = scmp.ne.s32.totalorder %s107_s7, %s4440_s4  ;;  %p4446_p13 = scmp.lt.s32.totalorder %s4440_s4, %s4440_s4 }
  0x97   :  { %p4447_p0 = por %p4446_p13, %p4445_p12 }
  0x99   :  { %p4448_p1 = pnand %p4447_p0, %p4441_p11 }
  0x9b   :  { %4451 = shalt.err (!%p4448_p1)
}
  0x9c   :  { %112 = dma.hbm_to_vmem [thread:$0]  %s5163_s6, 2048, %s107_s7, [#allocation12], %s4557_s28, %s4557_s28, %s4558_s29  }
  0x9d   :  { %s4452_s3 = scalar_lea.hbm %s5165_s8, 1024 }
  0x9e   :  { %p4453_p2 = scmp.ne.s32.totalorder %s5165_s8, %s4452_s3  ;;  %p4456_p3 = scmp.lt.u32.totalorder %s4452_s3, %s5165_s8 }
  0xa0   :  { %p4458_p4 = pnand %p4456_p3, %p4453_p2 }
  0xa2   :  { %4461 = shalt.err (!%p4458_p4)
}
  0xa3   :  { %s4462_s1 = scalar_lea.vmem %s4785_s17, 1024  ;;  %p4467_p6 = scmp.lt.s32.totalorder %s4785_s17, %s4785_s17 }
  0xa4   :  { %p4463_p5 = scmp.ne.s32.totalorder %s4785_s17, %s4462_s1  ;;  %p4468_p7 = scmp.lt.s32.totalorder %s4462_s1, %s4462_s1 }
  0xa6   :  { %p4469_p8 = por %p4468_p7, %p4467_p6 }
  0xa8   :  { %p4470_p9 = pnand %p4469_p8, %p4463_p5 }
  0xaa   :  { %4473 = shalt.err (!%p4470_p9)
}
  0xab   :  { %136 = dma.hbm_to_vmem [thread:$0]  %s5165_s8, 1024, %s4785_s17, [#allocation15], %s4557_s28, %s4557_s28, %s4558_s29  }
  0xac   :  { %s4572_s20 = smov [#allocation19]   ;;  %s4474_s23 = scalar_lea.hbm %s5167_s10, 1024 }
  0xad   :  { %s154_s0 = sshll.u32 %s4572_s20, 4  ;;  %p4475_p10 = scmp.ne.s32.totalorder %s5167_s10, %s4474_s23  ;;  %s155_s0 = int_to_ptr.vmem [resolvable:$true] %s154_s0 }
  0xae   :  { %p4478_p11 = scmp.lt.u32.totalorder %s4474_s23, %s5167_s10 }
  0xb0   :  { %p4480_p12 = pnand %p4478_p11, %p4475_p10 }
  0xb2   :  { %4483 = shalt.err (!%p4480_p12)
}
  0xb3   :  { %s4484_s16 = scalar_lea.vmem %s155_s0, 1024  ;;  %p4489_p0 = scmp.lt.s32.totalorder %s155_s0, %s155_s0 }
  0xb4   :  { %p4485_p13 = scmp.ne.s32.totalorder %s155_s0, %s4484_s16  ;;  %p4490_p1 = scmp.lt.s32.totalorder %s4484_s16, %s4484_s16 }
  0xb6   :  { %p4491_p2 = por %p4490_p1, %p4489_p0 }
  0xb8   :  { %p4492_p3 = pnand %p4491_p2, %p4485_p13 }
  0xba   :  { %4495 = shalt.err (!%p4492_p3)
}
  0xbb   :  { %160 = dma.hbm_to_vmem [thread:$0]  %s5167_s10, 1024, %s155_s0, [#allocation18], %s4557_s28, %s4557_s28, %s4558_s29  }
  0xbc   :  { %4540 = dma.done.wait [#allocation3], 256  }
  0xbd   :  { %4541 = vsyncadd [#allocation3], 4294967040 }
  0xbe   :  { %4542 = dma.done.wait [#allocation6], 6272  }
  0xbf   :  { %4543 = vsyncadd [#allocation6], 4294961024 }
  0xc0   :  { %4544 = dma.done.wait [#allocation9], 8192  }
  0xc1   :  { %4545 = vsyncadd [#allocation9], 4294959104 }
  0xc2   :  { %4546 = dma.done.wait [#allocation12], 8192  }
  0xc3   :  { %4547 = vsyncadd [#allocation12], 4294959104 }
  0xc4   :  { %4548 = dma.done.wait [#allocation15], 2048  }
  0xc5   :  { %4549 = vsyncadd [#allocation15], 4294965248 }
  0xc6   :  { %4550 = dma.done.wait [#allocation18], 2048  }
  0xc7   :  { %4551 = vsyncadd [#allocation18], 4294965248  ;;  %v4573_v0 = vmov 0   ;;  %v3923_v1 = vld [vmem:[#allocation8 + $0x4] ss:$24 sps:$4 sm:$0xff]   ;;  %vm4575_vm0 = vmmov 0  }
  0xc8   :  { %587 = vmatprep.mubr.bf16.mxu0 %v4573_v0  ;;  %630 = vmatprep.mubr.bf16.mxu1 %v4573_v0  ;;  %v3925_v2 = vld [vmem:[#allocation8 + $0xc] ss:$24 sps:$4 sm:$0xff]   ;;  %v3927_v3 = vld [vmem:[#allocation8] ss:$24 sps:$4 sm:$0xff]   ;;  %v3931_v6 = vld [vmem:[#allocation8 + $0x3c] ss:$24 sps:$4 sm:$0xff]  }
  0xc9   :  { %555 = vmatprep.subr.bf16.mxu0 %v3923_v1  ;;  %v3928_v4 = vld [vmem:[#allocation8 + $0x8] ss:$24 sps:$4 sm:$0xff]   ;;  %598 = vmatprep.subr.bf16.mxu1 %v3925_v2  ;;  %v3929_v5 = vld [vmem:[#allocation8 + $0x34] ss:$24 sps:$4 sm:$0xff]   ;;  %v3934_v8 = vld [vmem:[#allocation8 + $0x38] ss:$24 sps:$4 sm:$0xff]  }
  0xca   :  { %556 = vmatpush1.bf16.msra.mxu0 %v3927_v3  ;;  %599 = vmatpush1.bf16.msra.mxu1 %v3928_v4  ;;  %v3933_v7 = vld [vmem:[#allocation8 + $0x30] ss:$24 sps:$4 sm:$0xff]   ;;  %v3935_v9 = vld [vmem:[#allocation8 + $0x64] ss:$24 sps:$4 sm:$0xff]   ;;  %v3939_v11 = vld [vmem:[#allocation8 + $0x60] ss:$24 sps:$4 sm:$0xff]  }
  0xcb   :  { %557 = vmatprep.subr.bf16.mxu0 %v3929_v5  ;;  %600 = vmatprep.subr.bf16.mxu1 %v3931_v6  ;;  %v3937_v10 = vld [vmem:[#allocation8 + $0x6c] ss:$24 sps:$4 sm:$0xff]   ;;  %v3940_v12 = vld [vmem:[#allocation8 + $0x68] ss:$24 sps:$4 sm:$0xff]   ;;  %v3943_v14 = vld [vmem:[#allocation8 + $0x9c] ss:$24 sps:$4 sm:$0xff]  }
  0xcc   :  { %v3941_v13 = vld [vmem:[#allocation8 + $0x94] ss:$24 sps:$4 sm:$0xff]   ;;  %v3945_v15 = vld [vmem:[#allocation8 + $0x90] ss:$24 sps:$4 sm:$0xff]   ;;  %v3947_v17 = vld [vmem:[#allocation8 + $0xc4] ss:$24 sps:$4 sm:$0xff]  }
  0xcd   :  { %v3946_v16 = vld [vmem:[#allocation8 + $0x98] ss:$24 sps:$4 sm:$0xff]   ;;  %v3949_v18 = vld [vmem:[#allocation8 + $0xcc] ss:$24 sps:$4 sm:$0xff]   ;;  %v3952_v20 = vld [vmem:[#allocation8 + $0xc8] ss:$24 sps:$4 sm:$0xff]  }
  0xce   :  { %558 = vmatpush1.bf16.msra.mxu0 %v3933_v7  ;;  %601 = vmatpush1.bf16.msra.mxu1 %v3934_v8  ;;  %v3951_v19 = vld [vmem:[#allocation8 + $0xc0] ss:$24 sps:$4 sm:$0xff]   ;;  %v3953_v21 = vld [vmem:[#allocation8 + $0xf4] ss:$24 sps:$4 sm:$0xff]   ;;  %v3957_v23 = vld [vmem:[#allocation8 + $0xf0] ss:$24 sps:$4 sm:$0xff]  }
  0xcf   :  { %559 = vmatprep.subr.bf16.mxu0 %v3935_v9  ;;  %602 = vmatprep.subr.bf16.mxu1 %v3937_v10  ;;  %v3955_v22 = vld [vmem:[#allocation8 + $0xfc] ss:$24 sps:$4 sm:$0xff]   ;;  %v3958_v24 = vld [vmem:[#allocation8 + $0xf8] ss:$24 sps:$4 sm:$0xff]   ;;  %v3961_v26 = vld [vmem:[#allocation8 + $0x12c] ss:$24 sps:$4 sm:$0xff]  }
  0xd0   :  { %v3959_v25 = vld [vmem:[#allocation8 + $0x124] ss:$24 sps:$4 sm:$0xff]   ;;  %v3963_v27 = vld [vmem:[#allocation8 + $0x120] ss:$24 sps:$4 sm:$0xff]   ;;  %v3965_v29 = vld [vmem:[#allocation8 + $0x154] ss:$24 sps:$4 sm:$0xff]  }
  0xd1   :  { %v3964_v28 = vld [vmem:[#allocation8 + $0x128] ss:$24 sps:$4 sm:$0xff]   ;;  %v3967_v30 = vld [vmem:[#allocation8 + $0x15c] ss:$24 sps:$4 sm:$0xff]   ;;  %v3970_v32 = vld [vmem:[#allocation8 + $0x158] ss:$24 sps:$4 sm:$0xff]  }
  0xd2   :  { %560 = vmatpush1.bf16.msra.mxu0 %v3939_v11  ;;  %603 = vmatpush1.bf16.msra.mxu1 %v3940_v12  ;;  %v3969_v31 = vld [vmem:[#allocation8 + $0x150] ss:$24 sps:$4 sm:$0xff]   ;;  %v3973_v33 = vld [vmem:[#allocation8 + $0x14] ss:$24 sps:$4 sm:$0xff]   ;;  %v4839_v36 = vld [vmem:[#allocation5] sm:$0xff]   ;;  %vm1173_vm1 = vcmask 1043456  }
  0xd3   :  { %561 = vmatprep.subr.bf16.mxu0 %v3941_v13  ;;  %604 = vmatprep.subr.bf16.mxu1 %v3943_v14  ;;  %v3976_v34 = vld [vmem:[#allocation7 + $0xc] ss:$24 sps:$4 sm:$0xff]   ;;  %v3971_v35 = vld [vmem:[#allocation8 + $0x10] ss:$24 sps:$4 sm:$0xff]   ;;  %v3983_v39 = vld [vmem:[#allocation7 + $0x3c] ss:$24 sps:$4 sm:$0xff]  }
  0xd4   :  { %v3974_v37 = vld [vmem:[#allocation7 + $0x8] ss:$24 sps:$4 sm:$0xff]   ;;  %v3980_v38 = vld [vmem:[#allocation8 + $0x44] ss:$24 sps:$4 sm:$0xff]   ;;  %v3981_v41 = vld [vmem:[#allocation7 + $0x38] ss:$24 sps:$4 sm:$0xff]  }
  0xd5   :  { %v3978_v40 = vld [vmem:[#allocation8 + $0x40] ss:$24 sps:$4 sm:$0xff]   ;;  %v3986_v42 = vld [vmem:[#allocation8 + $0x74] ss:$24 sps:$4 sm:$0xff]   ;;  %v3984_v44 = vld [vmem:[#allocation8 + $0x70] ss:$24 sps:$4 sm:$0xff]  }
  0xd6   :  { %562 = vmatpush1.bf16.msra.mxu0 %v3945_v15  ;;  %605 = vmatpush1.bf16.msra.mxu1 %v3946_v16  ;;  %v3989_v43 = vld [vmem:[#allocation7 + $0x6c] ss:$24 sps:$4 sm:$0xff]   ;;  %v3987_v45 = vld [vmem:[#allocation7 + $0x68] ss:$24 sps:$4 sm:$0xff]   ;;  %v3995_v47 = vld [vmem:[#allocation7 + $0x9c] ss:$24 sps:$4 sm:$0xff]  }
  0xd7   :  { %563 = vmatprep.subr.bf16.mxu0 %v3947_v17  ;;  %606 = vmatprep.subr.bf16.mxu1 %v3949_v18  ;;  %v3992_v46 = vld [vmem:[#allocation8 + $0xa4] ss:$24 sps:$4 sm:$0xff]   ;;  %v3990_v48 = vld [vmem:[#allocation8 + $0xa0] ss:$24 sps:$4 sm:$0xff]   ;;  %v3998_v50 = vld [vmem:[#allocation8 + $0xd4] ss:$24 sps:$4 sm:$0xff]  }
  0xd8   :  { %v3993_v49 = vld [vmem:[#allocation7 + $0x98] ss:$24 sps:$4 sm:$0xff]   ;;  %v4001_v51 = vld [vmem:[#allocation7 + $0xcc] ss:$24 sps:$4 sm:$0xff]   ;;  %v3999_v53 = vld [vmem:[#allocation7 + $0xc8] ss:$24 sps:$4 sm:$0xff]  }
  0xd9   :  { %v3996_v52 = vld [vmem:[#allocation8 + $0xd0] ss:$24 sps:$4 sm:$0xff]   ;;  %v4004_v54 = vld [vmem:[#allocation8 + $0x104] ss:$24 sps:$4 sm:$0xff]   ;;  %v4002_v56 = vld [vmem:[#allocation8 + $0x100] ss:$24 sps:$4 sm:$0xff]  }
  0xda   :  { %564 = vmatpush1.bf16.msra.mxu0 %v3951_v19  ;;  %607 = vmatpush1.bf16.msra.mxu1 %v3952_v20  ;;  %v4007_v55 = vld [vmem:[#allocation7 + $0xfc] ss:$24 sps:$4 sm:$0xff]   ;;  %v4005_v57 = vld [vmem:[#allocation7 + $0xf8] ss:$24 sps:$4 sm:$0xff]   ;;  %v4013_v59 = vld [vmem:[#allocation7 + $0x12c] ss:$24 sps:$4 sm:$0xff]  }
  0xdb   :  { %565 = vmatprep.subr.bf16.mxu0 %v3953_v21  ;;  %608 = vmatprep.subr.bf16.mxu1 %v3955_v22  ;;  %v4010_v58 = vld [vmem:[#allocation8 + $0x134] ss:$24 sps:$4 sm:$0xff]   ;;  %v4008_v60 = vld [vmem:[#allocation8 + $0x130] ss:$24 sps:$4 sm:$0xff]   ;;  %v4016_v62 = vld [vmem:[#allocation8 + $0x164] ss:$24 sps:$4 sm:$0xff]  }
  0xdc   :  { %v4011_v61 = vld [vmem:[#allocation7 + $0x128] ss:$24 sps:$4 sm:$0xff]   ;;  %v4019_v63 = vld [vmem:[#allocation7 + $0x15c] ss:$24 sps:$4 sm:$0xff]   ;;  %v4017_v2 = vld [vmem:[#allocation7 + $0x158] ss:$24 sps:$4 sm:$0xff]  }
  0xdd   :  { %v4014_v1 = vld [vmem:[#allocation8 + $0x160] ss:$24 sps:$4 sm:$0xff]   ;;  %v201_v3 = vld [vmem:[#allocation2] sm:$0xff]  ;;  %v202_v4 = vld [vmem:[#allocation2 + $0x8] sm:$0xff]  ;;  %vm1145_vm2 = vcmask 64512  }
  0xde   :  { %566 = vmatpush1.bf16.msra.mxu0 %v3957_v23  ;;  %609 = vmatpush1.bf16.msra.mxu1 %v3958_v24  ;;  %v4022_v5 = vld [vmem:[#allocation7 + $0x4] ss:$24 sps:$4 sm:$0xff]   ;;  %v4845_v6 = vpack.c.bf16 %v202_v4, %v201_v3  ;;  %v4020_v7 = vld [vmem:[#allocation7] ss:$24 sps:$4 sm:$0xff]   ;;  %v4025_v8 = vld [vmem:[#allocation7 + $0x34] ss:$24 sps:$4 sm:$0xff]  }
  0xdf   :  { %567 = vmatprep.subr.bf16.mxu0 %v3959_v25  ;;  %610 = vmatprep.subr.bf16.mxu1 %v3961_v26  ;;  %v4023_v9 = vld [vmem:[#allocation7 + $0x30] ss:$24 sps:$4 sm:$0xff]   ;;  %v4028_v10 = vld [vmem:[#allocation7 + $0x64] ss:$24 sps:$4 sm:$0xff]   ;;  %v4026_v11 = vld [vmem:[#allocation7 + $0x60] ss:$24 sps:$4 sm:$0xff]  }
  0xe0   :  { %v4031_v12 = vld [vmem:[#allocation7 + $0x94] ss:$24 sps:$4 sm:$0xff]   ;;  %v4029_v13 = vld [vmem:[#allocation7 + $0x90] ss:$24 sps:$4 sm:$0xff]   ;;  %v4034_v14 = vld [vmem:[#allocation7 + $0xc4] ss:$24 sps:$4 sm:$0xff]  }
  0xe1   :  { %v4032_v15 = vld [vmem:[#allocation7 + $0xc0] ss:$24 sps:$4 sm:$0xff]   ;;  %v4037_v16 = vld [vmem:[#allocation7 + $0xf4] ss:$24 sps:$4 sm:$0xff]   ;;  %v4035_v17 = vld [vmem:[#allocation7 + $0xf0] ss:$24 sps:$4 sm:$0xff]  }
  0xe2   :  { %568 = vmatpush1.bf16.msra.mxu0 %v3963_v27  ;;  %611 = vmatpush1.bf16.msra.mxu1 %v3964_v28  ;;  %v4040_v18 = vld [vmem:[#allocation7 + $0x124] ss:$24 sps:$4 sm:$0xff]   ;;  %v4038_v19 = vld [vmem:[#allocation7 + $0x120] ss:$24 sps:$4 sm:$0xff]   ;;  %v4043_v20 = vld [vmem:[#allocation7 + $0x154] ss:$24 sps:$4 sm:$0xff]  }
  0xe3   :  { %569 = vmatprep.subr.bf16.mxu0 %v3965_v29  ;;  %612 = vmatprep.subr.bf16.mxu1 %v3967_v30  ;;  %v4041_v21 = vld [vmem:[#allocation7 + $0x150] ss:$24 sps:$4 sm:$0xff]   ;;  %v4046_v22 = vld [vmem:[#allocation7 + $0x14] ss:$24 sps:$4 sm:$0xff]   ;;  %v4049_v24 = vld [vmem:[#allocation7 + $0x44] ss:$24 sps:$4 sm:$0xff]  }
  0xe4   :  { %v4044_v23 = vld [vmem:[#allocation7 + $0x10] ss:$24 sps:$4 sm:$0xff]   ;;  %v4047_v25 = vld [vmem:[#allocation7 + $0x40] ss:$24 sps:$4 sm:$0xff]   ;;  %v4052_v26 = vld [vmem:[#allocation7 + $0x74] ss:$24 sps:$4 sm:$0xff]  }
  0xe5   :  { %v4050_v27 = vld [vmem:[#allocation7 + $0x70] ss:$24 sps:$4 sm:$0xff]   ;;  %v4055_v28 = vld [vmem:[#allocation7 + $0xa4] ss:$24 sps:$4 sm:$0xff]   ;;  %v4053_v29 = vld [vmem:[#allocation7 + $0xa0] ss:$24 sps:$4 sm:$0xff]  }
  0xe6   :  { %570 = vmatpush1.bf16.msra.mxu0 %v3969_v31  ;;  %613 = vmatpush1.bf16.msra.mxu1 %v3970_v32  ;;  %v4058_v30 = vld [vmem:[#allocation7 + $0xd4] ss:$24 sps:$4 sm:$0xff]   ;;  %v4056_v31 = vld [vmem:[#allocation7 + $0xd0] ss:$24 sps:$4 sm:$0xff]   ;;  %v4061_v32 = vld [vmem:[#allocation7 + $0x104] ss:$24 sps:$4 sm:$0xff]  }
  0xe7   :  { %641 = vmatprep.subr.bf16.mxu0 %v3973_v33  ;;  %967 = vmatprep.subr.bf16.mxu1 %v3976_v34  ;;  %v4059_v33 = vld [vmem:[#allocation7 + $0x100] ss:$24 sps:$4 sm:$0xff]   ;;  %v4064_v34 = vld [vmem:[#allocation7 + $0x134] ss:$24 sps:$4 sm:$0xff]  }
  0xe9   :  { %588 = vmatmul.mubr.bf16.vlgmr.msra.gmra.mrb[0].mxu0 %v4839_v36  ;;  %631 = vmatmul.mubr.bf16.vlgmr.msra.gmra.mrb[0].mxu1 %v4839_v36 }
  0xea   :  { %642 = vmatpush1.bf16.msra.mxu0 %v3971_v35  ;;  %968 = vmatpush1.bf16.msra.mxu1 %v3974_v37  ;;  %v4062_v35 = vld [vmem:[#allocation7 + $0x130] ss:$24 sps:$4 sm:$0xff]   ;;  %v4065_v37 = vld [vmem:[#allocation7 + $0x160] ss:$24 sps:$4 sm:$0xff]  }
  0xeb   :  { %643 = vmatprep.subr.bf16.mxu0 %v3980_v38  ;;  %969 = vmatprep.subr.bf16.mxu1 %v3983_v39  ;;  %v4574_v38 = vmov 0.0  }
  0xec   :  { %999 = vmatprep.mubr.bf16.mxu1 %v4573_v0  ;;  %673 = vmatprep.mubr.bf16.mxu0 %v4573_v0 }
  0xee   :  { %644 = vmatpush1.bf16.msra.mxu0 %v3978_v40  ;;  %970 = vmatpush1.bf16.msra.mxu1 %v3981_v41 }
  0xef   :  { %645 = vmatprep.subr.bf16.mxu0 %v3986_v42  ;;  %971 = vmatprep.subr.bf16.mxu1 %v3989_v43 }
  0xf2   :  { %646 = vmatpush1.bf16.msra.mxu0 %v3984_v44  ;;  %972 = vmatpush1.bf16.msra.mxu1 %v3987_v45 }
  0xf3   :  { %647 = vmatprep.subr.bf16.mxu0 %v3992_v46  ;;  %973 = vmatprep.subr.bf16.mxu1 %v3995_v47 }
  0xf6   :  { %648 = vmatpush1.bf16.msra.mxu0 %v3990_v48  ;;  %974 = vmatpush1.bf16.msra.mxu1 %v3993_v49 }
  0xf7   :  { %649 = vmatprep.subr.bf16.mxu0 %v3998_v50  ;;  %975 = vmatprep.subr.bf16.mxu1 %v4001_v51 }
  0xfa   :  { %650 = vmatpush1.bf16.msra.mxu0 %v3996_v52  ;;  %976 = vmatpush1.bf16.msra.mxu1 %v3999_v53 }
  0xfb   :  { %651 = vmatprep.subr.bf16.mxu0 %v4004_v54  ;;  %977 = vmatprep.subr.bf16.mxu1 %v4007_v55 }
  0xfe   :  { %652 = vmatpush1.bf16.msra.mxu0 %v4002_v56  ;;  %978 = vmatpush1.bf16.msra.mxu1 %v4005_v57 }
  0xff   :  { %653 = vmatprep.subr.bf16.mxu0 %v4010_v58  ;;  %979 = vmatprep.subr.bf16.mxu1 %v4013_v59 }
 0x102   :  { %654 = vmatpush1.bf16.msra.mxu0 %v4008_v60  ;;  %980 = vmatpush1.bf16.msra.mxu1 %v4011_v61 }
 0x103   :  { %655 = vmatprep.subr.bf16.mxu0 %v4016_v62  ;;  %981 = vmatprep.subr.bf16.mxu1 %v4019_v63 }
 0x106   :  { %656 = vmatpush1.bf16.msra.mxu0 %v4014_v1  ;;  %982 = vmatpush1.bf16.msra.mxu1 %v4017_v2 }
 0x107   :  { %924 = vmatprep.subr.bf16.mxu0 %v4022_v5  ;;  %3629 = vmatprep.subr.bf16.mxu1 %v4574_v38 }
 0x109   :  { %1000 = vmatmul.mubr.bf16.vlgmr.msra.gmra.mrb[0].mxu1 %v4845_v6  ;;  %674 = vmatmul.mubr.bf16.vlgmr.msra.gmra.mrb[4].mxu0 %v4839_v36  ;;  %v4067_v36 = vld [vmem:[#allocation7 + $0x164] ss:$24 sps:$4 sm:$0xff]  }
 0x10a   :  { %925 = vmatpush1.bf16.msra.mxu0 %v4020_v7  ;;  %956 = vmatprep.mubr.bf16.mxu0 %v4573_v0 }
 0x10b   :  { %926 = vmatprep.subr.bf16.mxu0 %v4025_v8  ;;  %3631 = vmatprep.mubr.msk.bf16.mxu1 %vm4575_vm0, %v4574_v38 }
 0x10e   :  { %927 = vmatpush1.bf16.msra.mxu0 %v4023_v9 }
 0x10f   :  { %928 = vmatprep.subr.bf16.mxu0 %v4028_v10 }
 0x112   :  { %929 = vmatpush1.bf16.msra.mxu0 %v4026_v11 }
 0x113   :  { %930 = vmatprep.subr.bf16.mxu0 %v4031_v12 }
 0x116   :  { %931 = vmatpush1.bf16.msra.mxu0 %v4029_v13 }
 0x117   :  { %932 = vmatprep.subr.bf16.mxu0 %v4034_v14 }
 0x11a   :  { %933 = vmatpush1.bf16.msra.mxu0 %v4032_v15 }
 0x11b   :  { %934 = vmatprep.subr.bf16.mxu0 %v4037_v16 }
 0x11e   :  { %935 = vmatpush1.bf16.msra.mxu0 %v4035_v17 }
 0x11f   :  { %936 = vmatprep.subr.bf16.mxu0 %v4040_v18 }
 0x122   :  { %937 = vmatpush1.bf16.msra.mxu0 %v4038_v19 }
 0x123   :  { %938 = vmatprep.subr.bf16.mxu0 %v4043_v20 }
 0x126   :  { %939 = vmatpush1.bf16.msra.mxu0 %v4041_v21 }
 0x127   :  { %1010 = vmatprep.subr.bf16.mxu0 %v4046_v22 }
 0x129   :  { %957 = vmatmul.mubr.bf16.vlgmr.msra.gmra.mrb[0].mxu0 %v4845_v6 }
 0x12a   :  { %1011 = vmatpush1.bf16.msra.mxu0 %v4044_v23  ;;  %1042 = vmatprep.mubr.bf16.mxu0 %v4573_v0 }
 0x12b   :  { %1012 = vmatprep.subr.bf16.mxu0 %v4049_v24 }
 0x12e   :  { %1013 = vmatpush1.bf16.msra.mxu0 %v4047_v25 }
 0x12f   :  { %1014 = vmatprep.subr.bf16.mxu0 %v4052_v26 }
 0x132   :  { %1015 = vmatpush1.bf16.msra.mxu0 %v4050_v27 }
 0x133   :  { %1016 = vmatprep.subr.bf16.mxu0 %v4055_v28 }
 0x136   :  { %1017 = vmatpush1.bf16.msra.mxu0 %v4053_v29 }
 0x137   :  { %1018 = vmatprep.subr.bf16.mxu0 %v4058_v30 }
 0x13a   :  { %1019 = vmatpush1.bf16.msra.mxu0 %v4056_v31 }
 0x13b   :  { %1020 = vmatprep.subr.bf16.mxu0 %v4061_v32 }
 0x13e   :  { %1021 = vmatpush1.bf16.msra.mxu0 %v4059_v33 }
 0x13f   :  { %1022 = vmatprep.subr.bf16.mxu0 %v4064_v34 }
 0x142   :  { %1023 = vmatpush1.bf16.msra.mxu0 %v4062_v35 }
 0x143   :  { %1024 = vmatprep.subr.bf16.mxu0 %v4067_v36 }
 0x146   :  { %1025 = vmatpush1.bf16.msra.mxu0 %v4065_v37 }
 0x147   :  { %3677 = vmatprep.subr.bf16.mxu0 %v4574_v38 }
 0x149   :  { %1043 = vmatmul.mubr.bf16.vlgmr.msra.gmra.mrb[4].mxu0 %v4845_v6 }
 0x14a   :  { %3693 = vmatprep.mubr.msk.bf16.mxu0 %vm4575_vm0, %v4574_v38 }
 0x1dc   :  { %v1001_v39 = vpop.f32.mrb[0].mxu1 }
 0x1dd   :  { %v1055_v40 = vpack.c.bf16 %v1001_v39, %v1001_v39  ;;  %v4859_v41 = vpop.f32.mrb[1].mxu1 }
 0x1de   :  { %v1005_v42 = vpop.f32.mrb[2].mxu1  ;;  %v1056_v24 = vpack.c.bf16 %v4859_v41, %v4859_v41 }
 0x1df   :  { %v4861_v43 = vpop.f32.mrb[3].mxu1  ;;  %3630 = vmatpush3.bf16.xpose.msra.mxu1 %v1055_v40  ;;  %v1061_v47 = vpack.c.bf16 %v1005_v42, %v1005_v42 }
 0x1e0   :  { %3635 = vmatprep.subr.bf16.mxu1 %v4574_v38  ;;  %v1062_v26 = vpack.c.bf16 %v4861_v43, %v4861_v43 }
 0x1fc   :  { %v958_v44 = vpop.f32.mrb[0].mxu0 }
 0x1fd   :  { %v1053_v45 = vpack.c.bf16 %v958_v44, %v958_v44  ;;  %v4864_v46 = vpop.f32.mrb[1].mxu0 }
 0x1fe   :  { %v962_v48 = vpop.f32.mrb[2].mxu0  ;;  %v1054_v25 = vpack.c.bf16 %v4864_v46, %v4864_v46 }
 0x1ff   :  { %v4866_v49 = vpop.f32.mrb[3].mxu0  ;;  %3632 = vmatmul.mubr.bf16.vlgmr.msra.gmra.mrb[4].mxu1 %v1053_v45  ;;  %v1059_v50 = vpack.c.bf16 %v962_v48, %v962_v48 }
 0x200   :  { %3636 = vmatpush3.bf16.xpose.msra.mxu1 %v1061_v47  ;;  %3637 = vmatprep.mubr.msk.bf16.mxu1 %vm4575_vm0, %v4574_v38  ;;  %v1060_v28 = vpack.c.bf16 %v4866_v49, %v4866_v49 }
 0x201   :  { %3641 = vmatprep.subr.bf16.mxu1 %v4574_v38 }
 0x207   :  { %3638 = vmatmul.mubr.bf16.vlgmr.msra.gmra.mrb[8].mxu1 %v1059_v50 }
 0x208   :  { %3643 = vmatprep.mubr.msk.bf16.mxu1 %vm4575_vm0, %v4574_v38 }
 0x21c   :  { %v1044_v51 = vpop.f32.mrb[4].mxu0 }
 0x21d   :  { %v1057_v52 = vpack.c.bf16 %v1044_v51, %v1044_v51  ;;  %v4873_v53 = vpop.f32.mrb[5].mxu0 }
 0x21e   :  { %v1048_v54 = vpop.f32.mrb[6].mxu0  ;;  %v1058_v27 = vpack.c.bf16 %v4873_v53, %v4873_v53 }
 0x21f   :  { %v1175_v55 = vsel %vm1173_vm1, %v1057_v52, 0  ;;  %v4876_v56 = vpop.f32.mrb[7].mxu0  ;;  %v1063_v17 = vpack.c.bf16 %v1048_v54, %v1048_v54 }
 0x220   :  { %3642 = vmatpush3.bf16.msra.mxu1 %v1175_v55  ;;  %v1388_v29 = vsel %vm1173_vm1, %v1058_v27, 0  ;;  %v4122_v27 = vld [vmem:[#allocation11 + $0x124] ss:$24 sps:$4 sm:$0xff]  }
 0x221   :  { %3647 = vmatprep.subr.bf16.mxu1 %v4574_v38  ;;  %v1221_v20 = vsel %vm1173_vm1, %v1063_v17, 0  ;;  %v4092_v17 = vld [vmem:[#allocation11 + $0x34] ss:$24 sps:$4 sm:$0xff]  }
 0x2d2   :  { %v1099_v57 = vpop.f32.mrb[4].mxu1 }
 0x2d3   :  { %v3633_v58 = vpop.f32.mrb[5].mxu1  ;;  %v1146_v59 = vsel %vm1145_vm2, %v1099_v57, -inf }
 0x2d4   :  { %1147 = vmax.xlane.f32.xlu0 %v1146_v59  ;;  %v1102_v60 = vpop.f32.mrb[6].mxu1 }
 0x2d5   :  { %v3634_v61 = vpop.f32.mrb[7].mxu1 }
 0x2d6   :  { %v4068_v61 = vld [vmem:[#allocation10 + $0x40] sm:$0xff]  }
 0x2d7   :  { %3678 = vmatpush3.bf16.msra.mxu0 %v4068_v61  ;;  %v4119_v61 = vld [vmem:[#allocation11 + $0x104] ss:$24 sps:$4 sm:$0xff]  }
 0x2d8   :  { %3679 = vmatprep.subr.bf16.mxu0 %v4574_v38 }
 0x2da   :  { %v1139_v62 = vpop.f32.mrb[8].mxu1 }
 0x2db   :  { %v3639_v63 = vpop.f32.mrb[9].mxu1  ;;  %v1149_v1 = vsel %vm1145_vm2, %v1139_v62, -inf }
 0x2dc   :  { %1150 = vmax.xlane.f32.xlu0 %v1149_v1  ;;  %v1142_v2 = vpop.f32.mrb[10].mxu1  ;;  %v4070_v63 = vld [vmem:[#allocation10 + $0x50] sm:$0xff]   ;;  %v4071_v1 = vld [vmem:[#allocation10 + $0x58] sm:$0xff]  }
 0x2dd   :  { %v3640_v3 = vpop.f32.mrb[11].mxu1  ;;  %v4072_v2 = vld [vmem:[#allocation10 + $0x60] sm:$0xff]  }
 0x2de   :  { %v4073_v3 = vld [vmem:[#allocation10 + $0x68] sm:$0xff]  }
 0x361   :  { %v1148_v4 = vpop.xlane.xlu0 %1147 }
 0x362   :  { %v1152_v5 = vsub.f32 %v1099_v57, %v1148_v4 }
 0x364   :  { %v1154_v6 = vmul.f32 1.442695, %v1152_v5 }
 0x366   :  { %4204 = vpow2.f32 %v1154_v6 }
 0x369   :  { %v1151_v7 = vpop.xlane.xlu0 %1150 }
 0x36a   :  { %v1153_v8 = vsub.f32 %v1139_v62, %v1151_v7  ;;  %v4069_v62 = vld [vmem:[#allocation10 + $0x48] sm:$0xff]   ;;  %v1064_v7 = vpack.c.bf16 %v4876_v56, %v4876_v56  ;;  %v4075_v56 = vld [vmem:[#allocation10 + $0x78] sm:$0xff]  }
 0x36b   :  { %3680 = vmatpush3.bf16.msra.mxu0 %v4069_v62  ;;  %v4128_v62 = vld [vmem:[#allocation11 + $0x154] ss:$24 sps:$4 sm:$0xff]  }
 0x36c   :  { %v1156_v9 = vmul.f32 1.442695, %v1153_v8  ;;  %3681 = vmatprep.subr.bf16.mxu0 %v4574_v38 }
 0x36e   :  { %4206 = vpow2.f32 %v1156_v9 }
 0x36f   :  { %3682 = vmatpush3.bf16.msra.mxu0 %v4070_v63  ;;  %v4126_v63 = vld [vmem:[#allocation11 + $0x150] ss:$24 sps:$4 sm:$0xff]  }
 0x370   :  { %v4205_v10 = vpop.eup %4204  ;;  %3683 = vmatprep.subr.bf16.mxu0 %v4574_v38 }
 0x371   :  { %v1158_v11 = vsel %vm1145_vm2, %v4205_v10, 0.0 }
 0x372   :  { %1159 = vadd.xlane.f32.xlu1 %v1158_v11 }
 0x373   :  { %3684 = vmatpush3.bf16.msra.mxu0 %v4071_v1  ;;  %v4131_v1 = vld [vmem:[#allocation11 + $0x164] ss:$24 sps:$4 sm:$0xff]  }
 0x374   :  { %3685 = vmatprep.subr.bf16.mxu0 %v4574_v38 }
 0x377   :  { %3686 = vmatpush3.bf16.msra.mxu0 %v4072_v2  ;;  %v4129_v2 = vld [vmem:[#allocation11 + $0x160] ss:$24 sps:$4 sm:$0xff]  }
 0x378   :  { %v4207_v12 = vpop.eup %4206  ;;  %3687 = vmatprep.subr.bf16.mxu0 %v4574_v38 }
 0x379   :  { %v1161_v13 = vsel %vm1145_vm2, %v4207_v12, 0.0 }
 0x37a   :  { %1162 = vadd.xlane.f32.xlu1 %v1161_v13 }
 0x37b   :  { %3688 = vmatpush3.bf16.msra.mxu0 %v4073_v3  ;;  %v4134_v3 = vld [vmem:[#allocation11 + $0xc] ss:$24 sps:$4 sm:$0xff]  }
 0x37c   :  { %3689 = vmatprep.subr.bf16.mxu0 %v4574_v38 }
 0x3ff   :  { %v1160_v14 = vpop.xlane.xlu1 %1159 }
 0x400   :  { %4208 = vrcp.f32 %v1160_v14  ;;  %v4074_v14 = vld [vmem:[#allocation10 + $0x70] sm:$0xff]  }
 0x401   :  { %3690 = vmatpush3.bf16.msra.mxu0 %v4074_v14  ;;  %v4143_v14 = vld [vmem:[#allocation11 + $0x9c] ss:$24 sps:$4 sm:$0xff]  }
 0x402   :  { %3691 = vmatprep.subr.bf16.mxu0 %v4574_v38 }
 0x405   :  { %3692 = vmatpush3.bf16.msra.mxu0 %v4075_v56  ;;  %v4141_v56 = vld [vmem:[#allocation11 + $0x98] ss:$24 sps:$4 sm:$0xff]  }
 0x406   :  { %3697 = vmatprep.subr.bf16.mxu0 %v4574_v38 }
 0x407   :  { %v1163_v15 = vpop.xlane.xlu1 %1162 }
 0x408   :  { %4210 = vrcp.f32 %v1163_v15  ;;  %v4084_v15 = vld [vmem:[#allocation11] ss:$24 sps:$4 sm:$0xff]  }
 0x40a   :  { %v4209_v16 = vpop.eup %4208 }
 0x40b   :  { %v1166_v18 = vmul.f32 %v4209_v16, %v4205_v10  ;;  %v1434_v10 = vsel %vm1173_vm1, %v1064_v7, 0  ;;  %v4086_v16 = vld [vmem:[#allocation11 + $0x4] ss:$24 sps:$4 sm:$0xff]   ;;  %v4132_v7 = vld [vmem:[#allocation11 + $0x8] ss:$24 sps:$4 sm:$0xff]  }
 0x40d   :  { %v1168_v19 = vpack.c.bf16 %v1166_v18, %v1166_v18  ;;  %v4090_v18 = vld [vmem:[#allocation11 + $0x30] ss:$24 sps:$4 sm:$0xff]  }
 0x40f   :  { %3644 = vmatmul.mubr.msk.bf16.vlgmr.msra.gmra.mrb[12].mxu1 %vm1145_vm2, %v1168_v19  ;;  %v4098_v19 = vld [vmem:[#allocation11 + $0x64] ss:$24 sps:$4 sm:$0xff]  }
 0x410   :  { %3648 = vmatpush3.bf16.msra.mxu1 %v1221_v20  ;;  %3649 = vmatprep.mubr.msk.bf16.mxu1 %vm4575_vm0, %v4574_v38  ;;  %v4096_v20 = vld [vmem:[#allocation11 + $0x60] ss:$24 sps:$4 sm:$0xff]  }
 0x411   :  { %3653 = vmatprep.subr.bf16.mxu1 %v4574_v38 }
 0x412   :  { %v4211_v21 = vpop.eup %4210 }
 0x413   :  { %v1167_v22 = vmul.f32 %v4211_v21, %v4207_v12  ;;  %v4104_v21 = vld [vmem:[#allocation11 + $0x94] ss:$24 sps:$4 sm:$0xff]  }
 0x415   :  { %v1169_v23 = vpack.c.bf16 %v1167_v22, %v1167_v22  ;;  %v4102_v22 = vld [vmem:[#allocation11 + $0x90] ss:$24 sps:$4 sm:$0xff]  }
 0x417   :  { %3650 = vmatmul.mubr.msk.bf16.vlgmr.msra.gmra.mrb[16].mxu1 %vm1145_vm2, %v1169_v23  ;;  %v4110_v23 = vld [vmem:[#allocation11 + $0xc4] ss:$24 sps:$4 sm:$0xff]  }
 0x418   :  { %3655 = vmatprep.mubr.msk.bf16.mxu1 %vm4575_vm0, %v4574_v38 }
 0x419   :  { %3654 = vmatpush3.bf16.xpose.msra.mxu1 %v1056_v24  ;;  %v4108_v24 = vld [vmem:[#allocation11 + $0xc0] ss:$24 sps:$4 sm:$0xff]  }
 0x41a   :  { %3659 = vmatprep.subr.bf16.mxu1 %v4574_v38 }
 0x420   :  { %3656 = vmatmul.mubr.bf16.vlgmr.msra.gmra.mrb[20].mxu1 %v1054_v25  ;;  %v4116_v25 = vld [vmem:[#allocation11 + $0xf4] ss:$24 sps:$4 sm:$0xff]  }
 0x421   :  { %3660 = vmatpush3.bf16.xpose.msra.mxu1 %v1062_v26  ;;  %3661 = vmatprep.mubr.msk.bf16.mxu1 %vm4575_vm0, %v4574_v38  ;;  %v4114_v26 = vld [vmem:[#allocation11 + $0xf0] ss:$24 sps:$4 sm:$0xff]  }
 0x422   :  { %3665 = vmatprep.subr.bf16.mxu1 %v4574_v38 }
 0x428   :  { %3662 = vmatmul.mubr.bf16.vlgmr.msra.gmra.mrb[24].mxu1 %v1060_v28  ;;  %v4120_v28 = vld [vmem:[#allocation11 + $0x120] ss:$24 sps:$4 sm:$0xff]  }
 0x429   :  { %3666 = vmatpush3.bf16.msra.mxu1 %v1388_v29  ;;  %3667 = vmatprep.mubr.msk.bf16.mxu1 %vm4575_vm0, %v4574_v38 }
 0x42a   :  { %3671 = vmatprep.subr.bf16.mxu1 %v4574_v38 }
 0x4e2   :  { %v4909_v30 = vpop.f32.mrb[12].mxu1 }
 0x4e3   :  { %v3645_v31 = vpop.f32.mrb[13].mxu1 }
 0x4e4   :  { %v1214_v32 = vpop.f32.mrb[14].mxu1 }
 0x4e5   :  { %v3646_v33 = vpop.f32.mrb[15].mxu1 }
 0x4ea   :  { %v4911_v34 = vpop.f32.mrb[16].mxu1 }
 0x4eb   :  { %v1263_v35 = vpack.c.bf16 %v4911_v34, %v4909_v30  ;;  %v3651_v36 = vpop.f32.mrb[17].mxu1  ;;  %v4117_v30 = vld [vmem:[#allocation11 + $0x100] ss:$24 sps:$4 sm:$0xff]   ;;  %v4125_v34 = vld [vmem:[#allocation11 + $0x134] ss:$24 sps:$4 sm:$0xff]  }
 0x4ec   :  { %v1260_v37 = vpop.f32.mrb[18].mxu1 }
 0x4ed   :  { %v3652_v39 = vpop.f32.mrb[19].mxu1  ;;  %v4076_v37 = vld [vmem:[#allocation10] sm:$0xff]  }
 0x4f3   :  { %v1314_v40 = vpop.f32.mrb[20].mxu1 }
 0x4f4   :  { %v3657_v41 = vpop.f32.mrb[21].mxu1  ;;  %v1360_v42 = vsel %vm1145_vm2, %v1314_v40, -inf }
 0x4f5   :  { %1361 = vmax.xlane.f32.xlu0 %v1360_v42  ;;  %v1317_v43 = vpop.f32.mrb[22].mxu1 }
 0x4f6   :  { %v3658_v44 = vpop.f32.mrb[23].mxu1  ;;  %v4077_v43 = vld [vmem:[#allocation10 + $0x8] sm:$0xff]  }
 0x4f7   :  { %v4078_v44 = vld [vmem:[#allocation10 + $0x10] sm:$0xff]  }
 0x4fb   :  { %v1354_v45 = vpop.f32.mrb[24].mxu1 }
 0x4fc   :  { %v3663_v46 = vpop.f32.mrb[25].mxu1  ;;  %v1363_v47 = vsel %vm1145_vm2, %v1354_v45, -inf }
 0x4fd   :  { %1364 = vmax.xlane.f32.xlu1 %v1363_v47  ;;  %v1357_v48 = vpop.f32.mrb[26].mxu1  ;;  %v4080_v46 = vld [vmem:[#allocation10 + $0x20] sm:$0xff]   ;;  %v4081_v47 = vld [vmem:[#allocation10 + $0x28] sm:$0xff]  }
 0x4fe   :  { %v3664_v49 = vpop.f32.mrb[27].mxu1  ;;  %v4082_v48 = vld [vmem:[#allocation10 + $0x30] sm:$0xff]  }
 0x4ff   :  { %v4083_v49 = vld [vmem:[#allocation10 + $0x38] sm:$0xff]  }
 0x582   :  { %v1362_v50 = vpop.xlane.xlu0 %1361 }
 0x583   :  { %v1366_v51 = vsub.f32 %v1314_v40, %v1362_v50  ;;  %v4089_v50 = vld [vmem:[#allocation11 + $0x14] ss:$24 sps:$4 sm:$0xff]  }
 0x585   :  { %v1368_v52 = vmul.f32 1.442695, %v1366_v51  ;;  %v4087_v51 = vld [vmem:[#allocation11 + $0x10] ss:$24 sps:$4 sm:$0xff]  }
 0x587   :  { %4212 = vpow2.f32 %v1368_v52  ;;  %v4095_v52 = vld [vmem:[#allocation11 + $0x44] ss:$24 sps:$4 sm:$0xff]  }
 0x58a   :  { %v1365_v53 = vpop.xlane.xlu1 %1364 }
 0x58b   :  { %v1367_v54 = vsub.f32 %v1354_v45, %v1365_v53  ;;  %v4079_v45 = vld [vmem:[#allocation10 + $0x18] sm:$0xff]  }
 0x58c   :  { %v4093_v53 = vld [vmem:[#allocation11 + $0x40] ss:$24 sps:$4 sm:$0xff]  }
 0x58d   :  { %v1370_v55 = vmul.f32 1.442695, %v1367_v54  ;;  %v4101_v54 = vld [vmem:[#allocation11 + $0x74] ss:$24 sps:$4 sm:$0xff]  }
 0x58f   :  { %4214 = vpow2.f32 %v1370_v55  ;;  %v4099_v55 = vld [vmem:[#allocation11 + $0x70] ss:$24 sps:$4 sm:$0xff]  }
 0x591   :  { %v4213_v57 = vpop.eup %4212 }
 0x592   :  { %v1372_v58 = vsel %vm1145_vm2, %v4213_v57, 0.0 }
 0x593   :  { %1373 = vadd.xlane.f32.xlu0 %v1372_v58  ;;  %v4105_v58 = vld [vmem:[#allocation11 + $0xa0] ss:$24 sps:$4 sm:$0xff]  }
 0x599   :  { %v4215_v59 = vpop.eup %4214 }
 0x59a   :  { %v1375_v60 = vsel %vm1145_vm2, %v4215_v59, 0.0 }
 0x59b   :  { %1376 = vadd.xlane.f32.xlu1 %v1375_v60  ;;  %v4111_v60 = vld [vmem:[#allocation11 + $0xd0] ss:$24 sps:$4 sm:$0xff]  }
 0x620   :  { %v1374_v4 = vpop.xlane.xlu0 %1373 }
 0x621   :  { %4216 = vrcp.f32 %v1374_v4 }
 0x628   :  { %v1377_v5 = vpop.xlane.xlu1 %1376 }
 0x629   :  { %4218 = vrcp.f32 %v1377_v5 }
 0x62b   :  { %v4217_v6 = vpop.eup %4216 }
 0x62c   :  { %v1380_v8 = vmul.f32 %v4217_v6, %v4213_v57  ;;  %v4107_v57 = vld [vmem:[#allocation11 + $0xa4] ss:$24 sps:$4 sm:$0xff]  }
 0x62e   :  { %v1382_v9 = vpack.c.bf16 %v1380_v8, %v1380_v8 }
 0x630   :  { %3668 = vmatmul.mubr.msk.bf16.vlgmr.msra.gmra.mrb[28].mxu1 %vm1145_vm2, %v1382_v9 }
 0x631   :  { %3672 = vmatpush3.bf16.msra.mxu1 %v1434_v10  ;;  %3673 = vmatprep.mubr.msk.bf16.mxu1 %vm4575_vm0, %v4574_v38  ;;  %v4137_v10 = vld [vmem:[#allocation11 + $0x3c] ss:$24 sps:$4 sm:$0xff]  }
 0x632   :  { %1961 = vmatprep.subr.bf16.mxu1 %v4086_v16  ;;  %v4144_v16 = vld [vmem:[#allocation11 + $0xc8] ss:$24 sps:$4 sm:$0xff]  }
 0x633   :  { %v4219_v11 = vpop.eup %4218 }
 0x634   :  { %v1381_v12 = vmul.f32 %v4219_v11, %v4215_v59  ;;  %v4113_v59 = vld [vmem:[#allocation11 + $0xd4] ss:$24 sps:$4 sm:$0xff]   ;;  %v4135_v11 = vld [vmem:[#allocation11 + $0x38] ss:$24 sps:$4 sm:$0xff]  }
 0x636   :  { %v1383_v13 = vpack.c.bf16 %v1381_v12, %v1381_v12  ;;  %v4140_v12 = vld [vmem:[#allocation11 + $0x6c] ss:$24 sps:$4 sm:$0xff]  }
 0x638   :  { %3674 = vmatmul.mubr.msk.bf16.vlgmr.msra.gmra.mrb[32].mxu1 %vm1145_vm2, %v1383_v13  ;;  %v4138_v13 = vld [vmem:[#allocation11 + $0x68] ss:$24 sps:$4 sm:$0xff]  }
 0x639   :  { %1993 = vmatprep.mubr.bf16.mxu1 %v4573_v0  ;;  %1962 = vmatpush1.bf16.msra.mxu1 %v4084_v15  ;;  %v4146_v15 = vld [vmem:[#allocation11 + $0xcc] ss:$24 sps:$4 sm:$0xff]  }
 0x63a   :  { %1963 = vmatprep.subr.bf16.mxu1 %v4092_v17  ;;  %v4149_v17 = vld [vmem:[#allocation11 + $0xfc] ss:$24 sps:$4 sm:$0xff]  }
 0x63d   :  { %1964 = vmatpush1.bf16.msra.mxu1 %v4090_v18  ;;  %v4147_v18 = vld [vmem:[#allocation11 + $0xf8] ss:$24 sps:$4 sm:$0xff]  }
 0x63e   :  { %1965 = vmatprep.subr.bf16.mxu1 %v4098_v19  ;;  %v4150_v19 = vld [vmem:[#allocation11 + $0x128] ss:$24 sps:$4 sm:$0xff]  }
 0x641   :  { %1966 = vmatpush1.bf16.msra.mxu1 %v4096_v20  ;;  %v4155_v20 = vld [vmem:[#allocation11 + $0x15c] ss:$24 sps:$4 sm:$0xff]  }
 0x642   :  { %1967 = vmatprep.subr.bf16.mxu1 %v4104_v21  ;;  %v4153_v21 = vld [vmem:[#allocation11 + $0x158] ss:$24 sps:$4 sm:$0xff]  }
 0x645   :  { %1968 = vmatpush1.bf16.msra.mxu1 %v4102_v22 }
 0x646   :  { %1969 = vmatprep.subr.bf16.mxu1 %v4110_v23 }
 0x649   :  { %1970 = vmatpush1.bf16.msra.mxu1 %v4108_v24 }
 0x64a   :  { %1971 = vmatprep.subr.bf16.mxu1 %v4116_v25 }
 0x64d   :  { %1972 = vmatpush1.bf16.msra.mxu1 %v4114_v26 }
 0x64e   :  { %1973 = vmatprep.subr.bf16.mxu1 %v4122_v27 }
 0x651   :  { %1974 = vmatpush1.bf16.msra.mxu1 %v4120_v28 }
 0x652   :  { %1975 = vmatprep.subr.bf16.mxu1 %v4128_v62 }
 0x655   :  { %1976 = vmatpush1.bf16.msra.mxu1 %v4126_v63 }
 0x656   :  { %2004 = vmatprep.subr.bf16.mxu1 %v4134_v3 }
 0x703   :  { %v1424_v29 = vpop.f32.mrb[28].mxu1 }
 0x704   :  { %v3669_v31 = vpop.f32.mrb[29].mxu1 }
 0x705   :  { %v1427_v32 = vpop.f32.mrb[30].mxu1 }
 0x706   :  { %v3670_v33 = vpop.f32.mrb[31].mxu1 }
 0x70b   :  { %v1470_v36 = vpop.f32.mrb[32].mxu1 }
 0x70c   :  { %v1476_v39 = vpack.c.bf16 %v1470_v36, %v1424_v29  ;;  %v3675_v40 = vpop.f32.mrb[33].mxu1 }
 0x70d   :  { %v1473_v41 = vpop.f32.mrb[34].mxu1 }
 0x70e   :  { %v3676_v42 = vpop.f32.mrb[35].mxu1  ;;  %3694 = vmatmul.mubr.bf16.vlgmr.msra.gmra.mrb[8].mxu0 %v1476_v39 }
 0x70f   :  { %3698 = vmatpush3.bf16.msra.mxu0 %v4076_v37  ;;  %3713 = vmatprep.mubr.msk.bf16.mxu0 %vm4575_vm0, %v4574_v38 }
 0x710   :  { %3699 = vmatprep.subr.bf16.mxu0 %v4574_v38 }
 0x713   :  { %3700 = vmatpush3.bf16.msra.mxu0 %v4077_v43 }
 0x714   :  { %3701 = vmatprep.subr.bf16.mxu0 %v4574_v38 }
 0x717   :  { %3702 = vmatpush3.bf16.msra.mxu0 %v4078_v44 }
 0x718   :  { %3703 = vmatprep.subr.bf16.mxu0 %v4574_v38 }
 0x71b   :  { %3704 = vmatpush3.bf16.msra.mxu0 %v4079_v45 }
 0x71c   :  { %3705 = vmatprep.subr.bf16.mxu0 %v4574_v38 }
 0x71f   :  { %3706 = vmatpush3.bf16.msra.mxu0 %v4080_v46 }
 0x720   :  { %3707 = vmatprep.subr.bf16.mxu0 %v4574_v38 }
 0x723   :  { %3708 = vmatpush3.bf16.msra.mxu0 %v4081_v47 }
 0x724   :  { %3709 = vmatprep.subr.bf16.mxu0 %v4574_v38 }
 0x727   :  { %3710 = vmatpush3.bf16.msra.mxu0 %v4082_v48 }
 0x728   :  { %3711 = vmatprep.subr.bf16.mxu0 %v4574_v38 }
 0x72b   :  { %3712 = vmatpush3.bf16.msra.mxu0 %v4083_v49 }
 0x72c   :  { %2047 = vmatprep.subr.bf16.mxu0 %v4089_v50 }
 0x72e   :  { %3714 = vmatmul.mubr.bf16.vlgmr.msra.gmra.mrb[8].mxu0 %v1263_v35  ;;  %v4123_v35 = vld [vmem:[#allocation11 + $0x130] ss:$24 sps:$4 sm:$0xff]  }
 0x72f   :  { %2048 = vmatpush1.bf16.msra.mxu0 %v4087_v51  ;;  %2079 = vmatprep.mubr.bf16.mxu0 %v4573_v0 }
 0x730   :  { %2049 = vmatprep.subr.bf16.mxu0 %v4095_v52 }
 0x733   :  { %2050 = vmatpush1.bf16.msra.mxu0 %v4093_v53 }
 0x734   :  { %2051 = vmatprep.subr.bf16.mxu0 %v4101_v54 }
 0x737   :  { %2052 = vmatpush1.bf16.msra.mxu0 %v4099_v55 }
 0x738   :  { %2053 = vmatprep.subr.bf16.mxu0 %v4107_v57 }
 0x73b   :  { %2054 = vmatpush1.bf16.msra.mxu0 %v4105_v58 }
 0x73c   :  { %2055 = vmatprep.subr.bf16.mxu0 %v4113_v59 }
 0x73f   :  { %2056 = vmatpush1.bf16.msra.mxu0 %v4111_v60 }
 0x740   :  { %2057 = vmatprep.subr.bf16.mxu0 %v4119_v61 }
 0x743   :  { %2058 = vmatpush1.bf16.msra.mxu0 %v4117_v30 }
 0x744   :  { %2059 = vmatprep.subr.bf16.mxu0 %v4125_v34 }
 0x747   :  { %2060 = vmatpush1.bf16.msra.mxu0 %v4123_v35 }
 0x748   :  { %2061 = vmatprep.subr.bf16.mxu0 %v4131_v1 }
 0x74b   :  { %2062 = vmatpush1.bf16.msra.mxu0 %v4129_v2 }
 0x74c   :  { %3741 = vmatprep.subr.bf16.mxu0 %v4574_v38 }
 0x801   :  { %v4949_v4 = vpop.f32.mrb[8].mxu0 }
 0x802   :  { %v3715_v5 = vpop.f32.mrb[9].mxu0 }
 0x803   :  { %v4951_v6 = vpop.f32.mrb[10].mxu0 }
 0x804   :  { %v1672_v8 = vpack.c.bf16 %v4951_v6, %v4949_v4  ;;  %v3716_v9 = vpop.f32.mrb[11].mxu0 }
 0x806   :  { %1994 = vmatmul.mubr.bf16.vlgmr.msra.gmra.mrb[36].mxu1 %v1672_v8  ;;  %2080 = vmatmul.mubr.bf16.vlgmr.msra.gmra.mrb[12].mxu0 %v1672_v8 }
 0x807   :  { %2005 = vmatpush1.bf16.msra.mxu1 %v4132_v7  ;;  %2036 = vmatprep.mubr.bf16.mxu1 %v4573_v0  ;;  %v4152_v0 = vld [vmem:[#allocation11 + $0x12c] ss:$24 sps:$4 sm:$0xff]  }
 0x808   :  { %2006 = vmatprep.subr.bf16.mxu1 %v4137_v10  ;;  %3743 = vmatprep.mubr.msk.bf16.mxu0 %vm4575_vm0, %v4574_v38 }
 0x80b   :  { %2007 = vmatpush1.bf16.msra.mxu1 %v4135_v11 }
 0x80c   :  { %2008 = vmatprep.subr.bf16.mxu1 %v4140_v12 }
 0x80f   :  { %2009 = vmatpush1.bf16.msra.mxu1 %v4138_v13 }
 0x810   :  { %2010 = vmatprep.subr.bf16.mxu1 %v4143_v14 }
 0x813   :  { %2011 = vmatpush1.bf16.msra.mxu1 %v4141_v56 }
 0x814   :  { %2012 = vmatprep.subr.bf16.mxu1 %v4146_v15 }
 0x817   :  { %2013 = vmatpush1.bf16.msra.mxu1 %v4144_v16 }
 0x818   :  { %2014 = vmatprep.subr.bf16.mxu1 %v4149_v17 }
 0x81b   :  { %2015 = vmatpush1.bf16.msra.mxu1 %v4147_v18 }
 0x81c   :  { %2016 = vmatprep.subr.bf16.mxu1 %v4152_v0 }
 0x81f   :  { %2017 = vmatpush1.bf16.msra.mxu1 %v4150_v19 }
 0x820   :  { %2018 = vmatprep.subr.bf16.mxu1 %v4155_v20 }
 0x823   :  { %2019 = vmatpush1.bf16.msra.mxu1 %v4153_v21 }
 0x824   :  { %3717 = vmatprep.subr.bf16.mxu1 %v4574_v38 }
 0x826   :  { %2037 = vmatmul.mubr.bf16.vlgmr.msra.gmra.mrb[40].mxu1 %v1672_v8 }
 0x827   :  { %3719 = vmatprep.mubr.msk.bf16.mxu1 %vm4575_vm0, %v4574_v38 }
 0x8d9   :  { %v1995_v22 = vpop.f32.mrb[36].mxu1  ;;  %v2081_v23 = vpop.f32.mrb[12].mxu0 }
 0x8da   :  { %v1997_v24 = vpop.f32.mrb[37].mxu1  ;;  %v2083_v25 = vpop.f32.mrb[13].mxu0  ;;  %v2090_v41 = vpack.c.bf16 %v1995_v22, %v1995_v22  ;;  %v2094_v45 = vpack.c.bf16 %v2081_v23, %v2081_v23 }
 0x8db   :  { %v1999_v26 = vpop.f32.mrb[38].mxu1  ;;  %v4961_v27 = vpop.f32.mrb[14].mxu0  ;;  %v2095_v40 = vpack.c.bf16 %v2083_v25, %v2083_v25  ;;  %v2091_v42 = vpack.c.bf16 %v1997_v24, %v1997_v24 }
 0x8dc   :  { %v4963_v28 = vpop.f32.mrb[39].mxu1  ;;  %v4965_v29 = vpop.f32.mrb[15].mxu0  ;;  %v2096_v46 = vpack.c.bf16 %v1999_v26, %v1999_v26  ;;  %v2210_v47 = vsel %vm1173_vm1, %v2094_v45, 0  ;;  %v2100_v15 = vpack.c.bf16 %v4961_v27, %v4961_v27 }
 0x8dd   :  { %v2423_v44 = vsel %vm1173_vm1, %v2095_v40, 0  ;;  %v2101_v24 = vpack.c.bf16 %v4965_v29, %v4965_v29  ;;  %v2097_v25 = vpack.c.bf16 %v4963_v28, %v4963_v28 }
 0x8de   :  { %v2256_v18 = vsel %vm1173_vm1, %v2100_v15, 0  ;;  %v4172_v15 = vld [vmem:[#allocation14] sm:$0xff]  }
 0x8df   :  { %v2469_v26 = vsel %vm1173_vm1, %v2101_v24, 0 }
 0x8f9   :  { %v2038_v31 = vpop.f32.mrb[40].mxu1 }
 0x8fa   :  { %v2092_v32 = vpack.c.bf16 %v2038_v31, %v2038_v31  ;;  %v2040_v33 = vpop.f32.mrb[41].mxu1 }
 0x8fb   :  { %v2093_v36 = vpack.c.bf16 %v2040_v33, %v2040_v33  ;;  %v2042_v37 = vpop.f32.mrb[42].mxu1 }
 0x8fc   :  { %v4967_v39 = vpop.f32.mrb[43].mxu1  ;;  %3718 = vmatpush3.bf16.xpose.msra.mxu1 %v2092_v32  ;;  %v2098_v43 = vpack.c.bf16 %v2042_v37, %v2042_v37 }
 0x8fd   :  { %3742 = vmatpush3.bf16.xpose.msra.mxu0 %v2093_v36  ;;  %3723 = vmatprep.subr.bf16.mxu1 %v4574_v38  ;;  %v2099_v23 = vpack.c.bf16 %v4967_v39, %v4967_v39 }
 0x8fe   :  { %3753 = vmatprep.subr.bf16.mxu0 %v4574_v38 }
 0x903   :  { %3720 = vmatmul.mubr.bf16.vlgmr.msra.gmra.mrb[44].mxu1 %v2090_v41 }
 0x904   :  { %3724 = vmatpush3.bf16.xpose.msra.mxu1 %v2098_v43  ;;  %3744 = vmatmul.mubr.bf16.vlgmr.msra.gmra.mrb[16].mxu0 %v2091_v42 }
 0x905   :  { %3754 = vmatpush3.bf16.msra.mxu0 %v2423_v44  ;;  %3725 = vmatprep.mubr.msk.bf16.mxu1 %vm4575_vm0, %v4574_v38 }
 0x906   :  { %3729 = vmatprep.subr.bf16.mxu1 %v4574_v38  ;;  %3755 = vmatprep.mubr.msk.bf16.mxu0 %vm4575_vm0, %v4574_v38 }
 0x907   :  { %3765 = vmatprep.subr.bf16.mxu0 %v4574_v38 }
 0x90b   :  { %3726 = vmatmul.mubr.bf16.vlgmr.msra.gmra.mrb[48].mxu1 %v2096_v46 }
 0x90c   :  { %3730 = vmatpush3.bf16.msra.mxu1 %v2210_v47  ;;  %3731 = vmatprep.mubr.msk.bf16.mxu1 %vm4575_vm0, %v4574_v38 }
 0x90d   :  { %3735 = vmatprep.subr.bf16.mxu1 %v4574_v38 }
 0x9d6   :  { %v2136_v48 = vpop.f32.mrb[44].mxu1 }
 0x9d7   :  { %v3721_v49 = vpop.f32.mrb[45].mxu1  ;;  %v2349_v50 = vpop.f32.mrb[16].mxu0  ;;  %v2182_v51 = vsel %vm1145_vm2, %v2136_v48, -inf }
 0x9d8   :  { %v3745_v52 = vpop.f32.mrb[17].mxu0  ;;  %2183 = vmax.xlane.f32.xlu0 %v2182_v51  ;;  %v2139_v53 = vpop.f32.mrb[46].mxu1  ;;  %v2395_v7 = vsel %vm1145_vm2, %v2349_v50, -inf }
 0x9d9   :  { %v3722_v54 = vpop.f32.mrb[47].mxu1  ;;  %v2352_v55 = vpop.f32.mrb[18].mxu0 }
 0x9da   :  { %v3746_v57 = vpop.f32.mrb[19].mxu0 }
 0x9de   :  { %v2176_v58 = vpop.f32.mrb[48].mxu1 }
 0x9df   :  { %v3727_v59 = vpop.f32.mrb[49].mxu1  ;;  %v2185_v60 = vsel %vm1145_vm2, %v2176_v58, -inf }
 0x9e0   :  { %2186 = vmax.xlane.f32.xlu1 %v2185_v60  ;;  %v2179_v61 = vpop.f32.mrb[50].mxu1  ;;  %v4164_v59 = vld [vmem:[#allocation13 + $0x40] sm:$0xff]   ;;  %v4165_v60 = vld [vmem:[#allocation13 + $0x48] sm:$0xff]  }
 0x9e1   :  { %v3728_v30 = vpop.f32.mrb[51].mxu1  ;;  %v4166_v61 = vld [vmem:[#allocation13 + $0x50] sm:$0xff]  }
 0x9e2   :  { %v4167_v30 = vld [vmem:[#allocation13 + $0x58] sm:$0xff]  }
 0xa65   :  { %v2184_v34 = vpop.xlane.xlu0 %2183 }
 0xa66   :  { %v2188_v35 = vsub.f32 %v2136_v48, %v2184_v34  ;;  %v4168_v34 = vld [vmem:[#allocation13 + $0x60] sm:$0xff]  }
 0xa68   :  { %v2190_v62 = vmul.f32 1.442695, %v2188_v35  ;;  %v4169_v35 = vld [vmem:[#allocation13 + $0x68] sm:$0xff]  }
 0xa6a   :  { %4220 = vpow2.f32 %v2190_v62  ;;  %v4170_v62 = vld [vmem:[#allocation13 + $0x70] sm:$0xff]  }
 0xa6d   :  { %v2187_v63 = vpop.xlane.xlu1 %2186 }
 0xa6e   :  { %v2189_v1 = vsub.f32 %v2176_v58, %v2187_v63 }
 0xa70   :  { %v2192_v2 = vmul.f32 1.442695, %v2189_v1 }
 0xa72   :  { %4222 = vpow2.f32 %v2192_v2 }
 0xa74   :  { %v4221_v3 = vpop.eup %4220 }
 0xa75   :  { %v2194_v5 = vsel %vm1145_vm2, %v4221_v3, 0.0 }
 0xa76   :  { %2195 = vadd.xlane.f32.xlu0 %v2194_v5 }
 0xa7a   :  { %2396 = vmax.xlane.f32.xlu0 %v2395_v7  ;;  %v4157_v7 = vld [vmem:[#allocation13 + $0x8] sm:$0xff]  }
 0xa7c   :  { %v4223_v8 = vpop.eup %4222 }
 0xa7d   :  { %v2197_v9 = vsel %vm1145_vm2, %v4223_v8, 0.0 }
 0xa7e   :  { %2198 = vadd.xlane.f32.xlu1 %v2197_v9  ;;  %v4159_v9 = vld [vmem:[#allocation13 + $0x18] sm:$0xff]  }
 0xb03   :  { %v2196_v10 = vpop.xlane.xlu0 %2195 }
 0xb04   :  { %4224 = vrcp.f32 %v2196_v10  ;;  %v4160_v10 = vld [vmem:[#allocation13 + $0x20] sm:$0xff]  }
 0xb07   :  { %v2397_v11 = vpop.xlane.xlu0 %2396 }
 0xb08   :  { %v2401_v12 = vsub.f32 %v2349_v50, %v2397_v11  ;;  %v4161_v11 = vld [vmem:[#allocation13 + $0x28] sm:$0xff]  }
 0xb0a   :  { %v2403_v13 = vmul.f32 1.442695, %v2401_v12  ;;  %v4162_v12 = vld [vmem:[#allocation13 + $0x30] sm:$0xff]  }
 0xb0b   :  { %v2199_v14 = vpop.xlane.xlu1 %2198 }
 0xb0c   :  { %4226 = vpow2.f32 %v2403_v13  ;;  %v4163_v13 = vld [vmem:[#allocation13 + $0x38] sm:$0xff]  }
 0xb0d   :  { %4228 = vrcp.f32 %v2199_v14  ;;  %v4171_v14 = vld [vmem:[#allocation13 + $0x78] sm:$0xff]  }
 0xb0e   :  { %v4225_v56 = vpop.eup %4224 }
 0xb0f   :  { %v2202_v16 = vmul.f32 %v4225_v56, %v4221_v3  ;;  %v4156_v3 = vld [vmem:[#allocation13] sm:$0xff]  }
 0xb11   :  { %v2204_v17 = vpack.c.bf16 %v2202_v16, %v2202_v16 }
 0xb13   :  { %3732 = vmatmul.mubr.msk.bf16.vlgmr.msra.gmra.mrb[52].mxu1 %vm1145_vm2, %v2204_v17 }
 0xb14   :  { %3736 = vmatpush3.bf16.msra.mxu1 %v2256_v18  ;;  %3737 = vmatprep.mubr.msk.bf16.mxu1 %vm4575_vm0, %v4574_v38 }
 0xb15   :  { %3747 = vmatprep.subr.bf16.mxu1 %v4574_v38 }
 0xb16   :  { %v4227_v0 = vpop.eup %4226 }
 0xb17   :  { %v4229_v19 = vpop.eup %4228  ;;  %v2407_v20 = vsel %vm1145_vm2, %v4227_v0, 0.0 }
 0xb18   :  { %v2203_v21 = vmul.f32 %v4229_v19, %v4223_v8  ;;  %2408 = vadd.xlane.f32.xlu0 %v2407_v20  ;;  %v4158_v8 = vld [vmem:[#allocation13 + $0x10] sm:$0xff]   ;;  %v4173_v19 = vld [vmem:[#allocation14 + $0x8] sm:$0xff]  }
 0xb19   :  { %v4174_v20 = vld [vmem:[#allocation14 + $0x10] sm:$0xff]  }
 0xb1a   :  { %v2205_v22 = vpack.c.bf16 %v2203_v21, %v2203_v21  ;;  %v4175_v21 = vld [vmem:[#allocation14 + $0x18] sm:$0xff]  }
 0xb1c   :  { %3738 = vmatmul.mubr.msk.bf16.vlgmr.msra.gmra.mrb[56].mxu1 %vm1145_vm2, %v2205_v22  ;;  %v4176_v22 = vld [vmem:[#allocation14 + $0x20] sm:$0xff]  }
 0xb1d   :  { %3748 = vmatpush3.bf16.xpose.msra.mxu1 %v2099_v23  ;;  %3749 = vmatprep.mubr.msk.bf16.mxu1 %vm4575_vm0, %v4574_v38  ;;  %v4177_v23 = vld [vmem:[#allocation14 + $0x28] sm:$0xff]  }
 0xb1e   :  { %3759 = vmatprep.subr.bf16.mxu1 %v4574_v38 }
 0xb24   :  { %3750 = vmatmul.mubr.bf16.vlgmr.msra.gmra.mrb[60].mxu1 %v2097_v25 }
 0xb25   :  { %3760 = vmatpush3.bf16.msra.mxu1 %v2469_v26  ;;  %3761 = vmatprep.mubr.msk.bf16.mxu1 %vm4575_vm0, %v4574_v38 }
 0xb26   :  { %3785 = vmatprep.subr.bf16.mxu1 %v4574_v38 }
 0xba5   :  { %v2409_v27 = vpop.xlane.xlu0 %2408 }
 0xba6   :  { %4230 = vrcp.f32 %v2409_v27 }
 0xbb0   :  { %v4231_v31 = vpop.eup %4230 }
 0xbb1   :  { %v2415_v32 = vmul.f32 %v4231_v31, %v4227_v0  ;;  %v4178_v31 = vld [vmem:[#allocation14 + $0x30] sm:$0xff]  }
 0xbb3   :  { %v2417_v33 = vpack.c.bf16 %v2415_v32, %v2415_v32  ;;  %v4179_v32 = vld [vmem:[#allocation14 + $0x38] sm:$0xff]  }
 0xbb5   :  { %3756 = vmatmul.mubr.msk.bf16.vlgmr.msra.gmra.mrb[20].mxu0 %vm1145_vm2, %v2417_v33 }
 0xbb6   :  { %3781 = vmatprep.mubr.msk.bf16.mxu0 %vm4575_vm0, %v4574_v38  ;;  %3766 = vmatpush3.bf16.msra.mxu0 %v4164_v59 }
 0xbb7   :  { %3767 = vmatprep.subr.bf16.mxu0 %v4574_v38 }
 0xbba   :  { %3768 = vmatpush3.bf16.msra.mxu0 %v4165_v60 }
 0xbbb   :  { %3769 = vmatprep.subr.bf16.mxu0 %v4574_v38 }
 0xbbe   :  { %3770 = vmatpush3.bf16.msra.mxu0 %v4166_v61 }
 0xbbf   :  { %3771 = vmatprep.subr.bf16.mxu0 %v4574_v38 }
 0xbc2   :  { %3772 = vmatpush3.bf16.msra.mxu0 %v4167_v30 }
 0xbc3   :  { %3773 = vmatprep.subr.bf16.mxu0 %v4574_v38 }
 0xbc6   :  { %3774 = vmatpush3.bf16.msra.mxu0 %v4168_v34 }
 0xbc7   :  { %3775 = vmatprep.subr.bf16.mxu0 %v4574_v38 }
 0xbca   :  { %3776 = vmatpush3.bf16.msra.mxu0 %v4169_v35 }
 0xbcb   :  { %3777 = vmatprep.subr.bf16.mxu0 %v4574_v38 }
 0xbce   :  { %3778 = vmatpush3.bf16.msra.mxu0 %v4170_v62 }
 0xbcf   :  { %3779 = vmatprep.subr.bf16.mxu0 %v4574_v38 }
 0xbd2   :  { %3780 = vmatpush3.bf16.msra.mxu0 %v4171_v14 }
 0xbd3   :  { %3805 = vmatprep.subr.bf16.mxu0 %v4574_v38 }
 0xbe6   :  { %v5012_v28 = vpop.f32.mrb[52].mxu1 }
 0xbe7   :  { %v3733_v29 = vpop.f32.mrb[53].mxu1 }
 0xbe8   :  { %v2249_v36 = vpop.f32.mrb[54].mxu1 }
 0xbe9   :  { %v3734_v37 = vpop.f32.mrb[55].mxu1 }
 0xbef   :  { %v5014_v39 = vpop.f32.mrb[56].mxu1 }
 0xbf0   :  { %v2298_v40 = vpack.c.bf16 %v5014_v39, %v5012_v28  ;;  %v3739_v41 = vpop.f32.mrb[57].mxu1 }
 0xbf1   :  { %v2295_v42 = vpop.f32.mrb[58].mxu1 }
 0xbf2   :  { %v3740_v43 = vpop.f32.mrb[59].mxu1 }
 0xbf3   :  { %v4180_v43 = vld [vmem:[#allocation16] sm:$0xff]  }
 0xbf7   :  { %v2389_v44 = vpop.f32.mrb[60].mxu1 }
 0xbf8   :  { %v3751_v45 = vpop.f32.mrb[61].mxu1  ;;  %v2398_v46 = vsel %vm1145_vm2, %v2389_v44, -inf }
 0xbf9   :  { %2399 = vmax.xlane.f32.xlu1 %v2398_v46  ;;  %v2392_v47 = vpop.f32.mrb[62].mxu1  ;;  %v4184_v45 = vld [vmem:[#allocation16 + $0x20] sm:$0xff]   ;;  %v4185_v46 = vld [vmem:[#allocation16 + $0x28] sm:$0xff]  }
 0xbfa   :  { %v3752_v48 = vpop.f32.mrb[63].mxu1  ;;  %v4186_v47 = vld [vmem:[#allocation16 + $0x30] sm:$0xff]  }
 0xbfb   :  { %v4187_v48 = vld [vmem:[#allocation16 + $0x38] sm:$0xff]  }
 0xc86   :  { %v2400_v49 = vpop.xlane.xlu1 %2399 }
 0xc87   :  { %v2402_v50 = vsub.f32 %v2389_v44, %v2400_v49  ;;  %v4181_v44 = vld [vmem:[#allocation16 + $0x8] sm:$0xff]   ;;  %v208_v49 = vlaneseq }
 0xc88   :  { %v5019_v51 = vpop.f32.mrb[20].mxu0 }
 0xc89   :  { %v2405_v52 = vmul.f32 1.442695, %v2402_v50  ;;  %v3757_v53 = vpop.f32.mrb[21].mxu0  ;;  %v5075_v50 = vshrl.u32 %v208_v49, 7 }
 0xc8a   :  { %v2462_v54 = vpop.f32.mrb[22].mxu0 }
 0xc8b   :  { %4232 = vpow2.f32 %v2405_v52  ;;  %v3758_v55 = vpop.f32.mrb[23].mxu0  ;;  %v5081_v52 = vld [vmem:[%s5169_s12] sm:$0x3] }
 0xc95   :  { %v4233_v57 = vpop.eup %4232 }
 0xc96   :  { %v2410_v58 = vsel %vm1145_vm2, %v4233_v57, 0.0 }
 0xc97   :  { %2411 = vadd.xlane.f32.xlu1 %v2410_v58 }
 0xd24   :  { %v2412_v63 = vpop.xlane.xlu1 %2411 }
 0xd25   :  { %4234 = vrcp.f32 %v2412_v63 }
 0xd2f   :  { %v4235_v1 = vpop.eup %4234 }
 0xd30   :  { %v2416_v2 = vmul.f32 %v4235_v1, %v4233_v57 }
 0xd32   :  { %v2418_v5 = vpack.c.bf16 %v2416_v2, %v2416_v2 }
 0xd34   :  { %3762 = vmatmul.mubr.msk.bf16.vlgmr.msra.gmra.mrb[64].mxu1 %vm1145_vm2, %v2418_v5 }
 0xd35   :  { %3786 = vmatpush3.bf16.msra.mxu1 %v4156_v3  ;;  %3801 = vmatprep.mubr.msk.bf16.mxu1 %vm4575_vm0, %v4574_v38 }
 0xd36   :  { %3787 = vmatprep.subr.bf16.mxu1 %v4574_v38 }
 0xd39   :  { %3788 = vmatpush3.bf16.msra.mxu1 %v4157_v7 }
 0xd3a   :  { %3789 = vmatprep.subr.bf16.mxu1 %v4574_v38 }
 0xd3d   :  { %3790 = vmatpush3.bf16.msra.mxu1 %v4158_v8 }
 0xd3e   :  { %3791 = vmatprep.subr.bf16.mxu1 %v4574_v38 }
 0xd41   :  { %3792 = vmatpush3.bf16.msra.mxu1 %v4159_v9 }
 0xd42   :  { %3793 = vmatprep.subr.bf16.mxu1 %v4574_v38 }
 0xd45   :  { %3794 = vmatpush3.bf16.msra.mxu1 %v4160_v10 }
 0xd46   :  { %3795 = vmatprep.subr.bf16.mxu1 %v4574_v38 }
 0xd49   :  { %3796 = vmatpush3.bf16.msra.mxu1 %v4161_v11 }
 0xd4a   :  { %3797 = vmatprep.subr.bf16.mxu1 %v4574_v38 }
 0xd4d   :  { %3798 = vmatpush3.bf16.msra.mxu1 %v4162_v12 }
 0xd4e   :  { %3799 = vmatprep.subr.bf16.mxu1 %v4574_v38 }
 0xd51   :  { %3800 = vmatpush3.bf16.msra.mxu1 %v4163_v13 }
 0xd52   :  { %3825 = vmatprep.subr.bf16.mxu1 %v4574_v38 }
 0xd54   :  { %3802 = vmatmul.mubr.bf16.vlgmr.msra.gmra.mrb[68].mxu1 %v2298_v40 }
 0xd55   :  { %3841 = vmatprep.mubr.msk.bf16.mxu1 %vm4575_vm0, %v4574_v38  ;;  %3826 = vmatpush3.bf16.msra.mxu1 %v4180_v43  ;;  %v4191_v43 = vld [vmem:[#allocation17 + $0x18] sm:$0xff]  }
 0xd56   :  { %3827 = vmatprep.subr.bf16.mxu1 %v4574_v38 }
 0xd59   :  { %3828 = vmatpush3.bf16.msra.mxu1 %v4181_v44  ;;  %v4192_v44 = vld [vmem:[#allocation17 + $0x20] sm:$0xff]  }
 0xd5a   :  { %3829 = vmatprep.subr.bf16.mxu1 %v4574_v38 }
 0xe07   :  { %v2505_v56 = vpop.f32.mrb[64].mxu1 }
 0xe08   :  { %v2511_v16 = vpack.c.bf16 %v2505_v56, %v5019_v51  ;;  %v3763_v17 = vpop.f32.mrb[65].mxu1  ;;  %v2728_v51 = vsub.s32 0, %v5075_v50 }
 0xe09   :  { %v2508_v18 = vpop.f32.mrb[66].mxu1 }
 0xe0a   :  { %v3764_v0 = vpop.f32.mrb[67].mxu1  ;;  %3782 = vmatmul.mubr.bf16.vlgmr.msra.gmra.mrb[24].mxu0 %v2511_v16  ;;  %v2729_v53 = vrot.slane %v5081_v52, %v2728_v51 }
 0xe0b   :  { %3806 = vmatpush3.bf16.msra.mxu0 %v4172_v15  ;;  %3821 = vmatprep.mubr.msk.bf16.mxu0 %vm4575_vm0, %v4574_v38  ;;  %v5089_v15 = vld [vmem:[%s5168_s11] sm:$0x1f]  ;;  %s4576_s11 = smov [#allocation21]  }
 0xe0c   :  { %3807 = vmatprep.subr.bf16.mxu0 %v4574_v38  ;;  %v2857_v16 = vrot.slane %v5089_v15, %v2728_v51  ;;  %s3285_s5 = sshll.u32 %s4576_s11, 4  ;;  %s3286_s5 = int_to_ptr.vmem [resolvable:$true] %s3285_s5 }
 0xe0d   :  { %s4496_s21 = scalar_lea.vmem %s3286_s5, 256  ;;  %p4501_p5 = scmp.lt.s32.totalorder %s3286_s5, %s3286_s5 }
 0xe0e   :  { %p4497_p4 = scmp.ne.s32.totalorder %s3286_s5, %s4496_s21  ;;  %p4502_p6 = scmp.lt.s32.totalorder %s4496_s21, %s4496_s21 }
 0xe0f   :  { %3808 = vmatpush3.bf16.msra.mxu0 %v4173_v19 }
 0xe10   :  { %3809 = vmatprep.subr.bf16.mxu0 %v4574_v38  ;;  %p4503_p7 = por %p4502_p6, %p4501_p5 }
 0xe12   :  { %p4504_p8 = pnand %p4503_p7, %p4497_p4 }
 0xe13   :  { %3810 = vmatpush3.bf16.msra.mxu0 %v4174_v20 }
 0xe14   :  { %3811 = vmatprep.subr.bf16.mxu0 %v4574_v38 }
 0xe17   :  { %3812 = vmatpush3.bf16.msra.mxu0 %v4175_v21 }
 0xe18   :  { %3813 = vmatprep.subr.bf16.mxu0 %v4574_v38 }
 0xe1b   :  { %3814 = vmatpush3.bf16.msra.mxu0 %v4176_v22 }
 0xe1c   :  { %3815 = vmatprep.subr.bf16.mxu0 %v4574_v38 }
 0xe1f   :  { %3816 = vmatpush3.bf16.msra.mxu0 %v4177_v23 }
 0xe20   :  { %3817 = vmatprep.subr.bf16.mxu0 %v4574_v38 }
 0xe23   :  { %3818 = vmatpush3.bf16.msra.mxu0 %v4178_v31 }
 0xe24   :  { %3819 = vmatprep.subr.bf16.mxu0 %v4574_v38 }
 0xe27   :  { %v2700_v24 = vpop.f32.mrb[68].mxu1  ;;  %3820 = vmatpush3.bf16.msra.mxu0 %v4179_v32 }
 0xe28   :  { %v3803_v25 = vpop.f32.mrb[69].mxu1  ;;  %3845 = vmatprep.subr.bf16.mxu0 %v4574_v38 }
 0xe29   :  { %v2703_v26 = vpop.f32.mrb[70].mxu1  ;;  %v4189_v25 = vld [vmem:[#allocation17 + $0x8] sm:$0xff]  }
 0xe2a   :  { %v3804_v27 = vpop.f32.mrb[71].mxu1 }
 0xedd   :  { %v2611_v33 = vpop.f32.mrb[24].mxu0 }
 0xede   :  { %v2701_v28 = vadd.f32 %v2700_v24, %v2611_v33  ;;  %v3783_v29 = vpop.f32.mrb[25].mxu0  ;;  %v4188_v24 = vld [vmem:[#allocation17] sm:$0xff]  }
 0xedf   :  { %v2614_v36 = vpop.f32.mrb[26].mxu0 }
 0xee0   :  { %v5058_v37 = vadd.f32 %v2701_v28, %v4949_v4  ;;  %v2704_v39 = vadd.f32 %v2703_v26, %v2614_v36  ;;  %v3784_v40 = vpop.f32.mrb[27].mxu0  ;;  %v4182_v4 = vld [vmem:[#allocation16 + $0x10] sm:$0xff]   ;;  %v209_v26 = vand.u32 127, %v208_v49 }
 0xee1   :  { %3830 = vmatpush3.bf16.msra.mxu1 %v4182_v4  ;;  %v4193_v4 = vld [vmem:[#allocation17 + $0x28] sm:$0xff]  }
 0xee2   :  { %v5061_v41 = vadd.f32 %v2704_v39, %v4951_v6  ;;  %3831 = vmatprep.subr.bf16.mxu1 %v4574_v38  ;;  %v4183_v6 = vld [vmem:[#allocation16 + $0x18] sm:$0xff]   ;;  %vm210_vm3 = vcmp.lt.s32.totalorder %v209_v26, 32 }
 0xee3   :  { %v5097_v33 = vsel %vm210_vm3, 1.0, %v4574_v38 }
 0xee4   :  { %v2709_v42 = vpack.c.bf16 %v5061_v41, %v5058_v37 }
 0xee5   :  { %3832 = vmatpush3.bf16.msra.mxu1 %v4183_v6  ;;  %v4194_v6 = vld [vmem:[#allocation17 + $0x30] sm:$0xff]  }
 0xee6   :  { %3822 = vmatmul.mubr.bf16.vlgmr.msra.gmra.mrb[28].mxu0 %v2709_v42  ;;  %3833 = vmatprep.subr.bf16.mxu1 %v4574_v38  ;;  %v4190_v42 = vld [vmem:[#allocation17 + $0x10] sm:$0xff]  }
 0xee7   :  { %3861 = vmatprep.mubr.msk.bf16.mxu0 %vm4575_vm0, %v4574_v38  ;;  %3846 = vmatpush3.bf16.msra.mxu0 %v4188_v24 }
 0xee8   :  { %3847 = vmatprep.subr.bf16.mxu0 %v4574_v38 }
 0xee9   :  { %3834 = vmatpush3.bf16.msra.mxu1 %v4184_v45  ;;  %v4195_v45 = vld [vmem:[#allocation17 + $0x38] sm:$0xff]  }
 0xeea   :  { %3835 = vmatprep.subr.bf16.mxu1 %v4574_v38 }
 0xeeb   :  { %3848 = vmatpush3.bf16.msra.mxu0 %v4189_v25 }
 0xeec   :  { %3849 = vmatprep.subr.bf16.mxu0 %v4574_v38 }
 0xeed   :  { %3836 = vmatpush3.bf16.msra.mxu1 %v4185_v46 }
 0xeee   :  { %3837 = vmatprep.subr.bf16.mxu1 %v4574_v38 }
 0xeef   :  { %3850 = vmatpush3.bf16.msra.mxu0 %v4190_v42 }
 0xef0   :  { %3851 = vmatprep.subr.bf16.mxu0 %v4574_v38 }
 0xef1   :  { %3838 = vmatpush3.bf16.msra.mxu1 %v4186_v47 }
 0xef2   :  { %3839 = vmatprep.subr.bf16.mxu1 %v4574_v38 }
 0xef3   :  { %3852 = vmatpush3.bf16.msra.mxu0 %v4191_v43 }
 0xef4   :  { %3853 = vmatprep.subr.bf16.mxu0 %v4574_v38 }
 0xef5   :  { %3840 = vmatpush3.bf16.msra.mxu1 %v4187_v48 }
 0xef6   :  { %3865 = vmatprep.subr.bf16.mxu1 %v4574_v38 }
 0xef7   :  { %3854 = vmatpush3.bf16.msra.mxu0 %v4192_v44 }
 0xef8   :  { %3855 = vmatprep.subr.bf16.mxu0 %v4574_v38 }
 0xefb   :  { %3856 = vmatpush3.bf16.msra.mxu0 %v4193_v4 }
 0xefc   :  { %3857 = vmatprep.subr.bf16.mxu0 %v4574_v38 }
 0xeff   :  { %3858 = vmatpush3.bf16.msra.mxu0 %v4194_v6 }
 0xf00   :  { %3859 = vmatprep.subr.bf16.mxu0 %v4574_v38 }
 0xf03   :  { %3860 = vmatpush3.bf16.msra.mxu0 %v4195_v45 }
 0xfb9   :  { %v2812_v54 = vpop.f32.mrb[28].mxu0 }
 0xfba   :  { %v2813_v55 = vadd.f32 %v2812_v54, %v2729_v53  ;;  %v3823_v57 = vpop.f32.mrb[29].mxu0  ;;  %v2975_v54 = vsub.s32 1, %v5075_v50 }
 0xfbb   :  { %v2815_v58 = vpop.f32.mrb[30].mxu0 }
 0xfbc   :  { %v2819_v59 = vmul.f32 %v2813_v55, %v2813_v55  ;;  %v2816_v60 = vadd.f32 %v2815_v58, %v2729_v53  ;;  %v3824_v61 = vpop.f32.mrb[31].mxu0  ;;  %v2976_v57 = vrot.slane %v5089_v15, %v2975_v54  ;;  %v3043_v25 = vrot.slane %v5081_v52, %v2975_v54 }
 0xfbe   :  { %v2821_v30 = vmul.f32 %v2819_v59, %v2813_v55  ;;  %v2820_v34 = vmul.f32 %v2816_v60, %v2816_v60 }
 0xfc0   :  { %v2823_v35 = vmul.f32 0.044715, %v2821_v30  ;;  %v2822_v62 = vmul.f32 %v2820_v34, %v2816_v60 }
 0xfc2   :  { %v2825_v63 = vadd.f32 %v2823_v35, %v2813_v55  ;;  %v2824_v1 = vmul.f32 0.044715, %v2822_v62 }
 0xfc4   :  { %v2827_v2 = vmul.f32 0.7978846, %v2825_v63  ;;  %v2826_v3 = vadd.f32 %v2824_v1, %v2816_v60  ;;  %v4252_v63 = vld [vmem:[#allocation2] sm:$0xff] }
 0xfc6   :  { %4236 = vtanh.f32 %v2827_v2  ;;  %v2828_v5 = vmul.f32 0.7978846, %v2826_v3 }
 0xfc8   :  { %4238 = vtanh.f32 %v2828_v5  ;;  %v4253_v5 = vld [vmem:[#allocation2 + $0x8] sm:$0xff] }
 0xfd0   :  { %v4237_v7 = vpop.eup %4236 }
 0xfd1   :  { %v2831_v8 = vadd.f32 1.0, %v4237_v7 }
 0xfd2   :  { %v4239_v9 = vpop.eup %4238 }
 0xfd3   :  { %v2833_v10 = vmul.f32 0.5, %v2831_v8  ;;  %v2832_v11 = vadd.f32 1.0, %v4239_v9  ;;  %v4196_v8 = vld [vmem:[#allocation19] sm:$0xff]   ;;  %v4197_v9 = vld [vmem:[#allocation19 + $0x8] sm:$0xff]  }
 0xfd5   :  { %v2834_v12 = vmul.f32 0.5, %v2832_v11  ;;  %v2835_v13 = vmul.f32 %v2833_v10, %v2813_v55  ;;  %v2981_v55 = vsub.s32 2, %v5075_v50  ;;  %v4198_v10 = vld [vmem:[#allocation19 + $0x10] sm:$0xff]   ;;  %v4199_v11 = vld [vmem:[#allocation19 + $0x18] sm:$0xff]  }
 0xfd7   :  { %v2836_v14 = vmul.f32 %v2834_v12, %v2816_v60  ;;  %v2982_v60 = vrot.slane %v5089_v15, %v2981_v55  ;;  %v4200_v12 = vld [vmem:[#allocation19 + $0x20] sm:$0xff]  }
 0xfd9   :  { %v2837_v56 = vpack.c.bf16 %v2836_v14, %v2835_v13  ;;  %v4201_v13 = vld [vmem:[#allocation19 + $0x28] sm:$0xff]   ;;  %v4202_v14 = vld [vmem:[#allocation19 + $0x30] sm:$0xff]  }
 0xfdb   :  { %3842 = vmatmul.mubr.bf16.vlgmr.msra.gmra.mrb[72].mxu1 %v2837_v56  ;;  %v4203_v56 = vld [vmem:[#allocation19 + $0x38] sm:$0xff]  }
 0xfdc   :  { %3881 = vmatprep.mubr.msk.bf16.mxu1 %vm4575_vm0, %v4574_v38  ;;  %3866 = vmatpush3.bf16.msra.mxu1 %v4196_v8 }
 0xfdd   :  { %3867 = vmatprep.subr.bf16.mxu1 %v4574_v38 }
 0xfe0   :  { %3868 = vmatpush3.bf16.msra.mxu1 %v4197_v9 }
 0xfe1   :  { %3869 = vmatprep.subr.bf16.mxu1 %v4574_v38 }
 0xfe4   :  { %3870 = vmatpush3.bf16.msra.mxu1 %v4198_v10 }
 0xfe5   :  { %3871 = vmatprep.subr.bf16.mxu1 %v4574_v38 }
 0xfe8   :  { %3872 = vmatpush3.bf16.msra.mxu1 %v4199_v11 }
 0xfe9   :  { %3873 = vmatprep.subr.bf16.mxu1 %v4574_v38 }
 0xfec   :  { %3874 = vmatpush3.bf16.msra.mxu1 %v4200_v12 }
 0xfed   :  { %3875 = vmatprep.subr.bf16.mxu1 %v4574_v38 }
 0xff0   :  { %3876 = vmatpush3.bf16.msra.mxu1 %v4201_v13 }
 0xff1   :  { %3877 = vmatprep.subr.bf16.mxu1 %v4574_v38 }
 0xff4   :  { %3878 = vmatpush3.bf16.msra.mxu1 %v4202_v14 }
 0xff5   :  { %3879 = vmatprep.subr.bf16.mxu1 %v4574_v38 }
 0xff8   :  { %3880 = vmatpush3.bf16.msra.mxu1 %v4203_v56 }
0x10ae   :  { %v2940_v17 = vpop.f32.mrb[72].mxu1 }
0x10af   :  { %v2941_v18 = vadd.f32 %v2940_v17, %v2857_v16  ;;  %v3843_v0 = vpop.f32.mrb[73].mxu1 }
0x10b0   :  { %v2943_v19 = vpop.f32.mrb[74].mxu1 }
0x10b1   :  { %v2944_v20 = vadd.f32 %v2943_v19, %v2857_v16  ;;  %v3844_v21 = vpop.f32.mrb[75].mxu1  ;;  %v2947_v22 = vadd.f32 %v2941_v18, %v5058_v37 }
0x10b3   :  { %2949 = vadd.xlane.f32.xlu0 %v2947_v22  ;;  %v2948_v23 = vadd.f32 %v2944_v20, %v5061_v41 }
0x10b5   :  { %2951 = vadd.xlane.f32.xlu1 %v2948_v23 }
0x1140   :  { %v2950_v27 = vpop.xlane.xlu0 %2949 }
0x1141   :  { %v2953_v31 = vmul.f32 0.03125, %v2950_v27 }
0x1142   :  { %v2952_v32 = vpop.xlane.xlu1 %2951 }
0x1143   :  { %v2955_v28 = vsub.f32 %v2947_v22, %v2953_v31  ;;  %v2954_v29 = vmul.f32 0.03125, %v2952_v32 }
0x1145   :  { %v2956_v36 = vsub.f32 %v2948_v23, %v2954_v29  ;;  %v2957_v37 = vmul.f32 %v5097_v33, %v2955_v28 }
0x1147   :  { %v2959_v39 = vmul.f32 %v2957_v37, %v2957_v37  ;;  %v2958_v40 = vmul.f32 %v5097_v33, %v2956_v36 }
0x1149   :  { %2961 = vadd.xlane.f32.xlu0 %v2959_v39  ;;  %v2960_v41 = vmul.f32 %v2958_v40, %v2958_v40 }
0x114b   :  { %2963 = vadd.xlane.f32.xlu1 %v2960_v41 }
0x11d6   :  { %v2962_v46 = vpop.xlane.xlu0 %2961 }
0x11d7   :  { %v2965_v47 = vmul.f32 0.03125, %v2962_v46 }
0x11d8   :  { %v2964_v48 = vpop.xlane.xlu1 %2963 }
0x11d9   :  { %v2967_v49 = vadd.f32 1e-05, %v2965_v47  ;;  %v2966_v51 = vmul.f32 0.03125, %v2964_v48 }
0x11db   :  { %4240 = vrsqrt.f32 %v2967_v49  ;;  %v2968_v53 = vadd.f32 1e-05, %v2966_v51 }
0x11dd   :  { %4242 = vrsqrt.f32 %v2968_v53 }
0x11e5   :  { %v4241_v58 = vpop.eup %4240 }
0x11e6   :  { %v2971_v59 = vmul.f32 %v4241_v58, %v2957_v37 }
0x11e7   :  { %v4243_v61 = vpop.eup %4242 }
0x11e8   :  { %v2977_v30 = vmul.f32 %v2976_v57, %v2971_v59  ;;  %v2972_v34 = vmul.f32 %v4243_v61, %v2958_v40  ;;  %v3019_v61 = vsub.s32 4, %v5075_v50 }
0x11ea   :  { %v2983_v35 = vadd.f32 %v2982_v60, %v2977_v30  ;;  %v2978_v62 = vmul.f32 %v2976_v57, %v2972_v34 }
0x11ec   :  { %v2985_v1 = vsub.f32 %v4252_v63, %v2983_v35  ;;  %v2984_v2 = vadd.f32 %v2982_v60, %v2978_v62  ;;  %v3013_v60 = vsub.s32 3, %v5075_v50  ;;  %v3020_v62 = vrot.slane %v5089_v15, %v3019_v61 }
0x11ee   :  { %2987 = vadd.xlane.f32.xlu0 %v2985_v1  ;;  %v3023_v3 = vpack.c.bf16 %v2984_v2, %v2983_v35  ;;  %v2986_v7 = vsub.f32 %v4253_v5, %v2984_v2  ;;  %v3014_v30 = vrot.slane %v5089_v15, %v3013_v60 }
0x11f0   :  { %3862 = vmatmul.mubr.bf16.vlgmr.msra.gmra.mrb[32].mxu0 %v3023_v3  ;;  %2989 = vadd.xlane.f32.xlu1 %v2986_v7 }
0x127b   :  { %v2988_v16 = vpop.xlane.xlu0 %2987 }
0x127c   :  { %v2991_v17 = vmul.f32 0.03125, %v2988_v16 }
0x127d   :  { %v2990_v18 = vpop.xlane.xlu1 %2989 }
0x127e   :  { %v2993_v0 = vsub.f32 %v2985_v1, %v2991_v17  ;;  %v2992_v19 = vmul.f32 0.03125, %v2990_v18 }
0x1280   :  { %v2994_v20 = vsub.f32 %v2986_v7, %v2992_v19  ;;  %v2995_v21 = vmul.f32 %v5097_v33, %v2993_v0 }
0x1282   :  { %v2997_v22 = vmul.f32 %v2995_v21, %v2995_v21  ;;  %v2996_v23 = vmul.f32 %v5097_v33, %v2994_v20 }
0x1284   :  { %2999 = vadd.xlane.f32.xlu0 %v2997_v22  ;;  %v2998_v24 = vmul.f32 %v2996_v23, %v2996_v23 }
0x1286   :  { %3001 = vadd.xlane.f32.xlu1 %v2998_v24 }
0x12c3   :  { %v3126_v26 = vpop.f32.mrb[32].mxu0 }
0x12c4   :  { %v3127_v38 = vadd.f32 %v3126_v26, %v3043_v25  ;;  %v3863_v27 = vpop.f32.mrb[33].mxu0 }
0x12c5   :  { %v3129_v31 = vpop.f32.mrb[34].mxu0 }
0x12c6   :  { %v3133_v32 = vmul.f32 %v3127_v38, %v3127_v38  ;;  %v3130_v28 = vadd.f32 %v3129_v31, %v3043_v25  ;;  %v3864_v29 = vpop.f32.mrb[35].mxu0 }
0x12c8   :  { %v3135_v36 = vmul.f32 %v3133_v32, %v3127_v38  ;;  %v3134_v37 = vmul.f32 %v3130_v28, %v3130_v28 }
0x12ca   :  { %v3137_v39 = vmul.f32 0.044715, %v3135_v36  ;;  %v3136_v40 = vmul.f32 %v3134_v37, %v3130_v28 }
0x12cc   :  { %v3139_v41 = vadd.f32 %v3137_v39, %v3127_v38  ;;  %v3138_v42 = vmul.f32 0.044715, %v3136_v40 }
0x12ce   :  { %v3141_v43 = vmul.f32 0.7978846, %v3139_v41  ;;  %v3140_v33 = vadd.f32 %v3138_v42, %v3130_v28 }
0x12d0   :  { %4244 = vtanh.f32 %v3141_v43  ;;  %v3142_v44 = vmul.f32 0.7978846, %v3140_v33 }
0x12d2   :  { %4246 = vtanh.f32 %v3142_v44 }
0x12da   :  { %v4245_v4 = vpop.eup %4244 }
0x12db   :  { %v3145_v52 = vadd.f32 1.0, %v4245_v4 }
0x12dc   :  { %v4247_v6 = vpop.eup %4246 }
0x12dd   :  { %v3147_v45 = vmul.f32 0.5, %v3145_v52  ;;  %v3146_v46 = vadd.f32 1.0, %v4247_v6 }
0x12df   :  { %v3148_v47 = vmul.f32 0.5, %v3146_v46  ;;  %v3149_v48 = vmul.f32 %v3147_v45, %v3127_v38 }
0x12e1   :  { %v3150_v49 = vmul.f32 %v3148_v47, %v3130_v28 }
0x12e3   :  { %v3151_v51 = vpack.c.bf16 %v3150_v49, %v3149_v48 }
0x12e5   :  { %3882 = vmatmul.mubr.bf16.vlgmr.msra.gmra.mrb[76].mxu1 %v3151_v51 }
0x1311   :  { %v3000_v53 = vpop.xlane.xlu0 %2999 }
0x1312   :  { %v3003_v54 = vmul.f32 0.03125, %v3000_v53 }
0x1313   :  { %v3002_v55 = vpop.xlane.xlu1 %3001 }
0x1314   :  { %v3005_v57 = vadd.f32 1e-05, %v3003_v54  ;;  %v3004_v58 = vmul.f32 0.03125, %v3002_v55 }
0x1316   :  { %4248 = vrsqrt.f32 %v3005_v57  ;;  %v3006_v59 = vadd.f32 1e-05, %v3004_v58 }
0x1318   :  { %4250 = vrsqrt.f32 %v3006_v59 }
0x1320   :  { %v4249_v34 = vpop.eup %4248 }
0x1321   :  { %v3009_v35 = vmul.f32 %v4249_v34, %v2995_v21 }
0x1322   :  { %v4251_v63 = vpop.eup %4250 }
0x1323   :  { %v3010_v1 = vmul.f32 %v4251_v63, %v2996_v23  ;;  %v3015_v2 = vmul.f32 %v3014_v30, %v3009_v35 }
0x1325   :  { %v3016_v3 = vmul.f32 %v3014_v30, %v3010_v1  ;;  %v3021_v5 = vadd.f32 %v3020_v62, %v3015_v2 }
0x1327   :  { %v3022_v7 = vadd.f32 %v3020_v62, %v3016_v3  ;;  %3266 = vst [vmem:[#allocation21] sm:$0xff] %v3021_v5 }
0x1329   :  { %3267 = vst [vmem:[#allocation21 + $0x8] sm:$0xff] %v3022_v7 }
0x132a   :  { %4507 = shalt.err (!%p4504_p8)
}
0x132b   :  { %s4508_s2 = scalar_lea.hbm %s5172_s15, 256 }
0x132c   :  { %p4509_p9 = scmp.ne.s32.totalorder %s5172_s15, %s4508_s2  ;;  %p4512_p10 = scmp.lt.u32.totalorder %s4508_s2, %s5172_s15 }
0x132e   :  { %p4514_p11 = pnand %p4512_p10, %p4509_p9 }
0x1330   :  { %4517 = shalt.err (!%p4514_p11)
}
0x1331   :  { %3291 = dma.vmem_to_hbm [thread:$0]  %s3286_s5, 256, %s5172_s15, [#allocation22], %s4566_s9, %s4566_s9, %s4567_s14  }
0x1332   :  { %v3516_v50 = vld [vmem:[%s5170_s13] ss:$0 sm:$0xff]  ;;  %s4577_s22 = smov [#allocation20]  }
0x1333   :  { %s3273_s23 = sshll.u32 %s4577_s22, 4  ;;  %s3274_s23 = int_to_ptr.vmem [resolvable:$true] %s3273_s23 }
0x1334   :  { %s4518_s24 = scalar_lea.vmem %s3274_s23, 256  ;;  %p4523_p13 = scmp.lt.s32.totalorder %s3274_s23, %s3274_s23 }
0x1335   :  { %p4519_p12 = scmp.ne.s32.totalorder %s3274_s23, %s4518_s24  ;;  %p4524_p0 = scmp.lt.s32.totalorder %s4518_s24, %s4518_s24 }
0x1337   :  { %p4525_p1 = por %p4524_p0, %p4523_p13 }
0x1339   :  { %p4526_p2 = pnand %p4525_p1, %p4519_p12 }
0x13b8   :  { %v3257_v15 = vpop.f32.mrb[76].mxu1 }
0x13b9   :  { %v3258_v8 = vadd.f32 %v3516_v50, %v3257_v15  ;;  %v3883_v9 = vpop.f32.mrb[77].mxu1 }
0x13ba   :  { %v3260_v10 = vpop.f32.mrb[78].mxu1 }
0x13bb   :  { %3264 = vst [vmem:[#allocation20] sm:$0xff] %v3258_v8  ;;  %v3261_v11 = vadd.f32 %v3516_v50, %v3260_v10  ;;  %v3884_v12 = vpop.f32.mrb[79].mxu1 }
0x13bd   :  { %3265 = vst [vmem:[#allocation20 + $0x8] sm:$0xff] %v3261_v11 }
0x13be   :  { %4529 = shalt.err (!%p4526_p2)
}
0x13bf   :  { %s5175_s25 = sld [smem:[#allocation31_spill]] }
0x13c5   :  { %s4530_s4 = scalar_lea.hbm %s5175_s25, 256 }
0x13c6   :  { %p4531_p3 = scmp.ne.s32.totalorder %s5175_s25, %s4530_s4  ;;  %p4534_p4 = scmp.lt.u32.totalorder %s4530_s4, %s5175_s25 }
0x13c8   :  { %p4536_p5 = pnand %p4534_p4, %p4531_p3 }
0x13ca   :  { %4539 = shalt.err (!%p4536_p5)
}
0x13cb   :  { %3279 = dma.vmem_to_hbm [thread:$0]  %s3274_s23, 256, %s5175_s25, [#allocation4], %s4566_s9, %s4566_s9, %s4567_s14  }
0x13cc   :  { %4552 = dma.done.wait [#allocation4], 256  }
0x13cd   :  { %4553 = vsyncadd [#allocation4], 4294967040 }
0x13ce   :  { %4554 = dma.done.wait [#allocation22], 256  }
0x13cf   :  { %4555 = vsyncadd [#allocation22], 4294967040 }
0x13d0   :  { %3298 = vsyncpa [#allocation3], 1 }
0x13d1   :  { %3299 = vsyncpa [#allocation6], 1 }
0x13d2   :  { %3300 = vsyncpa [#allocation9], 1 }
0x13d3   :  { %3301 = vsyncpa [#allocation12], 1 }
0x13d4   :  { %3302 = vsyncpa [#allocation15], 1 }
0x13d5   :  { %3303 = vsyncpa [#allocation18], 1 }
0x13d6   :  { %3304 = vsyncpa [#allocation4], 1 }
0x13d7   :  { %3305 = vsyncpa [#allocation22], 1 }

// kernel: tpu_custom_call.1
= control target key start
LH: loop header
LB: loop body
LE: loop exit
PB: predicated region body
PF: predicated region fallthrough
CT: control target
= control target key end

     0   :  { %s5157_s0 = inlined_call_operand.hbm [shape: f32[2,8,128], index: 0, kind: input, shape index: {}]   ;;  %s5158_s1 = inlined_call_operand.hbm [shape: bf16[2,8,128], index: 1, kind: input, shape index: {}]   ;;  %s5159_s2 = inlined_call_operand.hbm [shape: bf16[128,768], index: 2, kind: input, shape index: {}]   ;;  %s5160_s3 = inlined_call_operand.hbm [shape: bf16[128,768], index: 3, kind: input, shape index: {}]   ;;  %s5161_s4 = inlined_call_operand.hbm [shape: bf16[2,128,128], index: 4, kind: input, shape index: {}]   ;;  %s5162_s5 = inlined_call_operand.hbm [shape: bf16[128,768], index: 5, kind: input, shape index: {}]   ;;  %s5163_s6 = inlined_call_operand.hbm [shape: bf16[2,128,128], index: 6, kind: input, shape index: {}]   ;;  %s5164_s7 = inlined_call_operand.hbm [shape: bf16[128,128], index: 7, kind: input, shape index: {}]   ;;  %s5165_s8 = inlined_call_operand.hbm [shape: bf16[128,128], index: 8, kind: input, shape index: {}]   ;;  %s5166_s9 = inlined_call_operand.hbm [shape: bf16[128,128], index: 9, kind: input, shape index: {}]   ;;  %s5167_s10 = inlined_call_operand.hbm [shape: bf16[128,128], index: 10, kind: input, shape index: {}]   ;;  %s5168_s11 = inlined_call_operand.vmem [shape: f32[5,128], index: 11, kind: input, shape index: {}]   ;;  %s5169_s12 = inlined_call_operand.vmem [shape: f32[2,128], index: 12, kind: input, shape index: {}]   ;;  %s5170_s13 = inlined_call_operand.vmem [shape: f32[1,128], index: 13, kind: input, shape index: {}]   ;;  %s5171_s14 = inlined_call_operand.hbm [shape: f32[2,8,128], index: 14, kind: output, shape index: {0}]   ;;  %s5172_s15 = inlined_call_operand.hbm [shape: f32[2,8,128], index: 15, kind: output, shape index: {1}]  }
   0x1   :  { %5174 = sst [smem:[#allocation31_spill]] %s5171_s14 }
   0x2   :  { %21 = vsyncpa [#allocation3], 0 }
   0x3   :  { %22 = vsyncpa [#allocation6], 0 }
   0x4   :  { %23 = vsyncpa [#allocation9], 0 }
   0x5   :  { %24 = vsyncpa [#allocation12], 0 }
   0x6   :  { %25 = vsyncpa [#allocation15], 0 }
   0x7   :  { %26 = vsyncpa [#allocation18], 0 }
   0x8   :  { %27 = vsyncpa [#allocation4], 0 }
   0x9   :  { %28 = vsyncpa [#allocation22], 0  ;;  %s4556_s18 = smov [#allocation5]   ;;  %s4254_s22 = scalar_lea.hbm %s5158_s1, 128 }
   0xa   :  { %s46_s19 = sshll.u32 %s4556_s18, 4  ;;  %p4255_p0 = scmp.ne.s32.totalorder %s5158_s1, %s4254_s22  ;;  %s47_s19 = int_to_ptr.vmem [resolvable:$true] %s46_s19 }
   0xb   :  { %p4258_p1 = scmp.lt.u32.totalorder %s4254_s22, %s5158_s1 }
   0xd   :  { %p4260_p2 = pnand %p4258_p1, %p4255_p0 }
   0xf   :  { %4263 = shalt.err (!%p4260_p2)
}
  0x10   :  { %s4264_s27 = scalar_lea.vmem %s47_s19, 128  ;;  %p4269_p4 = scmp.lt.s32.totalorder %s47_s19, %s47_s19 }
  0x11   :  { %p4265_p3 = scmp.ne.s32.totalorder %s47_s19, %s4264_s27  ;;  %p4270_p5 = scmp.lt.s32.totalorder %s4264_s27, %s4264_s27 }
  0x13   :  { %p4271_p6 = por %p4270_p5, %p4269_p4 }
  0x15   :  { %p4272_p7 = pnand %p4271_p6, %p4265_p3 }
  0x17   :  { %4275 = shalt.err (!%p4272_p7)
}
  0x18   :  { %s4557_s28 = smov 64   ;;  %s4558_s29 = smov 4  }
  0x19   :  { %52 = dma.hbm_to_vmem [thread:$0]  %s5158_s1, 128, %s47_s19, [#allocation6], %s4557_s28, %s4557_s28, %s4558_s29  }
  0x1a   :  { %s4559_s17 = smov [#allocation8]   ;;  %s4560_s20 = smov [#allocation11]  }
  0x1b   :  { %s70_s18 = sshll.u32 %s4559_s17, 4  ;;  %s94_s21 = sshll.u32 %s4560_s20, 4  ;;  %s71_s18 = int_to_ptr.vmem [resolvable:$true] %s70_s18  ;;  %s95_s21 = int_to_ptr.vmem [resolvable:$true] %s94_s21 }
  0x1c   :  { %s4276_s24 = scalar_lea.hbm %s5160_s3, 6144 }
  0x1d   :  { %p4277_p8 = scmp.ne.s32.totalorder %s5160_s3, %s4276_s24  ;;  %p4280_p9 = scmp.lt.u32.totalorder %s4276_s24, %s5160_s3 }
  0x1f   :  { %p4282_p10 = pnand %p4280_p9, %p4277_p8 }
  0x21   :  { %4285 = shalt.err (!%p4282_p10)
}
  0x22   :  { %s4286_s1 = scalar_lea.vmem %s71_s18, 6144  ;;  %p4291_p12 = scmp.lt.s32.totalorder %s71_s18, %s71_s18 }
  0x23   :  { %p4287_p11 = scmp.ne.s32.totalorder %s71_s18, %s4286_s1  ;;  %p4292_p13 = scmp.lt.s32.totalorder %s4286_s1, %s4286_s1 }
  0x25   :  { %p4293_p0 = por %p4292_p13, %p4291_p12 }
  0x27   :  { %p4294_p1 = pnand %p4293_p0, %p4287_p11 }
  0x29   :  { %4297 = shalt.err (!%p4294_p1)
}
  0x2a   :  { %s4561_s19 = smov 384   ;;  %s4562_s30 = smov 24  }
  0x2b   :  { %76 = dma.hbm_to_vmem [thread:$0]  %s5160_s3, 6144, %s71_s18, [#allocation9], %s4561_s19, %s4561_s19, %s4562_s30  }
  0x2c   :  { %s4298_s22 = scalar_lea.hbm %s5162_s5, 6144 }
  0x2d   :  { %p4299_p2 = scmp.ne.s32.totalorder %s5162_s5, %s4298_s22  ;;  %p4302_p3 = scmp.lt.u32.totalorder %s4298_s22, %s5162_s5 }
  0x2f   :  { %p4304_p4 = pnand %p4302_p3, %p4299_p2 }
  0x31   :  { %4307 = shalt.err (!%p4304_p4)
}
  0x32   :  { %s4308_s27 = scalar_lea.vmem %s95_s21, 6144  ;;  %p4313_p6 = scmp.lt.s32.totalorder %s95_s21, %s95_s21 }
  0x33   :  { %p4309_p5 = scmp.ne.s32.totalorder %s95_s21, %s4308_s27  ;;  %p4314_p7 = scmp.lt.s32.totalorder %s4308_s27, %s4308_s27 }
  0x35   :  { %p4315_p8 = por %p4314_p7, %p4313_p6 }
  0x37   :  { %p4316_p9 = pnand %p4315_p8, %p4309_p5 }
  0x39   :  { %4319 = shalt.err (!%p4316_p9)
}
  0x3a   :  { %100 = dma.hbm_to_vmem [thread:$0]  %s5162_s5, 6144, %s95_s21, [#allocation12], %s4561_s19, %s4561_s19, %s4562_s30  }
  0x3b   :  { %s4563_s1 = smov [#allocation14]   ;;  %s4564_s17 = smov [#allocation17]  }
  0x3c   :  { %s118_s16 = sshll.u32 %s4563_s1, 4  ;;  %s142_s14 = sshll.u32 %s4564_s17, 4  ;;  %s119_s16 = int_to_ptr.vmem [resolvable:$true] %s118_s16  ;;  %s143_s14 = int_to_ptr.vmem [resolvable:$true] %s142_s14 }
  0x3d   :  { %s4320_s23 = scalar_lea.hbm %s5164_s7, 1024 }
  0x3e   :  { %p4321_p10 = scmp.ne.s32.totalorder %s5164_s7, %s4320_s23  ;;  %p4324_p11 = scmp.lt.u32.totalorder %s4320_s23, %s5164_s7 }
  0x40   :  { %p4326_p12 = pnand %p4324_p11, %p4321_p10 }
  0x42   :  { %4329 = shalt.err (!%p4326_p12)
}
  0x43   :  { %s4330_s5 = scalar_lea.vmem %s119_s16, 1024  ;;  %p4335_p0 = scmp.lt.s32.totalorder %s119_s16, %s119_s16 }
  0x44   :  { %p4331_p13 = scmp.ne.s32.totalorder %s119_s16, %s4330_s5  ;;  %p4336_p1 = scmp.lt.s32.totalorder %s4330_s5, %s4330_s5 }
  0x46   :  { %p4337_p2 = por %p4336_p1, %p4335_p0 }
  0x48   :  { %p4338_p3 = pnand %p4337_p2, %p4331_p13 }
  0x4a   :  { %4341 = shalt.err (!%p4338_p3)
}
  0x4b   :  { %124 = dma.hbm_to_vmem [thread:$0]  %s5164_s7, 1024, %s119_s16, [#allocation15], %s4557_s28, %s4557_s28, %s4558_s29  }
  0x4c   :  { %s4342_s17 = scalar_lea.hbm %s5166_s9, 1024 }
  0x4d   :  { %p4343_p4 = scmp.ne.s32.totalorder %s5166_s9, %s4342_s17  ;;  %p4346_p5 = scmp.lt.u32.totalorder %s4342_s17, %s5166_s9 }
  0x4f   :  { %p4348_p6 = pnand %p4346_p5, %p4343_p4 }
  0x51   :  { %4351 = shalt.err (!%p4348_p6)
}
  0x52   :  { %s4352_s25 = scalar_lea.vmem %s143_s14, 1024  ;;  %p4357_p8 = scmp.lt.s32.totalorder %s143_s14, %s143_s14 }
  0x53   :  { %p4353_p7 = scmp.ne.s32.totalorder %s143_s14, %s4352_s25  ;;  %p4358_p9 = scmp.lt.s32.totalorder %s4352_s25, %s4352_s25 }
  0x55   :  { %p4359_p10 = por %p4358_p9, %p4357_p8 }
  0x57   :  { %p4360_p11 = pnand %p4359_p10, %p4353_p7 }
  0x59   :  { %4363 = shalt.err (!%p4360_p11)
}
  0x5a   :  { %148 = dma.hbm_to_vmem [thread:$0]  %s5166_s9, 1024, %s143_s14, [#allocation18], %s4557_s28, %s4557_s28, %s4558_s29  }
  0x5b   :  { %s4565_s26 = smov [#allocation2]   ;;  %s4364_s3 = scalar_lea.hbm %s5157_s0, 256 }
  0x5c   :  { %s34_s27 = sshll.u32 %s4565_s26, 4  ;;  %p4365_p12 = scmp.ne.s32.totalorder %s5157_s0, %s4364_s3  ;;  %s35_s27 = int_to_ptr.vmem [resolvable:$true] %s34_s27 }
  0x5d   :  { %p4368_p13 = scmp.lt.u32.totalorder %s4364_s3, %s5157_s0 }
  0x5f   :  { %p4370_p0 = pnand %p4368_p13, %p4365_p12 }
  0x61   :  { %4373 = shalt.err (!%p4370_p0)
}
  0x62   :  { %s4374_s22 = scalar_lea.vmem %s35_s27, 256  ;;  %p4379_p2 = scmp.lt.s32.totalorder %s35_s27, %s35_s27 }
  0x63   :  { %p4375_p1 = scmp.ne.s32.totalorder %s35_s27, %s4374_s22  ;;  %p4380_p3 = scmp.lt.s32.totalorder %s4374_s22, %s4374_s22 }
  0x65   :  { %p4381_p4 = por %p4380_p3, %p4379_p2 }
  0x67   :  { %p4382_p5 = pnand %p4381_p4, %p4375_p1 }
  0x69   :  { %4385 = shalt.err (!%p4382_p5)
}
  0x6a   :  { %s4566_s9 = smov 128   ;;  %s4567_s14 = smov 8  }
  0x6b   :  { %40 = dma.hbm_to_vmem [thread:$0]  %s5157_s0, 256, %s35_s27, [#allocation3], %s4566_s9, %s4566_s9, %s4567_s14  }
  0x6c   :  { %s4568_s25 = smov [#allocation7]   ;;  %s4569_s16 = smov [#allocation10]  }
  0x6d   :  { %s58_s7 = sshll.u32 %s4568_s25, 4  ;;  %s82_s26 = sshll.u32 %s4569_s16, 4  ;;  %s59_s7 = int_to_ptr.vmem [resolvable:$true] %s58_s7  ;;  %s4748_s26 = int_to_ptr.vmem [resolvable:$true] %s82_s26 }
  0x6e   :  { %s4386_s3 = scalar_lea.hbm %s5159_s2, 6144 }
  0x6f   :  { %p4387_p6 = scmp.ne.s32.totalorder %s5159_s2, %s4386_s3  ;;  %p4390_p7 = scmp.lt.u32.totalorder %s4386_s3, %s5159_s2 }
  0x71   :  { %p4392_p8 = pnand %p4390_p7, %p4387_p6 }
  0x73   :  { %4395 = shalt.err (!%p4392_p8)
}
  0x74   :  { %s4396_s0 = scalar_lea.vmem %s59_s7, 6144  ;;  %p4401_p10 = scmp.lt.s32.totalorder %s59_s7, %s59_s7 }
  0x75   :  { %p4397_p9 = scmp.ne.s32.totalorder %s59_s7, %s4396_s0  ;;  %p4402_p11 = scmp.lt.s32.totalorder %s4396_s0, %s4396_s0 }
  0x77   :  { %p4403_p12 = por %p4402_p11, %p4401_p10 }
  0x79   :  { %p4404_p13 = pnand %p4403_p12, %p4397_p9 }
  0x7b   :  { %4407 = shalt.err (!%p4404_p13)
}
  0x7c   :  { %64 = dma.hbm_to_vmem [thread:$0]  %s5159_s2, 6144, %s59_s7, [#allocation6], %s4561_s19, %s4561_s19, %s4562_s30  }
  0x7d   :  { %s4408_s25 = scalar_lea.hbm %s5161_s4, 2048 }
  0x7e   :  { %p4409_p0 = scmp.ne.s32.totalorder %s5161_s4, %s4408_s25  ;;  %p4412_p1 = scmp.lt.u32.totalorder %s4408_s25, %s5161_s4 }
  0x80   :  { %p4414_p2 = pnand %p4412_p1, %p4409_p0 }
  0x82   :  { %4417 = shalt.err (!%p4414_p2)
}
  0x83   :  { %s4418_s18 = scalar_lea.vmem %s4748_s26, 2048  ;;  %p4423_p4 = scmp.lt.s32.totalorder %s4748_s26, %s4748_s26 }
  0x84   :  { %p4419_p3 = scmp.ne.s32.totalorder %s4748_s26, %s4418_s18  ;;  %p4424_p5 = scmp.lt.s32.totalorder %s4418_s18, %s4418_s18 }
  0x86   :  { %p4425_p6 = por %p4424_p5, %p4423_p4 }
  0x88   :  { %p4426_p7 = pnand %p4425_p6, %p4419_p3 }
  0x8a   :  { %4429 = shalt.err (!%p4426_p7)
}
  0x8b   :  { %88 = dma.hbm_to_vmem [thread:$0]  %s5161_s4, 2048, %s4748_s26, [#allocation9], %s4557_s28, %s4557_s28, %s4558_s29  }
  0x8c   :  { %s4570_s30 = smov [#allocation13]   ;;  %s4571_s1 = smov [#allocation16]  }
  0x8d   :  { %s106_s7 = sshll.u32 %s4570_s30, 4  ;;  %s130_s17 = sshll.u32 %s4571_s1, 4  ;;  %s107_s7 = int_to_ptr.vmem [resolvable:$true] %s106_s7  ;;  %s4785_s17 = int_to_ptr.vmem [resolvable:$true] %s130_s17 }
  0x8e   :  { %s4430_s27 = scalar_lea.hbm %s5163_s6, 2048 }
  0x8f   :  { %p4431_p8 = scmp.ne.s32.totalorder %s5163_s6, %s4430_s27  ;;  %p4434_p9 = scmp.lt.u32.totalorder %s4430_s27, %s5163_s6 }
  0x91   :  { %p4436_p10 = pnand %p4434_p9, %p4431_p8 }
  0x93   :  { %4439 = shalt.err (!%p4436_p10)
}
  0x94   :  { %s4440_s4 = scalar_lea.vmem %s107_s7, 2048  ;;  %p4445_p12 = scmp.lt.s32.totalorder %s107_s7, %s107_s7 }
  0x95   :  { %p4441_p11 = scmp.ne.s32.totalorder %s107_s7, %s4440_s4  ;;  %p4446_p13 = scmp.lt.s32.totalorder %s4440_s4, %s4440_s4 }
  0x97   :  { %p4447_p0 = por %p4446_p13, %p4445_p12 }
  0x99   :  { %p4448_p1 = pnand %p4447_p0, %p4441_p11 }
  0x9b   :  { %4451 = shalt.err (!%p4448_p1)
}
  0x9c   :  { %112 = dma.hbm_to_vmem [thread:$0]  %s5163_s6, 2048, %s107_s7, [#allocation12], %s4557_s28, %s4557_s28, %s4558_s29  }
  0x9d   :  { %s4452_s3 = scalar_lea.hbm %s5165_s8, 1024 }
  0x9e   :  { %p4453_p2 = scmp.ne.s32.totalorder %s5165_s8, %s4452_s3  ;;  %p4456_p3 = scmp.lt.u32.totalorder %s4452_s3, %s5165_s8 }
  0xa0   :  { %p4458_p4 = pnand %p4456_p3, %p4453_p2 }
  0xa2   :  { %4461 = shalt.err (!%p4458_p4)
}
  0xa3   :  { %s4462_s1 = scalar_lea.vmem %s4785_s17, 1024  ;;  %p4467_p6 = scmp.lt.s32.totalorder %s4785_s17, %s4785_s17 }
  0xa4   :  { %p4463_p5 = scmp.ne.s32.totalorder %s4785_s17, %s4462_s1  ;;  %p4468_p7 = scmp.lt.s32.totalorder %s4462_s1, %s4462_s1 }
  0xa6   :  { %p4469_p8 = por %p4468_p7, %p4467_p6 }
  0xa8   :  { %p4470_p9 = pnand %p4469_p8, %p4463_p5 }
  0xaa   :  { %4473 = shalt.err (!%p4470_p9)
}
  0xab   :  { %136 = dma.hbm_to_vmem [thread:$0]  %s5165_s8, 1024, %s4785_s17, [#allocation15], %s4557_s28, %s4557_s28, %s4558_s29  }
  0xac   :  { %s4572_s20 = smov [#allocation19]   ;;  %s4474_s23 = scalar_lea.hbm %s5167_s10, 1024 }
  0xad   :  { %s154_s0 = sshll.u32 %s4572_s20, 4  ;;  %p4475_p10 = scmp.ne.s32.totalorder %s5167_s10, %s4474_s23  ;;  %s155_s0 = int_to_ptr.vmem [resolvable:$true] %s154_s0 }
  0xae   :  { %p4478_p11 = scmp.lt.u32.totalorder %s4474_s23, %s5167_s10 }
  0xb0   :  { %p4480_p12 = pnand %p4478_p11, %p4475_p10 }
  0xb2   :  { %4483 = shalt.err (!%p4480_p12)
}
  0xb3   :  { %s4484_s16 = scalar_lea.vmem %s155_s0, 1024  ;;  %p4489_p0 = scmp.lt.s32.totalorder %s155_s0, %s155_s0 }
  0xb4   :  { %p4485_p13 = scmp.ne.s32.totalorder %s155_s0, %s4484_s16  ;;  %p4490_p1 = scmp.lt.s32.totalorder %s4484_s16, %s4484_s16 }
  0xb6   :  { %p4491_p2 = por %p4490_p1, %p4489_p0 }
  0xb8   :  { %p4492_p3 = pnand %p4491_p2, %p4485_p13 }
  0xba   :  { %4495 = shalt.err (!%p4492_p3)
}
  0xbb   :  { %160 = dma.hbm_to_vmem [thread:$0]  %s5167_s10, 1024, %s155_s0, [#allocation18], %s4557_s28, %s4557_s28, %s4558_s29  }
  0xbc   :  { %4540 = dma.done.wait [#allocation3], 256  }
  0xbd   :  { %4541 = vsyncadd [#allocation3], 4294967040 }
  0xbe   :  { %4542 = dma.done.wait [#allocation6], 6272  }
  0xbf   :  { %4543 = vsyncadd [#allocation6], 4294961024 }
  0xc0   :  { %4544 = dma.done.wait [#allocation9], 8192  }
  0xc1   :  { %4545 = vsyncadd [#allocation9], 4294959104 }
  0xc2   :  { %4546 = dma.done.wait [#allocation12], 8192  }
  0xc3   :  { %4547 = vsyncadd [#allocation12], 4294959104 }
  0xc4   :  { %4548 = dma.done.wait [#allocation15], 2048  }
  0xc5   :  { %4549 = vsyncadd [#allocation15], 4294965248 }
  0xc6   :  { %4550 = dma.done.wait [#allocation18], 2048  }
  0xc7   :  { %4551 = vsyncadd [#allocation18], 4294965248  ;;  %v4573_v0 = vmov 0   ;;  %v3923_v1 = vld [vmem:[#allocation8 + $0x4] ss:$24 sps:$4 sm:$0xff]   ;;  %vm4575_vm0 = vmmov 0  }
  0xc8   :  { %587 = vmatprep.mubr.bf16.mxu0 %v4573_v0  ;;  %630 = vmatprep.mubr.bf16.mxu1 %v4573_v0  ;;  %v3925_v2 = vld [vmem:[#allocation8 + $0xc] ss:$24 sps:$4 sm:$0xff]   ;;  %v3927_v3 = vld [vmem:[#allocation8] ss:$24 sps:$4 sm:$0xff]   ;;  %v3931_v6 = vld [vmem:[#allocation8 + $0x3c] ss:$24 sps:$4 sm:$0xff]  }
  0xc9   :  { %555 = vmatprep.subr.bf16.mxu0 %v3923_v1  ;;  %v3928_v4 = vld [vmem:[#allocation8 + $0x8] ss:$24 sps:$4 sm:$0xff]   ;;  %598 = vmatprep.subr.bf16.mxu1 %v3925_v2  ;;  %v3929_v5 = vld [vmem:[#allocation8 + $0x34] ss:$24 sps:$4 sm:$0xff]   ;;  %v3934_v8 = vld [vmem:[#allocation8 + $0x38] ss:$24 sps:$4 sm:$0xff]  }
  0xca   :  { %556 = vmatpush1.bf16.msra.mxu0 %v3927_v3  ;;  %599 = vmatpush1.bf16.msra.mxu1 %v3928_v4  ;;  %v3933_v7 = vld [vmem:[#allocation8 + $0x30] ss:$24 sps:$4 sm:$0xff]   ;;  %v3935_v9 = vld [vmem:[#allocation8 + $0x64] ss:$24 sps:$4 sm:$0xff]   ;;  %v3939_v11 = vld [vmem:[#allocation8 + $0x60] ss:$24 sps:$4 sm:$0xff]  }
  0xcb   :  { %557 = vmatprep.subr.bf16.mxu0 %v3929_v5  ;;  %600 = vmatprep.subr.bf16.mxu1 %v3931_v6  ;;  %v3937_v10 = vld [vmem:[#allocation8 + $0x6c] ss:$24 sps:$4 sm:$0xff]   ;;  %v3940_v12 = vld [vmem:[#allocation8 + $0x68] ss:$24 sps:$4 sm:$0xff]   ;;  %v3943_v14 = vld [vmem:[#allocation8 + $0x9c] ss:$24 sps:$4 sm:$0xff]  }
  0xcc   :  { %v3941_v13 = vld [vmem:[#allocation8 + $0x94] ss:$24 sps:$4 sm:$0xff]   ;;  %v3945_v15 = vld [vmem:[#allocation8 + $0x90] ss:$24 sps:$4 sm:$0xff]   ;;  %v3947_v17 = vld [vmem:[#allocation8 + $0xc4] ss:$24 sps:$4 sm:$0xff]  }
  0xcd   :  { %v3946_v16 = vld [vmem:[#allocation8 + $0x98] ss:$24 sps:$4 sm:$0xff]   ;;  %v3949_v18 = vld [vmem:[#allocation8 + $0xcc] ss:$24 sps:$4 sm:$0xff]   ;;  %v3952_v20 = vld [vmem:[#allocation8 + $0xc8] ss:$24 sps:$4 sm:$0xff]  }
  0xce   :  { %558 = vmatpush1.bf16.msra.mxu0 %v3933_v7  ;;  %601 = vmatpush1.bf16.msra.mxu1 %v3934_v8  ;;  %v3951_v19 = vld [vmem:[#allocation8 + $0xc0] ss:$24 sps:$4 sm:$0xff]   ;;  %v3953_v21 = vld [vmem:[#allocation8 + $0xf4] ss:$24 sps:$4 sm:$0xff]   ;;  %v3957_v23 = vld [vmem:[#allocation8 + $0xf0] ss:$24 sps:$4 sm:$0xff]  }
  0xcf   :  { %559 = vmatprep.subr.bf16.mxu0 %v3935_v9  ;;  %602 = vmatprep.subr.bf16.mxu1 %v3937_v10  ;;  %v3955_v22 = vld [vmem:[#allocation8 + $0xfc] ss:$24 sps:$4 sm:$0xff]   ;;  %v3958_v24 = vld [vmem:[#allocation8 + $0xf8] ss:$24 sps:$4 sm:$0xff]   ;;  %v3961_v26 = vld [vmem:[#allocation8 + $0x12c] ss:$24 sps:$4 sm:$0xff]  }
  0xd0   :  { %v3959_v25 = vld [vmem:[#allocation8 + $0x124] ss:$24 sps:$4 sm:$0xff]   ;;  %v3963_v27 = vld [vmem:[#allocation8 + $0x120] ss:$24 sps:$4 sm:$0xff]   ;;  %v3965_v29 = vld [vmem:[#allocation8 + $0x154] ss:$24 sps:$4 sm:$0xff]  }
  0xd1   :  { %v3964_v28 = vld [vmem:[#allocation8 + $0x128] ss:$24 sps:$4 sm:$0xff]   ;;  %v3967_v30 = vld [vmem:[#allocation8 + $0x15c] ss:$24 sps:$4 sm:$0xff]   ;;  %v3970_v32 = vld [vmem:[#allocation8 + $0x158] ss:$24 sps:$4 sm:$0xff]  }
  0xd2   :  { %560 = vmatpush1.bf16.msra.mxu0 %v3939_v11  ;;  %603 = vmatpush1.bf16.msra.mxu1 %v3940_v12  ;;  %v3969_v31 = vld [vmem:[#allocation8 + $0x150] ss:$24 sps:$4 sm:$0xff]   ;;  %v3973_v33 = vld [vmem:[#allocation8 + $0x14] ss:$24 sps:$4 sm:$0xff]   ;;  %v4839_v36 = vld [vmem:[#allocation5] sm:$0xff]   ;;  %vm1173_vm1 = vcmask 1043456  }
  0xd3   :  { %561 = vmatprep.subr.bf16.mxu0 %v3941_v13  ;;  %604 = vmatprep.subr.bf16.mxu1 %v3943_v14  ;;  %v3976_v34 = vld [vmem:[#allocation7 + $0xc] ss:$24 sps:$4 sm:$0xff]   ;;  %v3971_v35 = vld [vmem:[#allocation8 + $0x10] ss:$24 sps:$4 sm:$0xff]   ;;  %v3983_v39 = vld [vmem:[#allocation7 + $0x3c] ss:$24 sps:$4 sm:$0xff]  }
  0xd4   :  { %v3974_v37 = vld [vmem:[#allocation7 + $0x8] ss:$24 sps:$4 sm:$0xff]   ;;  %v3980_v38 = vld [vmem:[#allocation8 + $0x44] ss:$24 sps:$4 sm:$0xff]   ;;  %v3981_v41 = vld [vmem:[#allocation7 + $0x38] ss:$24 sps:$4 sm:$0xff]  }
  0xd5   :  { %v3978_v40 = vld [vmem:[#allocation8 + $0x40] ss:$24 sps:$4 sm:$0xff]   ;;  %v3986_v42 = vld [vmem:[#allocation8 + $0x74] ss:$24 sps:$4 sm:$0xff]   ;;  %v3984_v44 = vld [vmem:[#allocation8 + $0x70] ss:$24 sps:$4 sm:$0xff]  }
  0xd6   :  { %562 = vmatpush1.bf16.msra.mxu0 %v3945_v15  ;;  %605 = vmatpush1.bf16.msra.mxu1 %v3946_v16  ;;  %v3989_v43 = vld [vmem:[#allocation7 + $0x6c] ss:$24 sps:$4 sm:$0xff]   ;;  %v3987_v45 = vld [vmem:[#allocation7 + $0x68] ss:$24 sps:$4 sm:$0xff]   ;;  %v3995_v47 = vld [vmem:[#allocation7 + $0x9c] ss:$24 sps:$4 sm:$0xff]  }
  0xd7   :  { %563 = vmatprep.subr.bf16.mxu0 %v3947_v17  ;;  %606 = vmatprep.subr.bf16.mxu1 %v3949_v18  ;;  %v3992_v46 = vld [vmem:[#allocation8 + $0xa4] ss:$24 sps:$4 sm:$0xff]   ;;  %v3990_v48 = vld [vmem:[#allocation8 + $0xa0] ss:$24 sps:$4 sm:$0xff]   ;;  %v3998_v50 = vld [vmem:[#allocation8 + $0xd4] ss:$24 sps:$4 sm:$0xff]  }
  0xd8   :  { %v3993_v49 = vld [vmem:[#allocation7 + $0x98] ss:$24 sps:$4 sm:$0xff]   ;;  %v4001_v51 = vld [vmem:[#allocation7 + $0xcc] ss:$24 sps:$4 sm:$0xff]   ;;  %v3999_v53 = vld [vmem:[#allocation7 + $0xc8] ss:$24 sps:$4 sm:$0xff]  }
  0xd9   :  { %v3996_v52 = vld [vmem:[#allocation8 + $0xd0] ss:$24 sps:$4 sm:$0xff]   ;;  %v4004_v54 = vld [vmem:[#allocation8 + $0x104] ss:$24 sps:$4 sm:$0xff]   ;;  %v4002_v56 = vld [vmem:[#allocation8 + $0x100] ss:$24 sps:$4 sm:$0xff]  }
  0xda   :  { %564 = vmatpush1.bf16.msra.mxu0 %v3951_v19  ;;  %607 = vmatpush1.bf16.msra.mxu1 %v3952_v20  ;;  %v4007_v55 = vld [vmem:[#allocation7 + $0xfc] ss:$24 sps:$4 sm:$0xff]   ;;  %v4005_v57 = vld [vmem:[#allocation7 + $0xf8] ss:$24 sps:$4 sm:$0xff]   ;;  %v4013_v59 = vld [vmem:[#allocation7 + $0x12c] ss:$24 sps:$4 sm:$0xff]  }
  0xdb   :  { %565 = vmatprep.subr.bf16.mxu0 %v3953_v21  ;;  %608 = vmatprep.subr.bf16.mxu1 %v3955_v22  ;;  %v4010_v58 = vld [vmem:[#allocation8 + $0x134] ss:$24 sps:$4 sm:$0xff]   ;;  %v4008_v60 = vld [vmem:[#allocation8 + $0x130] ss:$24 sps:$4 sm:$0xff]   ;;  %v4016_v62 = vld [vmem:[#allocation8 + $0x164] ss:$24 sps:$4 sm:$0xff]  }
  0xdc   :  { %v4011_v61 = vld [vmem:[#allocation7 + $0x128] ss:$24 sps:$4 sm:$0xff]   ;;  %v4019_v63 = vld [vmem:[#allocation7 + $0x15c] ss:$24 sps:$4 sm:$0xff]   ;;  %v4017_v2 = vld [vmem:[#allocation7 + $0x158] ss:$24 sps:$4 sm:$0xff]  }
  0xdd   :  { %v4014_v1 = vld [vmem:[#allocation8 + $0x160] ss:$24 sps:$4 sm:$0xff]   ;;  %v201_v3 = vld [vmem:[#allocation2] sm:$0xff]  ;;  %v202_v4 = vld [vmem:[#allocation2 + $0x8] sm:$0xff]  ;;  %vm1145_vm2 = vcmask 64512  }
  0xde   :  { %566 = vmatpush1.bf16.msra.mxu0 %v3957_v23  ;;  %609 = vmatpush1.bf16.msra.mxu1 %v3958_v24  ;;  %v4022_v5 = vld [vmem:[#allocation7 + $0x4] ss:$24 sps:$4 sm:$0xff]   ;;  %v4845_v6 = vpack.c.bf16 %v202_v4, %v201_v3  ;;  %v4020_v7 = vld [vmem:[#allocation7] ss:$24 sps:$4 sm:$0xff]   ;;  %v4025_v8 = vld [vmem:[#allocation7 + $0x34] ss:$24 sps:$4 sm:$0xff]  }
  0xdf   :  { %567 = vmatprep.subr.bf16.mxu0 %v3959_v25  ;;  %610 = vmatprep.subr.bf16.mxu1 %v3961_v26  ;;  %v4023_v9 = vld [vmem:[#allocation7 + $0x30] ss:$24 sps:$4 sm:$0xff]   ;;  %v4028_v10 = vld [vmem:[#allocation7 + $0x64] ss:$24 sps:$4 sm:$0xff]   ;;  %v4026_v11 = vld [vmem:[#allocation7 + $0x60] ss:$24 sps:$4 sm:$0xff]  }
  0xe0   :  { %v4031_v12 = vld [vmem:[#allocation7 + $0x94] ss:$24 sps:$4 sm:$0xff]   ;;  %v4029_v13 = vld [vmem:[#allocation7 + $0x90] ss:$24 sps:$4 sm:$0xff]   ;;  %v4034_v14 = vld [vmem:[#allocation7 + $0xc4] ss:$24 sps:$4 sm:$0xff]  }
  0xe1   :  { %v4032_v15 = vld [vmem:[#allocation7 + $0xc0] ss:$24 sps:$4 sm:$0xff]   ;;  %v4037_v16 = vld [vmem:[#allocation7 + $0xf4] ss:$24 sps:$4 sm:$0xff]   ;;  %v4035_v17 = vld [vmem:[#allocation7 + $0xf0] ss:$24 sps:$4 sm:$0xff]  }
  0xe2   :  { %568 = vmatpush1.bf16.msra.mxu0 %v3963_v27  ;;  %611 = vmatpush1.bf16.msra.mxu1 %v3964_v28  ;;  %v4040_v18 = vld [vmem:[#allocation7 + $0x124] ss:$24 sps:$4 sm:$0xff]   ;;  %v4038_v19 = vld [vmem:[#allocation7 + $0x120] ss:$24 sps:$4 sm:$0xff]   ;;  %v4043_v20 = vld [vmem:[#allocation7 + $0x154] ss:$24 sps:$4 sm:$0xff]  }
  0xe3   :  { %569 = vmatprep.subr.bf16.mxu0 %v3965_v29  ;;  %612 = vmatprep.subr.bf16.mxu1 %v3967_v30  ;;  %v4041_v21 = vld [vmem:[#allocation7 + $0x150] ss:$24 sps:$4 sm:$0xff]   ;;  %v4046_v22 = vld [vmem:[#allocation7 + $0x14] ss:$24 sps:$4 sm:$0xff]   ;;  %v4049_v24 = vld [vmem:[#allocation7 + $0x44] ss:$24 sps:$4 sm:$0xff]  }
  0xe4   :  { %v4044_v23 = vld [vmem:[#allocation7 + $0x10] ss:$24 sps:$4 sm:$0xff]   ;;  %v4047_v25 = vld [vmem:[#allocation7 + $0x40] ss:$24 sps:$4 sm:$0xff]   ;;  %v4052_v26 = vld [vmem:[#allocation7 + $0x74] ss:$24 sps:$4 sm:$0xff]  }
  0xe5   :  { %v4050_v27 = vld [vmem:[#allocation7 + $0x70] ss:$24 sps:$4 sm:$0xff]   ;;  %v4055_v28 = vld [vmem:[#allocation7 + $0xa4] ss:$24 sps:$4 sm:$0xff]   ;;  %v4053_v29 = vld [vmem:[#allocation7 + $0xa0] ss:$24 sps:$4 sm:$0xff]  }
  0xe6   :  { %570 = vmatpush1.bf16.msra.mxu0 %v3969_v31  ;;  %613 = vmatpush1.bf16.msra.mxu1 %v3970_v32  ;;  %v4058_v30 = vld [vmem:[#allocation7 + $0xd4] ss:$24 sps:$4 sm:$0xff]   ;;  %v4056_v31 = vld [vmem:[#allocation7 + $0xd0] ss:$24 sps:$4 sm:$0xff]   ;;  %v4061_v32 = vld [vmem:[#allocation7 + $0x104] ss:$24 sps:$4 sm:$0xff]  }
  0xe7   :  { %641 = vmatprep.subr.bf16.mxu0 %v3973_v33  ;;  %967 = vmatprep.subr.bf16.mxu1 %v3976_v34  ;;  %v4059_v33 = vld [vmem:[#allocation7 + $0x100] ss:$24 sps:$4 sm:$0xff]   ;;  %v4064_v34 = vld [vmem:[#allocation7 + $0x134] ss:$24 sps:$4 sm:$0xff]  }
  0xe9   :  { %588 = vmatmul.mubr.bf16.vlgmr.msra.gmra.mrb[0].mxu0 %v4839_v36  ;;  %631 = vmatmul.mubr.bf16.vlgmr.msra.gmra.mrb[0].mxu1 %v4839_v36 }
  0xea   :  { %642 = vmatpush1.bf16.msra.mxu0 %v3971_v35  ;;  %968 = vmatpush1.bf16.msra.mxu1 %v3974_v37  ;;  %v4062_v35 = vld [vmem:[#allocation7 + $0x130] ss:$24 sps:$4 sm:$0xff]   ;;  %v4065_v37 = vld [vmem:[#allocation7 + $0x160] ss:$24 sps:$4 sm:$0xff]  }
  0xeb   :  { %643 = vmatprep.subr.bf16.mxu0 %v3980_v38  ;;  %969 = vmatprep.subr.bf16.mxu1 %v3983_v39  ;;  %v4574_v38 = vmov 0.0  }
  0xec   :  { %999 = vmatprep.mubr.bf16.mxu1 %v4573_v0  ;;  %673 = vmatprep.mubr.bf16.mxu0 %v4573_v0 }
  0xee   :  { %644 = vmatpush1.bf16.msra.mxu0 %v3978_v40  ;;  %970 = vmatpush1.bf16.msra.mxu1 %v3981_v41 }
  0xef   :  { %645 = vmatprep.subr.bf16.mxu0 %v3986_v42  ;;  %971 = vmatprep.subr.bf16.mxu1 %v3989_v43 }
  0xf2   :  { %646 = vmatpush1.bf16.msra.mxu0 %v3984_v44  ;;  %972 = vmatpush1.bf16.msra.mxu1 %v3987_v45 }
  0xf3   :  { %647 = vmatprep.subr.bf16.mxu0 %v3992_v46  ;;  %973 = vmatprep.subr.bf16.mxu1 %v3995_v47 }
  0xf6   :  { %648 = vmatpush1.bf16.msra.mxu0 %v3990_v48  ;;  %974 = vmatpush1.bf16.msra.mxu1 %v3993_v49 }
  0xf7   :  { %649 = vmatprep.subr.bf16.mxu0 %v3998_v50  ;;  %975 = vmatprep.subr.bf16.mxu1 %v4001_v51 }
  0xfa   :  { %650 = vmatpush1.bf16.msra.mxu0 %v3996_v52  ;;  %976 = vmatpush1.bf16.msra.mxu1 %v3999_v53 }
  0xfb   :  { %651 = vmatprep.subr.bf16.mxu0 %v4004_v54  ;;  %977 = vmatprep.subr.bf16.mxu1 %v4007_v55 }
  0xfe   :  { %652 = vmatpush1.bf16.msra.mxu0 %v4002_v56  ;;  %978 = vmatpush1.bf16.msra.mxu1 %v4005_v57 }
  0xff   :  { %653 = vmatprep.subr.bf16.mxu0 %v4010_v58  ;;  %979 = vmatprep.subr.bf16.mxu1 %v4013_v59 }
 0x102   :  { %654 = vmatpush1.bf16.msra.mxu0 %v4008_v60  ;;  %980 = vmatpush1.bf16.msra.mxu1 %v4011_v61 }
 0x103   :  { %655 = vmatprep.subr.bf16.mxu0 %v4016_v62  ;;  %981 = vmatprep.subr.bf16.mxu1 %v4019_v63 }
 0x106   :  { %656 = vmatpush1.bf16.msra.mxu0 %v4014_v1  ;;  %982 = vmatpush1.bf16.msra.mxu1 %v4017_v2 }
 0x107   :  { %924 = vmatprep.subr.bf16.mxu0 %v4022_v5  ;;  %3629 = vmatprep.subr.bf16.mxu1 %v4574_v38 }
 0x109   :  { %1000 = vmatmul.mubr.bf16.vlgmr.msra.gmra.mrb[0].mxu1 %v4845_v6  ;;  %674 = vmatmul.mubr.bf16.vlgmr.msra.gmra.mrb[4].mxu0 %v4839_v36  ;;  %v4067_v36 = vld [vmem:[#allocation7 + $0x164] ss:$24 sps:$4 sm:$0xff]  }
 0x10a   :  { %925 = vmatpush1.bf16.msra.mxu0 %v4020_v7  ;;  %956 = vmatprep.mubr.bf16.mxu0 %v4573_v0 }
 0x10b   :  { %926 = vmatprep.subr.bf16.mxu0 %v4025_v8  ;;  %3631 = vmatprep.mubr.msk.bf16.mxu1 %vm4575_vm0, %v4574_v38 }
 0x10e   :  { %927 = vmatpush1.bf16.msra.mxu0 %v4023_v9 }
 0x10f   :  { %928 = vmatprep.subr.bf16.mxu0 %v4028_v10 }
 0x112   :  { %929 = vmatpush1.bf16.msra.mxu0 %v4026_v11 }
 0x113   :  { %930 = vmatprep.subr.bf16.mxu0 %v4031_v12 }
 0x116   :  { %931 = vmatpush1.bf16.msra.mxu0 %v4029_v13 }
 0x117   :  { %932 = vmatprep.subr.bf16.mxu0 %v4034_v14 }
 0x11a   :  { %933 = vmatpush1.bf16.msra.mxu0 %v4032_v15 }
 0x11b   :  { %934 = vmatprep.subr.bf16.mxu0 %v4037_v16 }
 0x11e   :  { %935 = vmatpush1.bf16.msra.mxu0 %v4035_v17 }
 0x11f   :  { %936 = vmatprep.subr.bf16.mxu0 %v4040_v18 }
 0x122   :  { %937 = vmatpush1.bf16.msra.mxu0 %v4038_v19 }
 0x123   :  { %938 = vmatprep.subr.bf16.mxu0 %v4043_v20 }
 0x126   :  { %939 = vmatpush1.bf16.msra.mxu0 %v4041_v21 }
 0x127   :  { %1010 = vmatprep.subr.bf16.mxu0 %v4046_v22 }
 0x129   :  { %957 = vmatmul.mubr.bf16.vlgmr.msra.gmra.mrb[0].mxu0 %v4845_v6 }
 0x12a   :  { %1011 = vmatpush1.bf16.msra.mxu0 %v4044_v23  ;;  %1042 = vmatprep.mubr.bf16.mxu0 %v4573_v0 }
 0x12b   :  { %1012 = vmatprep.subr.bf16.mxu0 %v4049_v24 }
 0x12e   :  { %1013 = vmatpush1.bf16.msra.mxu0 %v4047_v25 }
 0x12f   :  { %1014 = vmatprep.subr.bf16.mxu0 %v4052_v26 }
 0x132   :  { %1015 = vmatpush1.bf16.msra.mxu0 %v4050_v27 }
 0x133   :  { %1016 = vmatprep.subr.bf16.mxu0 %v4055_v28 }
 0x136   :  { %1017 = vmatpush1.bf16.msra.mxu0 %v4053_v29 }
 0x137   :  { %1018 = vmatprep.subr.bf16.mxu0 %v4058_v30 }
 0x13a   :  { %1019 = vmatpush1.bf16.msra.mxu0 %v4056_v31 }
 0x13b   :  { %1020 = vmatprep.subr.bf16.mxu0 %v4061_v32 }
 0x13e   :  { %1021 = vmatpush1.bf16.msra.mxu0 %v4059_v33 }
 0x13f   :  { %1022 = vmatprep.subr.bf16.mxu0 %v4064_v34 }
 0x142   :  { %1023 = vmatpush1.bf16.msra.mxu0 %v4062_v35 }
 0x143   :  { %1024 = vmatprep.subr.bf16.mxu0 %v4067_v36 }
 0x146   :  { %1025 = vmatpush1.bf16.msra.mxu0 %v4065_v37 }
 0x147   :  { %3677 = vmatprep.subr.bf16.mxu0 %v4574_v38 }
 0x149   :  { %1043 = vmatmul.mubr.bf16.vlgmr.msra.gmra.mrb[4].mxu0 %v4845_v6 }
 0x14a   :  { %3693 = vmatprep.mubr.msk.bf16.mxu0 %vm4575_vm0, %v4574_v38 }
 0x1dc   :  { %v1001_v39 = vpop.f32.mrb[0].mxu1 }
 0x1dd   :  { %v1055_v40 = vpack.c.bf16 %v1001_v39, %v1001_v39  ;;  %v4859_v41 = vpop.f32.mrb[1].mxu1 }
 0x1de   :  { %v1005_v42 = vpop.f32.mrb[2].mxu1  ;;  %v1056_v24 = vpack.c.bf16 %v4859_v41, %v4859_v41 }
 0x1df   :  { %v4861_v43 = vpop.f32.mrb[3].mxu1  ;;  %3630 = vmatpush3.bf16.xpose.msra.mxu1 %v1055_v40  ;;  %v1061_v47 = vpack.c.bf16 %v1005_v42, %v1005_v42 }
 0x1e0   :  { %3635 = vmatprep.subr.bf16.mxu1 %v4574_v38  ;;  %v1062_v26 = vpack.c.bf16 %v4861_v43, %v4861_v43 }
 0x1fc   :  { %v958_v44 = vpop.f32.mrb[0].mxu0 }
 0x1fd   :  { %v1053_v45 = vpack.c.bf16 %v958_v44, %v958_v44  ;;  %v4864_v46 = vpop.f32.mrb[1].mxu0 }
 0x1fe   :  { %v962_v48 = vpop.f32.mrb[2].mxu0  ;;  %v1054_v25 = vpack.c.bf16 %v4864_v46, %v4864_v46 }
 0x1ff   :  { %v4866_v49 = vpop.f32.mrb[3].mxu0  ;;  %3632 = vmatmul.mubr.bf16.vlgmr.msra.gmra.mrb[4].mxu1 %v1053_v45  ;;  %v1059_v50 = vpack.c.bf16 %v962_v48, %v962_v48 }
 0x200   :  { %3636 = vmatpush3.bf16.xpose.msra.mxu1 %v1061_v47  ;;  %3637 = vmatprep.mubr.msk.bf16.mxu1 %vm4575_vm0, %v4574_v38  ;;  %v1060_v28 = vpack.c.bf16 %v4866_v49, %v4866_v49 }
 0x201   :  { %3641 = vmatprep.subr.bf16.mxu1 %v4574_v38 }
 0x207   :  { %3638 = vmatmul.mubr.bf16.vlgmr.msra.gmra.mrb[8].mxu1 %v1059_v50 }
 0x208   :  { %3643 = vmatprep.mubr.msk.bf16.mxu1 %vm4575_vm0, %v4574_v38 }
 0x21c   :  { %v1044_v51 = vpop.f32.mrb[4].mxu0 }
 0x21d   :  { %v1057_v52 = vpack.c.bf16 %v1044_v51, %v1044_v51  ;;  %v4873_v53 = vpop.f32.mrb[5].mxu0 }
 0x21e   :  { %v1048_v54 = vpop.f32.mrb[6].mxu0  ;;  %v1058_v27 = vpack.c.bf16 %v4873_v53, %v4873_v53 }
 0x21f   :  { %v1175_v55 = vsel %vm1173_vm1, %v1057_v52, 0  ;;  %v4876_v56 = vpop.f32.mrb[7].mxu0  ;;  %v1063_v17 = vpack.c.bf16 %v1048_v54, %v1048_v54 }
 0x220   :  { %3642 = vmatpush3.bf16.msra.mxu1 %v1175_v55  ;;  %v1388_v29 = vsel %vm1173_vm1, %v1058_v27, 0  ;;  %v4122_v27 = vld [vmem:[#allocation11 + $0x124] ss:$24 sps:$4 sm:$0xff]  }
 0x221   :  { %3647 = vmatprep.subr.bf16.mxu1 %v4574_v38  ;;  %v1221_v20 = vsel %vm1173_vm1, %v1063_v17, 0  ;;  %v4092_v17 = vld [vmem:[#allocation11 + $0x34] ss:$24 sps:$4 sm:$0xff]  }
 0x2d2   :  { %v1099_v57 = vpop.f32.mrb[4].mxu1 }
 0x2d3   :  { %v3633_v58 = vpop.f32.mrb[5].mxu1  ;;  %v1146_v59 = vsel %vm1145_vm2, %v1099_v57, -inf }
 0x2d4   :  { %1147 = vmax.xlane.f32.xlu0 %v1146_v59  ;;  %v1102_v60 = vpop.f32.mrb[6].mxu1 }
 0x2d5   :  { %v3634_v61 = vpop.f32.mrb[7].mxu1 }
 0x2d6   :  { %v4068_v61 = vld [vmem:[#allocation10 + $0x40] sm:$0xff]  }
 0x2d7   :  { %3678 = vmatpush3.bf16.msra.mxu0 %v4068_v61  ;;  %v4119_v61 = vld [vmem:[#allocation11 + $0x104] ss:$24 sps:$4 sm:$0xff]  }
 0x2d8   :  { %3679 = vmatprep.subr.bf16.mxu0 %v4574_v38 }
 0x2da   :  { %v1139_v62 = vpop.f32.mrb[8].mxu1 }
 0x2db   :  { %v3639_v63 = vpop.f32.mrb[9].mxu1  ;;  %v1149_v1 = vsel %vm1145_vm2, %v1139_v62, -inf }
 0x2dc   :  { %1150 = vmax.xlane.f32.xlu0 %v1149_v1  ;;  %v1142_v2 = vpop.f32.mrb[10].mxu1  ;;  %v4070_v63 = vld [vmem:[#allocation10 + $0x50] sm:$0xff]   ;;  %v4071_v1 = vld [vmem:[#allocation10 + $0x58] sm:$0xff]  }
 0x2dd   :  { %v3640_v3 = vpop.f32.mrb[11].mxu1  ;;  %v4072_v2 = vld [vmem:[#allocation10 + $0x60] sm:$0xff]  }
 0x2de   :  { %v4073_v3 = vld [vmem:[#allocation10 + $0x68] sm:$0xff]  }
 0x361   :  { %v1148_v4 = vpop.xlane.xlu0 %1147 }
 0x362   :  { %v1152_v5 = vsub.f32 %v1099_v57, %v1148_v4 }
 0x364   :  { %v1154_v6 = vmul.f32 1.442695, %v1152_v5 }
 0x366   :  { %4204 = vpow2.f32 %v1154_v6 }
 0x369   :  { %v1151_v7 = vpop.xlane.xlu0 %1150 }
 0x36a   :  { %v1153_v8 = vsub.f32 %v1139_v62, %v1151_v7  ;;  %v4069_v62 = vld [vmem:[#allocation10 + $0x48] sm:$0xff]   ;;  %v1064_v7 = vpack.c.bf16 %v4876_v56, %v4876_v56  ;;  %v4075_v56 = vld [vmem:[#allocation10 + $0x78] sm:$0xff]  }
 0x36b   :  { %3680 = vmatpush3.bf16.msra.mxu0 %v4069_v62  ;;  %v4128_v62 = vld [vmem:[#allocation11 + $0x154] ss:$24 sps:$4 sm:$0xff]  }
 0x36c   :  { %v1156_v9 = vmul.f32 1.442695, %v1153_v8  ;;  %3681 = vmatprep.subr.bf16.mxu0 %v4574_v38 }
 0x36e   :  { %4206 = vpow2.f32 %v1156_v9 }
 0x36f   :  { %3682 = vmatpush3.bf16.msra.mxu0 %v4070_v63  ;;  %v4126_v63 = vld [vmem:[#allocation11 + $0x150] ss:$24 sps:$4 sm:$0xff]  }
 0x370   :  { %v4205_v10 = vpop.eup %4204  ;;  %3683 = vmatprep.subr.bf16.mxu0 %v4574_v38 }
 0x371   :  { %v1158_v11 = vsel %vm1145_vm2, %v4205_v10, 0.0 }
 0x372   :  { %1159 = vadd.xlane.f32.xlu1 %v1158_v11 }
 0x373   :  { %3684 = vmatpush3.bf16.msra.mxu0 %v4071_v1  ;;  %v4131_v1 = vld [vmem:[#allocation11 + $0x164] ss:$24 sps:$4 sm:$0xff]  }
 0x374   :  { %3685 = vmatprep.subr.bf16.mxu0 %v4574_v38 }
 0x377   :  { %3686 = vmatpush3.bf16.msra.mxu0 %v4072_v2  ;;  %v4129_v2 = vld [vmem:[#allocation11 + $0x160] ss:$24 sps:$4 sm:$0xff]  }
 0x378   :  { %v4207_v12 = vpop.eup %4206  ;;  %3687 = vmatprep.subr.bf16.mxu0 %v4574_v38 }
 0x379   :  { %v1161_v13 = vsel %vm1145_vm2, %v4207_v12, 0.0 }
 0x37a   :  { %1162 = vadd.xlane.f32.xlu1 %v1161_v13 }
 0x37b   :  { %3688 = vmatpush3.bf16.msra.mxu0 %v4073_v3  ;;  %v4134_v3 = vld [vmem:[#allocation11 + $0xc] ss:$24 sps:$4 sm:$0xff]  }
 0x37c   :  { %3689 = vmatprep.subr.bf16.mxu0 %v4574_v38 }
 0x3ff   :  { %v1160_v14 = vpop.xlane.xlu1 %1159 }
 0x400   :  { %4208 = vrcp.f32 %v1160_v14  ;;  %v4074_v14 = vld [vmem:[#allocation10 + $0x70] sm:$0xff]  }
 0x401   :  { %3690 = vmatpush3.bf16.msra.mxu0 %v4074_v14  ;;  %v4143_v14 = vld [vmem:[#allocation11 + $0x9c] ss:$24 sps:$4 sm:$0xff]  }
 0x402   :  { %3691 = vmatprep.subr.bf16.mxu0 %v4574_v38 }
 0x405   :  { %3692 = vmatpush3.bf16.msra.mxu0 %v4075_v56  ;;  %v4141_v56 = vld [vmem:[#allocation11 + $0x98] ss:$24 sps:$4 sm:$0xff]  }
 0x406   :  { %3697 = vmatprep.subr.bf16.mxu0 %v4574_v38 }
 0x407   :  { %v1163_v15 = vpop.xlane.xlu1 %1162 }
 0x408   :  { %4210 = vrcp.f32 %v1163_v15  ;;  %v4084_v15 = vld [vmem:[#allocation11] ss:$24 sps:$4 sm:$0xff]  }
 0x40a   :  { %v4209_v16 = vpop.eup %4208 }
 0x40b   :  { %v1166_v18 = vmul.f32 %v4209_v16, %v4205_v10  ;;  %v1434_v10 = vsel %vm1173_vm1, %v1064_v7, 0  ;;  %v4086_v16 = vld [vmem:[#allocation11 + $0x4] ss:$24 sps:$4 sm:$0xff]   ;;  %v4132_v7 = vld [vmem:[#allocation11 + $0x8] ss:$24 sps:$4 sm:$0xff]  }
 0x40d   :  { %v1168_v19 = vpack.c.bf16 %v1166_v18, %v1166_v18  ;;  %v4090_v18 = vld [vmem:[#allocation11 + $0x30] ss:$24 sps:$4 sm:$0xff]  }
 0x40f   :  { %3644 = vmatmul.mubr.msk.bf16.vlgmr.msra.gmra.mrb[12].mxu1 %vm1145_vm2, %v1168_v19  ;;  %v4098_v19 = vld [vmem:[#allocation11 + $0x64] ss:$24 sps:$4 sm:$0xff]  }
 0x410   :  { %3648 = vmatpush3.bf16.msra.mxu1 %v1221_v20  ;;  %3649 = vmatprep.mubr.msk.bf16.mxu1 %vm4575_vm0, %v4574_v38  ;;  %v4096_v20 = vld [vmem:[#allocation11 + $0x60] ss:$24 sps:$4 sm:$0xff]  }
 0x411   :  { %3653 = vmatprep.subr.bf16.mxu1 %v4574_v38 }
 0x412   :  { %v4211_v21 = vpop.eup %4210 }
 0x413   :  { %v1167_v22 = vmul.f32 %v4211_v21, %v4207_v12  ;;  %v4104_v21 = vld [vmem:[#allocation11 + $0x94] ss:$24 sps:$4 sm:$0xff]  }
 0x415   :  { %v1169_v23 = vpack.c.bf16 %v1167_v22, %v1167_v22  ;;  %v4102_v22 = vld [vmem:[#allocation11 + $0x90] ss:$24 sps:$4 sm:$0xff]  }
 0x417   :  { %3650 = vmatmul.mubr.msk.bf16.vlgmr.msra.gmra.mrb[16].mxu1 %vm1145_vm2, %v1169_v23  ;;  %v4110_v23 = vld [vmem:[#allocation11 + $0xc4] ss:$24 sps:$4 sm:$0xff]  }
 0x418   :  { %3655 = vmatprep.mubr.msk.bf16.mxu1 %vm4575_vm0, %v4574_v38 }
 0x419   :  { %3654 = vmatpush3.bf16.xpose.msra.mxu1 %v1056_v24  ;;  %v4108_v24 = vld [vmem:[#allocation11 + $0xc0] ss:$24 sps:$4 sm:$0xff]  }
 0x41a   :  { %3659 = vmatprep.subr.bf16.mxu1 %v4574_v38 }
 0x420   :  { %3656 = vmatmul.mubr.bf16.vlgmr.msra.gmra.mrb[20].mxu1 %v1054_v25  ;;  %v4116_v25 = vld [vmem:[#allocation11 + $0xf4] ss:$24 sps:$4 sm:$0xff]  }
 0x421   :  { %3660 = vmatpush3.bf16.xpose.msra.mxu1 %v1062_v26  ;;  %3661 = vmatprep.mubr.msk.bf16.mxu1 %vm4575_vm0, %v4574_v38  ;;  %v4114_v26 = vld [vmem:[#allocation11 + $0xf0] ss:$24 sps:$4 sm:$0xff]  }
 0x422   :  { %3665 = vmatprep.subr.bf16.mxu1 %v4574_v38 }
 0x428   :  { %3662 = vmatmul.mubr.bf16.vlgmr.msra.gmra.mrb[24].mxu1 %v1060_v28  ;;  %v4120_v28 = vld [vmem:[#allocation11 + $0x120] ss:$24 sps:$4 sm:$0xff]  }
 0x429   :  { %3666 = vmatpush3.bf16.msra.mxu1 %v1388_v29  ;;  %3667 = vmatprep.mubr.msk.bf16.mxu1 %vm4575_vm0, %v4574_v38 }
 0x42a   :  { %3671 = vmatprep.subr.bf16.mxu1 %v4574_v38 }
 0x4e2   :  { %v4909_v30 = vpop.f32.mrb[12].mxu1 }
 0x4e3   :  { %v3645_v31 = vpop.f32.mrb[13].mxu1 }
 0x4e4   :  { %v1214_v32 = vpop.f32.mrb[14].mxu1 }
 0x4e5   :  { %v3646_v33 = vpop.f32.mrb[15].mxu1 }
 0x4ea   :  { %v4911_v34 = vpop.f32.mrb[16].mxu1 }
 0x4eb   :  { %v1263_v35 = vpack.c.bf16 %v4911_v34, %v4909_v30  ;;  %v3651_v36 = vpop.f32.mrb[17].mxu1  ;;  %v4117_v30 = vld [vmem:[#allocation11 + $0x100] ss:$24 sps:$4 sm:$0xff]   ;;  %v4125_v34 = vld [vmem:[#allocation11 + $0x134] ss:$24 sps:$4 sm:$0xff]  }
 0x4ec   :  { %v1260_v37 = vpop.f32.mrb[18].mxu1 }
 0x4ed   :  { %v3652_v39 = vpop.f32.mrb[19].mxu1  ;;  %v4076_v37 = vld [vmem:[#allocation10] sm:$0xff]  }
 0x4f3   :  { %v1314_v40 = vpop.f32.mrb[20].mxu1 }
 0x4f4   :  { %v3657_v41 = vpop.f32.mrb[21].mxu1  ;;  %v1360_v42 = vsel %vm1145_vm2, %v1314_v40, -inf }
 0x4f5   :  { %1361 = vmax.xlane.f32.xlu0 %v1360_v42  ;;  %v1317_v43 = vpop.f32.mrb[22].mxu1 }
 0x4f6   :  { %v3658_v44 = vpop.f32.mrb[23].mxu1  ;;  %v4077_v43 = vld [vmem:[#allocation10 + $0x8] sm:$0xff]  }
 0x4f7   :  { %v4078_v44 = vld [vmem:[#allocation10 + $0x10] sm:$0xff]  }
 0x4fb   :  { %v1354_v45 = vpop.f32.mrb[24].mxu1 }
 0x4fc   :  { %v3663_v46 = vpop.f32.mrb[25].mxu1  ;;  %v1363_v47 = vsel %vm1145_vm2, %v1354_v45, -inf }
 0x4fd   :  { %1364 = vmax.xlane.f32.xlu1 %v1363_v47  ;;  %v1357_v48 = vpop.f32.mrb[26].mxu1  ;;  %v4080_v46 = vld [vmem:[#allocation10 + $0x20] sm:$0xff]   ;;  %v4081_v47 = vld [vmem:[#allocation10 + $0x28] sm:$0xff]  }
 0x4fe   :  { %v3664_v49 = vpop.f32.mrb[27].mxu1  ;;  %v4082_v48 = vld [vmem:[#allocation10 + $0x30] sm:$0xff]  }
 0x4ff   :  { %v4083_v49 = vld [vmem:[#allocation10 + $0x38] sm:$0xff]  }
 0x582   :  { %v1362_v50 = vpop.xlane.xlu0 %1361 }
 0x583   :  { %v1366_v51 = vsub.f32 %v1314_v40, %v1362_v50  ;;  %v4089_v50 = vld [vmem:[#allocation11 + $0x14] ss:$24 sps:$4 sm:$0xff]  }
 0x585   :  { %v1368_v52 = vmul.f32 1.442695, %v1366_v51  ;;  %v4087_v51 = vld [vmem:[#allocation11 + $0x10] ss:$24 sps:$4 sm:$0xff]  }
 0x587   :  { %4212 = vpow2.f32 %v1368_v52  ;;  %v4095_v52 = vld [vmem:[#allocation11 + $0x44] ss:$24 sps:$4 sm:$0xff]  }
 0x58a   :  { %v1365_v53 = vpop.xlane.xlu1 %1364 }
 0x58b   :  { %v1367_v54 = vsub.f32 %v1354_v45, %v1365_v53  ;;  %v4079_v45 = vld [vmem:[#allocation10 + $0x18] sm:$0xff]  }
 0x58c   :  { %v4093_v53 = vld [vmem:[#allocation11 + $0x40] ss:$24 sps:$4 sm:$0xff]  }
 0x58d   :  { %v1370_v55 = vmul.f32 1.442695, %v1367_v54  ;;  %v4101_v54 = vld [vmem:[#allocation11 + $0x74] ss:$24 sps:$4 sm:$0xff]  }
 0x58f   :  { %4214 = vpow2.f32 %v1370_v55  ;;  %v4099_v55 = vld [vmem:[#allocation11 + $0x70] ss:$24 sps:$4 sm:$0xff]  }
 0x591   :  { %v4213_v57 = vpop.eup %4212 }
 0x592   :  { %v1372_v58 = vsel %vm1145_vm2, %v4213_v57, 0.0 }
 0x593   :  { %1373 = vadd.xlane.f32.xlu0 %v1372_v58  ;;  %v4105_v58 = vld [vmem:[#allocation11 + $0xa0] ss:$24 sps:$4 sm:$0xff]  }
 0x599   :  { %v4215_v59 = vpop.eup %4214 }
 0x59a   :  { %v1375_v60 = vsel %vm1145_vm2, %v4215_v59, 0.0 }
 0x59b   :  { %1376 = vadd.xlane.f32.xlu1 %v1375_v60  ;;  %v4111_v60 = vld [vmem:[#allocation11 + $0xd0] ss:$24 sps:$4 sm:$0xff]  }
 0x620   :  { %v1374_v4 = vpop.xlane.xlu0 %1373 }
 0x621   :  { %4216 = vrcp.f32 %v1374_v4 }
 0x628   :  { %v1377_v5 = vpop.xlane.xlu1 %1376 }
 0x629   :  { %4218 = vrcp.f32 %v1377_v5 }
 0x62b   :  { %v4217_v6 = vpop.eup %4216 }
 0x62c   :  { %v1380_v8 = vmul.f32 %v4217_v6, %v4213_v57  ;;  %v4107_v57 = vld [vmem:[#allocation11 + $0xa4] ss:$24 sps:$4 sm:$0xff]  }
 0x62e   :  { %v1382_v9 = vpack.c.bf16 %v1380_v8, %v1380_v8 }
 0x630   :  { %3668 = vmatmul.mubr.msk.bf16.vlgmr.msra.gmra.mrb[28].mxu1 %vm1145_vm2, %v1382_v9 }
 0x631   :  { %3672 = vmatpush3.bf16.msra.mxu1 %v1434_v10  ;;  %3673 = vmatprep.mubr.msk.bf16.mxu1 %vm4575_vm0, %v4574_v38  ;;  %v4137_v10 = vld [vmem:[#allocation11 + $0x3c] ss:$24 sps:$4 sm:$0xff]  }
 0x632   :  { %1961 = vmatprep.subr.bf16.mxu1 %v4086_v16  ;;  %v4144_v16 = vld [vmem:[#allocation11 + $0xc8] ss:$24 sps:$4 sm:$0xff]  }
 0x633   :  { %v4219_v11 = vpop.eup %4218 }
 0x634   :  { %v1381_v12 = vmul.f32 %v4219_v11, %v4215_v59  ;;  %v4113_v59 = vld [vmem:[#allocation11 + $0xd4] ss:$24 sps:$4 sm:$0xff]   ;;  %v4135_v11 = vld [vmem:[#allocation11 + $0x38] ss:$24 sps:$4 sm:$0xff]  }
 0x636   :  { %v1383_v13 = vpack.c.bf16 %v1381_v12, %v1381_v12  ;;  %v4140_v12 = vld [vmem:[#allocation11 + $0x6c] ss:$24 sps:$4 sm:$0xff]  }
 0x638   :  { %3674 = vmatmul.mubr.msk.bf16.vlgmr.msra.gmra.mrb[32].mxu1 %vm1145_vm2, %v1383_v13  ;;  %v4138_v13 = vld [vmem:[#allocation11 + $0x68] ss:$24 sps:$4 sm:$0xff]  }
 0x639   :  { %1993 = vmatprep.mubr.bf16.mxu1 %v4573_v0  ;;  %1962 = vmatpush1.bf16.msra.mxu1 %v4084_v15  ;;  %v4146_v15 = vld [vmem:[#allocation11 + $0xcc] ss:$24 sps:$4 sm:$0xff]  }
 0x63a   :  { %1963 = vmatprep.subr.bf16.mxu1 %v4092_v17  ;;  %v4149_v17 = vld [vmem:[#allocation11 + $0xfc] ss:$24 sps:$4 sm:$0xff]  }
 0x63d   :  { %1964 = vmatpush1.bf16.msra.mxu1 %v4090_v18  ;;  %v4147_v18 = vld [vmem:[#allocation11 + $0xf8] ss:$24 sps:$4 sm:$0xff]  }
 0x63e   :  { %1965 = vmatprep.subr.bf16.mxu1 %v4098_v19  ;;  %v4150_v19 = vld [vmem:[#allocation11 + $0x128] ss:$24 sps:$4 sm:$0xff]  }
 0x641   :  { %1966 = vmatpush1.bf16.msra.mxu1 %v4096_v20  ;;  %v4155_v20 = vld [vmem:[#allocation11 + $0x15c] ss:$24 sps:$4 sm:$0xff]  }
 0x642   :  { %1967 = vmatprep.subr.bf16.mxu1 %v4104_v21  ;;  %v4153_v21 = vld [vmem:[#allocation11 + $0x158] ss:$24 sps:$4 sm:$0xff]  }
 0x645   :  { %1968 = vmatpush1.bf16.msra.mxu1 %v4102_v22 }
 0x646   :  { %1969 = vmatprep.subr.bf16.mxu1 %v4110_v23 }
 0x649   :  { %1970 = vmatpush1.bf16.msra.mxu1 %v4108_v24 }
 0x64a   :  { %1971 = vmatprep.subr.bf16.mxu1 %v4116_v25 }
 0x64d   :  { %1972 = vmatpush1.bf16.msra.mxu1 %v4114_v26 }
 0x64e   :  { %1973 = vmatprep.subr.bf16.mxu1 %v4122_v27 }
 0x651   :  { %1974 = vmatpush1.bf16.msra.mxu1 %v4120_v28 }
 0x652   :  { %1975 = vmatprep.subr.bf16.mxu1 %v4128_v62 }
 0x655   :  { %1976 = vmatpush1.bf16.msra.mxu1 %v4126_v63 }
 0x656   :  { %2004 = vmatprep.subr.bf16.mxu1 %v4134_v3 }
 0x703   :  { %v1424_v29 = vpop.f32.mrb[28].mxu1 }
 0x704   :  { %v3669_v31 = vpop.f32.mrb[29].mxu1 }
 0x705   :  { %v1427_v32 = vpop.f32.mrb[30].mxu1 }
 0x706   :  { %v3670_v33 = vpop.f32.mrb[31].mxu1 }
 0x70b   :  { %v1470_v36 = vpop.f32.mrb[32].mxu1 }
 0x70c   :  { %v1476_v39 = vpack.c.bf16 %v1470_v36, %v1424_v29  ;;  %v3675_v40 = vpop.f32.mrb[33].mxu1 }
 0x70d   :  { %v1473_v41 = vpop.f32.mrb[34].mxu1 }
 0x70e   :  { %v3676_v42 = vpop.f32.mrb[35].mxu1  ;;  %3694 = vmatmul.mubr.bf16.vlgmr.msra.gmra.mrb[8].mxu0 %v1476_v39 }
 0x70f   :  { %3698 = vmatpush3.bf16.msra.mxu0 %v4076_v37  ;;  %3713 = vmatprep.mubr.msk.bf16.mxu0 %vm4575_vm0, %v4574_v38 }
 0x710   :  { %3699 = vmatprep.subr.bf16.mxu0 %v4574_v38 }
 0x713   :  { %3700 = vmatpush3.bf16.msra.mxu0 %v4077_v43 }
 0x714   :  { %3701 = vmatprep.subr.bf16.mxu0 %v4574_v38 }
 0x717   :  { %3702 = vmatpush3.bf16.msra.mxu0 %v4078_v44 }
 0x718   :  { %3703 = vmatprep.subr.bf16.mxu0 %v4574_v38 }
 0x71b   :  { %3704 = vmatpush3.bf16.msra.mxu0 %v4079_v45 }
 0x71c   :  { %3705 = vmatprep.subr.bf16.mxu0 %v4574_v38 }
 0x71f   :  { %3706 = vmatpush3.bf16.msra.mxu0 %v4080_v46 }
 0x720   :  { %3707 = vmatprep.subr.bf16.mxu0 %v4574_v38 }
 0x723   :  { %3708 = vmatpush3.bf16.msra.mxu0 %v4081_v47 }
 0x724   :  { %3709 = vmatprep.subr.bf16.mxu0 %v4574_v38 }
 0x727   :  { %3710 = vmatpush3.bf16.msra.mxu0 %v4082_v48 }
 0x728   :  { %3711 = vmatprep.subr.bf16.mxu0 %v4574_v38 }
 0x72b   :  { %3712 = vmatpush3.bf16.msra.mxu0 %v4083_v49 }
 0x72c   :  { %2047 = vmatprep.subr.bf16.mxu0 %v4089_v50 }
 0x72e   :  { %3714 = vmatmul.mubr.bf16.vlgmr.msra.gmra.mrb[8].mxu0 %v1263_v35  ;;  %v4123_v35 = vld [vmem:[#allocation11 + $0x130] ss:$24 sps:$4 sm:$0xff]  }
 0x72f   :  { %2048 = vmatpush1.bf16.msra.mxu0 %v4087_v51  ;;  %2079 = vmatprep.mubr.bf16.mxu0 %v4573_v0 }
 0x730   :  { %2049 = vmatprep.subr.bf16.mxu0 %v4095_v52 }
 0x733   :  { %2050 = vmatpush1.bf16.msra.mxu0 %v4093_v53 }
 0x734   :  { %2051 = vmatprep.subr.bf16.mxu0 %v4101_v54 }
 0x737   :  { %2052 = vmatpush1.bf16.msra.mxu0 %v4099_v55 }
 0x738   :  { %2053 = vmatprep.subr.bf16.mxu0 %v4107_v57 }
 0x73b   :  { %2054 = vmatpush1.bf16.msra.mxu0 %v4105_v58 }
 0x73c   :  { %2055 = vmatprep.subr.bf16.mxu0 %v4113_v59 }
 0x73f   :  { %2056 = vmatpush1.bf16.msra.mxu0 %v4111_v60 }
 0x740   :  { %2057 = vmatprep.subr.bf16.mxu0 %v4119_v61 }
 0x743   :  { %2058 = vmatpush1.bf16.msra.mxu0 %v4117_v30 }
 0x744   :  { %2059 = vmatprep.subr.bf16.mxu0 %v4125_v34 }
 0x747   :  { %2060 = vmatpush1.bf16.msra.mxu0 %v4123_v35 }
 0x748   :  { %2061 = vmatprep.subr.bf16.mxu0 %v4131_v1 }
 0x74b   :  { %2062 = vmatpush1.bf16.msra.mxu0 %v4129_v2 }
 0x74c   :  { %3741 = vmatprep.subr.bf16.mxu0 %v4574_v38 }
 0x801   :  { %v4949_v4 = vpop.f32.mrb[8].mxu0 }
 0x802   :  { %v3715_v5 = vpop.f32.mrb[9].mxu0 }
 0x803   :  { %v4951_v6 = vpop.f32.mrb[10].mxu0 }
 0x804   :  { %v1672_v8 = vpack.c.bf16 %v4951_v6, %v4949_v4  ;;  %v3716_v9 = vpop.f32.mrb[11].mxu0 }
 0x806   :  { %1994 = vmatmul.mubr.bf16.vlgmr.msra.gmra.mrb[36].mxu1 %v1672_v8  ;;  %2080 = vmatmul.mubr.bf16.vlgmr.msra.gmra.mrb[12].mxu0 %v1672_v8 }
 0x807   :  { %2005 = vmatpush1.bf16.msra.mxu1 %v4132_v7  ;;  %2036 = vmatprep.mubr.bf16.mxu1 %v4573_v0  ;;  %v4152_v0 = vld [vmem:[#allocation11 + $0x12c] ss:$24 sps:$4 sm:$0xff]  }
 0x808   :  { %2006 = vmatprep.subr.bf16.mxu1 %v4137_v10  ;;  %3743 = vmatprep.mubr.msk.bf16.mxu0 %vm4575_vm0, %v4574_v38 }
 0x80b   :  { %2007 = vmatpush1.bf16.msra.mxu1 %v4135_v11 }
 0x80c   :  { %2008 = vmatprep.subr.bf16.mxu1 %v4140_v12 }
 0x80f   :  { %2009 = vmatpush1.bf16.msra.mxu1 %v4138_v13 }
 0x810   :  { %2010 = vmatprep.subr.bf16.mxu1 %v4143_v14 }
 0x813   :  { %2011 = vmatpush1.bf16.msra.mxu1 %v4141_v56 }
 0x814   :  { %2012 = vmatprep.subr.bf16.mxu1 %v4146_v15 }
 0x817   :  { %2013 = vmatpush1.bf16.msra.mxu1 %v4144_v16 }
 0x818   :  { %2014 = vmatprep.subr.bf16.mxu1 %v4149_v17 }
 0x81b   :  { %2015 = vmatpush1.bf16.msra.mxu1 %v4147_v18 }
 0x81c   :  { %2016 = vmatprep.subr.bf16.mxu1 %v4152_v0 }
 0x81f   :  { %2017 = vmatpush1.bf16.msra.mxu1 %v4150_v19 }
 0x820   :  { %2018 = vmatprep.subr.bf16.mxu1 %v4155_v20 }
 0x823   :  { %2019 = vmatpush1.bf16.msra.mxu1 %v4153_v21 }
 0x824   :  { %3717 = vmatprep.subr.bf16.mxu1 %v4574_v38 }
 0x826   :  { %2037 = vmatmul.mubr.bf16.vlgmr.msra.gmra.mrb[40].mxu1 %v1672_v8 }
 0x827   :  { %3719 = vmatprep.mubr.msk.bf16.mxu1 %vm4575_vm0, %v4574_v38 }
 0x8d9   :  { %v1995_v22 = vpop.f32.mrb[36].mxu1  ;;  %v2081_v23 = vpop.f32.mrb[12].mxu0 }
 0x8da   :  { %v1997_v24 = vpop.f32.mrb[37].mxu1  ;;  %v2083_v25 = vpop.f32.mrb[13].mxu0  ;;  %v2090_v41 = vpack.c.bf16 %v1995_v22, %v1995_v22  ;;  %v2094_v45 = vpack.c.bf16 %v2081_v23, %v2081_v23 }
 0x8db   :  { %v1999_v26 = vpop.f32.mrb[38].mxu1  ;;  %v4961_v27 = vpop.f32.mrb[14].mxu0  ;;  %v2095_v40 = vpack.c.bf16 %v2083_v25, %v2083_v25  ;;  %v2091_v42 = vpack.c.bf16 %v1997_v24, %v1997_v24 }
 0x8dc   :  { %v4963_v28 = vpop.f32.mrb[39].mxu1  ;;  %v4965_v29 = vpop.f32.mrb[15].mxu0  ;;  %v2096_v46 = vpack.c.bf16 %v1999_v26, %v1999_v26  ;;  %v2210_v47 = vsel %vm1173_vm1, %v2094_v45, 0  ;;  %v2100_v15 = vpack.c.bf16 %v4961_v27, %v4961_v27 }
 0x8dd   :  { %v2423_v44 = vsel %vm1173_vm1, %v2095_v40, 0  ;;  %v2101_v24 = vpack.c.bf16 %v4965_v29, %v4965_v29  ;;  %v2097_v25 = vpack.c.bf16 %v4963_v28, %v4963_v28 }
 0x8de   :  { %v2256_v18 = vsel %vm1173_vm1, %v2100_v15, 0  ;;  %v4172_v15 = vld [vmem:[#allocation14] sm:$0xff]  }
 0x8df   :  { %v2469_v26 = vsel %vm1173_vm1, %v2101_v24, 0 }
 0x8f9   :  { %v2038_v31 = vpop.f32.mrb[40].mxu1 }
 0x8fa   :  { %v2092_v32 = vpack.c.bf16 %v2038_v31, %v2038_v31  ;;  %v2040_v33 = vpop.f32.mrb[41].mxu1 }
 0x8fb   :  { %v2093_v36 = vpack.c.bf16 %v2040_v33, %v2040_v33  ;;  %v2042_v37 = vpop.f32.mrb[42].mxu1 }
 0x8fc   :  { %v4967_v39 = vpop.f32.mrb[43].mxu1  ;;  %3718 = vmatpush3.bf16.xpose.msra.mxu1 %v2092_v32  ;;  %v2098_v43 = vpack.c.bf16 %v2042_v37, %v2042_v37 }
 0x8fd   :  { %3742 = vmatpush3.bf16.xpose.msra.mxu0 %v2093_v36  ;;  %3723 = vmatprep.subr.bf16.mxu1 %v4574_v38  ;;  %v2099_v23 = vpack.c.bf16 %v4967_v39, %v4967_v39 }
 0x8fe   :  { %3753 = vmatprep.subr.bf16.mxu0 %v4574_v38 }
 0x903   :  { %3720 = vmatmul.mubr.bf16.vlgmr.msra.gmra.mrb[44].mxu1 %v2090_v41 }
 0x904   :  { %3724 = vmatpush3.bf16.xpose.msra.mxu1 %v2098_v43  ;;  %3744 = vmatmul.mubr.bf16.vlgmr.msra.gmra.mrb[16].mxu0 %v2091_v42 }
 0x905   :  { %3754 = vmatpush3.bf16.msra.mxu0 %v2423_v44  ;;  %3725 = vmatprep.mubr.msk.bf16.mxu1 %vm4575_vm0, %v4574_v38 }
 0x906   :  { %3729 = vmatprep.subr.bf16.mxu1 %v4574_v38  ;;  %3755 = vmatprep.mubr.msk.bf16.mxu0 %vm4575_vm0, %v4574_v38 }
 0x907   :  { %3765 = vmatprep.subr.bf16.mxu0 %v4574_v38 }
 0x90b   :  { %3726 = vmatmul.mubr.bf16.vlgmr.msra.gmra.mrb[48].mxu1 %v2096_v46 }
 0x90c   :  { %3730 = vmatpush3.bf16.msra.mxu1 %v2210_v47  ;;  %3731 = vmatprep.mubr.msk.bf16.mxu1 %vm4575_vm0, %v4574_v38 }
 0x90d   :  { %3735 = vmatprep.subr.bf16.mxu1 %v4574_v38 }
 0x9d6   :  { %v2136_v48 = vpop.f32.mrb[44].mxu1 }
 0x9d7   :  { %v3721_v49 = vpop.f32.mrb[45].mxu1  ;;  %v2349_v50 = vpop.f32.mrb[16].mxu0  ;;  %v2182_v51 = vsel %vm1145_vm2, %v2136_v48, -inf }
 0x9d8   :  { %v3745_v52 = vpop.f32.mrb[17].mxu0  ;;  %2183 = vmax.xlane.f32.xlu0 %v2182_v51  ;;  %v2139_v53 = vpop.f32.mrb[46].mxu1  ;;  %v2395_v7 = vsel %vm1145_vm2, %v2349_v50, -inf }
 0x9d9   :  { %v3722_v54 = vpop.f32.mrb[47].mxu1  ;;  %v2352_v55 = vpop.f32.mrb[18].mxu0 }
 0x9da   :  { %v3746_v57 = vpop.f32.mrb[19].mxu0 }
 0x9de   :  { %v2176_v58 = vpop.f32.mrb[48].mxu1 }
 0x9df   :  { %v3727_v59 = vpop.f32.mrb[49].mxu1  ;;  %v2185_v60 = vsel %vm1145_vm2, %v2176_v58, -inf }
 0x9e0   :  { %2186 = vmax.xlane.f32.xlu1 %v2185_v60  ;;  %v2179_v61 = vpop.f32.mrb[50].mxu1  ;;  %v4164_v59 = vld [vmem:[#allocation13 + $0x40] sm:$0xff]   ;;  %v4165_v60 = vld [vmem:[#allocation13 + $0x48] sm:$0xff]  }
 0x9e1   :  { %v3728_v30 = vpop.f32.mrb[51].mxu1  ;;  %v4166_v61 = vld [vmem:[#allocation13 + $0x50] sm:$0xff]  }
 0x9e2   :  { %v4167_v30 = vld [vmem:[#allocation13 + $0x58] sm:$0xff]  }
 0xa65   :  { %v2184_v34 = vpop.xlane.xlu0 %2183 }
 0xa66   :  { %v2188_v35 = vsub.f32 %v2136_v48, %v2184_v34  ;;  %v4168_v34 = vld [vmem:[#allocation13 + $0x60] sm:$0xff]  }
 0xa68   :  { %v2190_v62 = vmul.f32 1.442695, %v2188_v35  ;;  %v4169_v35 = vld [vmem:[#allocation13 + $0x68] sm:$0xff]  }
 0xa6a   :  { %4220 = vpow2.f32 %v2190_v62  ;;  %v4170_v62 = vld [vmem:[#allocation13 + $0x70] sm:$0xff]  }
 0xa6d   :  { %v2187_v63 = vpop.xlane.xlu1 %2186 }
 0xa6e   :  { %v2189_v1 = vsub.f32 %v2176_v58, %v2187_v63 }
 0xa70   :  { %v2192_v2 = vmul.f32 1.442695, %v2189_v1 }
 0xa72   :  { %4222 = vpow2.f32 %v2192_v2 }
 0xa74   :  { %v4221_v3 = vpop.eup %4220 }
 0xa75   :  { %v2194_v5 = vsel %vm1145_vm2, %v4221_v3, 0.0 }
 0xa76   :  { %2195 = vadd.xlane.f32.xlu0 %v2194_v5 }
 0xa7a   :  { %2396 = vmax.xlane.f32.xlu0 %v2395_v7  ;;  %v4157_v7 = vld [vmem:[#allocation13 + $0x8] sm:$0xff]  }
 0xa7c   :  { %v4223_v8 = vpop.eup %4222 }
 0xa7d   :  { %v2197_v9 = vsel %vm1145_vm2, %v4223_v8, 0.0 }
 0xa7e   :  { %2198 = vadd.xlane.f32.xlu1 %v2197_v9  ;;  %v4159_v9 = vld [vmem:[#allocation13 + $0x18] sm:$0xff]  }
 0xb03   :  { %v2196_v10 = vpop.xlane.xlu0 %2195 }
 0xb04   :  { %4224 = vrcp.f32 %v2196_v10  ;;  %v4160_v10 = vld [vmem:[#allocation13 + $0x20] sm:$0xff]  }
 0xb07   :  { %v2397_v11 = vpop.xlane.xlu0 %2396 }
 0xb08   :  { %v2401_v12 = vsub.f32 %v2349_v50, %v2397_v11  ;;  %v4161_v11 = vld [vmem:[#allocation13 + $0x28] sm:$0xff]  }
 0xb0a   :  { %v2403_v13 = vmul.f32 1.442695, %v2401_v12  ;;  %v4162_v12 = vld [vmem:[#allocation13 + $0x30] sm:$0xff]  }
 0xb0b   :  { %v2199_v14 = vpop.xlane.xlu1 %2198 }
 0xb0c   :  { %4226 = vpow2.f32 %v2403_v13  ;;  %v4163_v13 = vld [vmem:[#allocation13 + $0x38] sm:$0xff]  }
 0xb0d   :  { %4228 = vrcp.f32 %v2199_v14  ;;  %v4171_v14 = vld [vmem:[#allocation13 + $0x78] sm:$0xff]  }
 0xb0e   :  { %v4225_v56 = vpop.eup %4224 }
 0xb0f   :  { %v2202_v16 = vmul.f32 %v4225_v56, %v4221_v3  ;;  %v4156_v3 = vld [vmem:[#allocation13] sm:$0xff]  }
 0xb11   :  { %v2204_v17 = vpack.c.bf16 %v2202_v16, %v2202_v16 }
 0xb13   :  { %3732 = vmatmul.mubr.msk.bf16.vlgmr.msra.gmra.mrb[52].mxu1 %vm1145_vm2, %v2204_v17 }
 0xb14   :  { %3736 = vmatpush3.bf16.msra.mxu1 %v2256_v18  ;;  %3737 = vmatprep.mubr.msk.bf16.mxu1 %vm4575_vm0, %v4574_v38 }
 0xb15   :  { %3747 = vmatprep.subr.bf16.mxu1 %v4574_v38 }
 0xb16   :  { %v4227_v0 = vpop.eup %4226 }
 0xb17   :  { %v4229_v19 = vpop.eup %4228  ;;  %v2407_v20 = vsel %vm1145_vm2, %v4227_v0, 0.0 }
 0xb18   :  { %v2203_v21 = vmul.f32 %v4229_v19, %v4223_v8  ;;  %2408 = vadd.xlane.f32.xlu0 %v2407_v20  ;;  %v4158_v8 = vld [vmem:[#allocation13 + $0x10] sm:$0xff]   ;;  %v4173_v19 = vld [vmem:[#allocation14 + $0x8] sm:$0xff]  }
 0xb19   :  { %v4174_v20 = vld [vmem:[#allocation14 + $0x10] sm:$0xff]  }
 0xb1a   :  { %v2205_v22 = vpack.c.bf16 %v2203_v21, %v2203_v21  ;;  %v4175_v21 = vld [vmem:[#allocation14 + $0x18] sm:$0xff]  }
 0xb1c   :  { %3738 = vmatmul.mubr.msk.bf16.vlgmr.msra.gmra.mrb[56].mxu1 %vm1145_vm2, %v2205_v22  ;;  %v4176_v22 = vld [vmem:[#allocation14 + $0x20] sm:$0xff]  }
 0xb1d   :  { %3748 = vmatpush3.bf16.xpose.msra.mxu1 %v2099_v23  ;;  %3749 = vmatprep.mubr.msk.bf16.mxu1 %vm4575_vm0, %v4574_v38  ;;  %v4177_v23 = vld [vmem:[#allocation14 + $0x28] sm:$0xff]  }
 0xb1e   :  { %3759 = vmatprep.subr.bf16.mxu1 %v4574_v38 }
 0xb24   :  { %3750 = vmatmul.mubr.bf16.vlgmr.msra.gmra.mrb[60].mxu1 %v2097_v25 }
 0xb25   :  { %3760 = vmatpush3.bf16.msra.mxu1 %v2469_v26  ;;  %3761 = vmatprep.mubr.msk.bf16.mxu1 %vm4575_vm0, %v4574_v38 }
 0xb26   :  { %3785 = vmatprep.subr.bf16.mxu1 %v4574_v38 }
 0xba5   :  { %v2409_v27 = vpop.xlane.xlu0 %2408 }
 0xba6   :  { %4230 = vrcp.f32 %v2409_v27 }
 0xbb0   :  { %v4231_v31 = vpop.eup %4230 }
 0xbb1   :  { %v2415_v32 = vmul.f32 %v4231_v31, %v4227_v0  ;;  %v4178_v31 = vld [vmem:[#allocation14 + $0x30] sm:$0xff]  }
 0xbb3   :  { %v2417_v33 = vpack.c.bf16 %v2415_v32, %v2415_v32  ;;  %v4179_v32 = vld [vmem:[#allocation14 + $0x38] sm:$0xff]  }
 0xbb5   :  { %3756 = vmatmul.mubr.msk.bf16.vlgmr.msra.gmra.mrb[20].mxu0 %vm1145_vm2, %v2417_v33 }
 0xbb6   :  { %3781 = vmatprep.mubr.msk.bf16.mxu0 %vm4575_vm0, %v4574_v38  ;;  %3766 = vmatpush3.bf16.msra.mxu0 %v4164_v59 }
 0xbb7   :  { %3767 = vmatprep.subr.bf16.mxu0 %v4574_v38 }
 0xbba   :  { %3768 = vmatpush3.bf16.msra.mxu0 %v4165_v60 }
 0xbbb   :  { %3769 = vmatprep.subr.bf16.mxu0 %v4574_v38 }
 0xbbe   :  { %3770 = vmatpush3.bf16.msra.mxu0 %v4166_v61 }
 0xbbf   :  { %3771 = vmatprep.subr.bf16.mxu0 %v4574_v38 }
 0xbc2   :  { %3772 = vmatpush3.bf16.msra.mxu0 %v4167_v30 }
 0xbc3   :  { %3773 = vmatprep.subr.bf16.mxu0 %v4574_v38 }
 0xbc6   :  { %3774 = vmatpush3.bf16.msra.mxu0 %v4168_v34 }
 0xbc7   :  { %3775 = vmatprep.subr.bf16.mxu0 %v4574_v38 }
 0xbca   :  { %3776 = vmatpush3.bf16.msra.mxu0 %v4169_v35 }
 0xbcb   :  { %3777 = vmatprep.subr.bf16.mxu0 %v4574_v38 }
 0xbce   :  { %3778 = vmatpush3.bf16.msra.mxu0 %v4170_v62 }
 0xbcf   :  { %3779 = vmatprep.subr.bf16.mxu0 %v4574_v38 }
 0xbd2   :  { %3780 = vmatpush3.bf16.msra.mxu0 %v4171_v14 }
 0xbd3   :  { %3805 = vmatprep.subr.bf16.mxu0 %v4574_v38 }
 0xbe6   :  { %v5012_v28 = vpop.f32.mrb[52].mxu1 }
 0xbe7   :  { %v3733_v29 = vpop.f32.mrb[53].mxu1 }
 0xbe8   :  { %v2249_v36 = vpop.f32.mrb[54].mxu1 }
 0xbe9   :  { %v3734_v37 = vpop.f32.mrb[55].mxu1 }
 0xbef   :  { %v5014_v39 = vpop.f32.mrb[56].mxu1 }
 0xbf0   :  { %v2298_v40 = vpack.c.bf16 %v5014_v39, %v5012_v28  ;;  %v3739_v41 = vpop.f32.mrb[57].mxu1 }
 0xbf1   :  { %v2295_v42 = vpop.f32.mrb[58].mxu1 }
 0xbf2   :  { %v3740_v43 = vpop.f32.mrb[59].mxu1 }
 0xbf3   :  { %v4180_v43 = vld [vmem:[#allocation16] sm:$0xff]  }
 0xbf7   :  { %v2389_v44 = vpop.f32.mrb[60].mxu1 }
 0xbf8   :  { %v3751_v45 = vpop.f32.mrb[61].mxu1  ;;  %v2398_v46 = vsel %vm1145_vm2, %v2389_v44, -inf }
 0xbf9   :  { %2399 = vmax.xlane.f32.xlu1 %v2398_v46  ;;  %v2392_v47 = vpop.f32.mrb[62].mxu1  ;;  %v4184_v45 = vld [vmem:[#allocation16 + $0x20] sm:$0xff]   ;;  %v4185_v46 = vld [vmem:[#allocation16 + $0x28] sm:$0xff]  }
 0xbfa   :  { %v3752_v48 = vpop.f32.mrb[63].mxu1  ;;  %v4186_v47 = vld [vmem:[#allocation16 + $0x30] sm:$0xff]  }
 0xbfb   :  { %v4187_v48 = vld [vmem:[#allocation16 + $0x38] sm:$0xff]  }
 0xc86   :  { %v2400_v49 = vpop.xlane.xlu1 %2399 }
 0xc87   :  { %v2402_v50 = vsub.f32 %v2389_v44, %v2400_v49  ;;  %v4181_v44 = vld [vmem:[#allocation16 + $0x8] sm:$0xff]   ;;  %v208_v49 = vlaneseq }
 0xc88   :  { %v5019_v51 = vpop.f32.mrb[20].mxu0 }
 0xc89   :  { %v2405_v52 = vmul.f32 1.442695, %v2402_v50  ;;  %v3757_v53 = vpop.f32.mrb[21].mxu0  ;;  %v5075_v50 = vshrl.u32 %v208_v49, 7 }
 0xc8a   :  { %v2462_v54 = vpop.f32.mrb[22].mxu0 }
 0xc8b   :  { %4232 = vpow2.f32 %v2405_v52  ;;  %v3758_v55 = vpop.f32.mrb[23].mxu0  ;;  %v5081_v52 = vld [vmem:[%s5169_s12] sm:$0x3] }
 0xc95   :  { %v4233_v57 = vpop.eup %4232 }
 0xc96   :  { %v2410_v58 = vsel %vm1145_vm2, %v4233_v57, 0.0 }
 0xc97   :  { %2411 = vadd.xlane.f32.xlu1 %v2410_v58 }
 0xd24   :  { %v2412_v63 = vpop.xlane.xlu1 %2411 }
 0xd25   :  { %4234 = vrcp.f32 %v2412_v63 }
 0xd2f   :  { %v4235_v1 = vpop.eup %4234 }
 0xd30   :  { %v2416_v2 = vmul.f32 %v4235_v1, %v4233_v57 }
 0xd32   :  { %v2418_v5 = vpack.c.bf16 %v2416_v2, %v2416_v2 }
 0xd34   :  { %3762 = vmatmul.mubr.msk.bf16.vlgmr.msra.gmra.mrb[64].mxu1 %vm1145_vm2, %v2418_v5 }
 0xd35   :  { %3786 = vmatpush3.bf16.msra.mxu1 %v4156_v3  ;;  %3801 = vmatprep.mubr.msk.bf16.mxu1 %vm4575_vm0, %v4574_v38 }
 0xd36   :  { %3787 = vmatprep.subr.bf16.mxu1 %v4574_v38 }
 0xd39   :  { %3788 = vmatpush3.bf16.msra.mxu1 %v4157_v7 }
 0xd3a   :  { %3789 = vmatprep.subr.bf16.mxu1 %v4574_v38 }
 0xd3d   :  { %3790 = vmatpush3.bf16.msra.mxu1 %v4158_v8 }
 0xd3e   :  { %3791 = vmatprep.subr.bf16.mxu1 %v4574_v38 }
 0xd41   :  { %3792 = vmatpush3.bf16.msra.mxu1 %v4159_v9 }
 0xd42   :  { %3793 = vmatprep.subr.bf16.mxu1 %v4574_v38 }
 0xd45   :  { %3794 = vmatpush3.bf16.msra.mxu1 %v4160_v10 }
 0xd46   :  { %3795 = vmatprep.subr.bf16.mxu1 %v4574_v38 }
 0xd49   :  { %3796 = vmatpush3.bf16.msra.mxu1 %v4161_v11 }
 0xd4a   :  { %3797 = vmatprep.subr.bf16.mxu1 %v4574_v38 }
 0xd4d   :  { %3798 = vmatpush3.bf16.msra.mxu1 %v4162_v12 }
 0xd4e   :  { %3799 = vmatprep.subr.bf16.mxu1 %v4574_v38 }
 0xd51   :  { %3800 = vmatpush3.bf16.msra.mxu1 %v4163_v13 }
 0xd52   :  { %3825 = vmatprep.subr.bf16.mxu1 %v4574_v38 }
 0xd54   :  { %3802 = vmatmul.mubr.bf16.vlgmr.msra.gmra.mrb[68].mxu1 %v2298_v40 }
 0xd55   :  { %3841 = vmatprep.mubr.msk.bf16.mxu1 %vm4575_vm0, %v4574_v38  ;;  %3826 = vmatpush3.bf16.msra.mxu1 %v4180_v43  ;;  %v4191_v43 = vld [vmem:[#allocation17 + $0x18] sm:$0xff]  }
 0xd56   :  { %3827 = vmatprep.subr.bf16.mxu1 %v4574_v38 }
 0xd59   :  { %3828 = vmatpush3.bf16.msra.mxu1 %v4181_v44  ;;  %v4192_v44 = vld [vmem:[#allocation17 + $0x20] sm:$0xff]  }
 0xd5a   :  { %3829 = vmatprep.subr.bf16.mxu1 %v4574_v38 }
 0xe07   :  { %v2505_v56 = vpop.f32.mrb[64].mxu1 }
 0xe08   :  { %v2511_v16 = vpack.c.bf16 %v2505_v56, %v5019_v51  ;;  %v3763_v17 = vpop.f32.mrb[65].mxu1  ;;  %v2728_v51 = vsub.s32 0, %v5075_v50 }
 0xe09   :  { %v2508_v18 = vpop.f32.mrb[66].mxu1 }
 0xe0a   :  { %v3764_v0 = vpop.f32.mrb[67].mxu1  ;;  %3782 = vmatmul.mubr.bf16.vlgmr.msra.gmra.mrb[24].mxu0 %v2511_v16  ;;  %v2729_v53 = vrot.slane %v5081_v52, %v2728_v51 }
 0xe0b   :  { %3806 = vmatpush3.bf16.msra.mxu0 %v4172_v15  ;;  %3821 = vmatprep.mubr.msk.bf16.mxu0 %vm4575_vm0, %v4574_v38  ;;  %v5089_v15 = vld [vmem:[%s5168_s11] sm:$0x1f]  ;;  %s4576_s11 = smov [#allocation21]  }
 0xe0c   :  { %3807 = vmatprep.subr.bf16.mxu0 %v4574_v38  ;;  %v2857_v16 = vrot.slane %v5089_v15, %v2728_v51  ;;  %s3285_s5 = sshll.u32 %s4576_s11, 4  ;;  %s3286_s5 = int_to_ptr.vmem [resolvable:$true] %s3285_s5 }
 0xe0d   :  { %s4496_s21 = scalar_lea.vmem %s3286_s5, 256  ;;  %p4501_p5 = scmp.lt.s32.totalorder %s3286_s5, %s3286_s5 }
 0xe0e   :  { %p4497_p4 = scmp.ne.s32.totalorder %s3286_s5, %s4496_s21  ;;  %p4502_p6 = scmp.lt.s32.totalorder %s4496_s21, %s4496_s21 }
 0xe0f   :  { %3808 = vmatpush3.bf16.msra.mxu0 %v4173_v19 }
 0xe10   :  { %3809 = vmatprep.subr.bf16.mxu0 %v4574_v38  ;;  %p4503_p7 = por %p4502_p6, %p4501_p5 }
 0xe12   :  { %p4504_p8 = pnand %p4503_p7, %p4497_p4 }
 0xe13   :  { %3810 = vmatpush3.bf16.msra.mxu0 %v4174_v20 }
 0xe14   :  { %3811 = vmatprep.subr.bf16.mxu0 %v4574_v38 }
 0xe17   :  { %3812 = vmatpush3.bf16.msra.mxu0 %v4175_v21 }
 0xe18   :  { %3813 = vmatprep.subr.bf16.mxu0 %v4574_v38 }
 0xe1b   :  { %3814 = vmatpush3.bf16.msra.mxu0 %v4176_v22 }
 0xe1c   :  { %3815 = vmatprep.subr.bf16.mxu0 %v4574_v38 }
 0xe1f   :  { %3816 = vmatpush3.bf16.msra.mxu0 %v4177_v23 }
 0xe20   :  { %3817 = vmatprep.subr.bf16.mxu0 %v4574_v38 }
 0xe23   :  { %3818 = vmatpush3.bf16.msra.mxu0 %v4178_v31 }
 0xe24   :  { %3819 = vmatprep.subr.bf16.mxu0 %v4574_v38 }
 0xe27   :  { %v2700_v24 = vpop.f32.mrb[68].mxu1  ;;  %3820 = vmatpush3.bf16.msra.mxu0 %v4179_v32 }
 0xe28   :  { %v3803_v25 = vpop.f32.mrb[69].mxu1  ;;  %3845 = vmatprep.subr.bf16.mxu0 %v4574_v38 }
 0xe29   :  { %v2703_v26 = vpop.f32.mrb[70].mxu1  ;;  %v4189_v25 = vld [vmem:[#allocation17 + $0x8] sm:$0xff]  }
 0xe2a   :  { %v3804_v27 = vpop.f32.mrb[71].mxu1 }
 0xedd   :  { %v2611_v33 = vpop.f32.mrb[24].mxu0 }
 0xede   :  { %v2701_v28 = vadd.f32 %v2700_v24, %v2611_v33  ;;  %v3783_v29 = vpop.f32.mrb[25].mxu0  ;;  %v4188_v24 = vld [vmem:[#allocation17] sm:$0xff]  }
 0xedf   :  { %v2614_v36 = vpop.f32.mrb[26].mxu0 }
 0xee0   :  { %v5058_v37 = vadd.f32 %v2701_v28, %v4949_v4  ;;  %v2704_v39 = vadd.f32 %v2703_v26, %v2614_v36  ;;  %v3784_v40 = vpop.f32.mrb[27].mxu0  ;;  %v4182_v4 = vld [vmem:[#allocation16 + $0x10] sm:$0xff]   ;;  %v209_v26 = vand.u32 127, %v208_v49 }
 0xee1   :  { %3830 = vmatpush3.bf16.msra.mxu1 %v4182_v4  ;;  %v4193_v4 = vld [vmem:[#allocation17 + $0x28] sm:$0xff]  }
 0xee2   :  { %v5061_v41 = vadd.f32 %v2704_v39, %v4951_v6  ;;  %3831 = vmatprep.subr.bf16.mxu1 %v4574_v38  ;;  %v4183_v6 = vld [vmem:[#allocation16 + $0x18] sm:$0xff]   ;;  %vm210_vm3 = vcmp.lt.s32.totalorder %v209_v26, 32 }
 0xee3   :  { %v5097_v33 = vsel %vm210_vm3, 1.0, %v4574_v38 }
 0xee4   :  { %v2709_v42 = vpack.c.bf16 %v5061_v41, %v5058_v37 }
 0xee5   :  { %3832 = vmatpush3.bf16.msra.mxu1 %v4183_v6  ;;  %v4194_v6 = vld [vmem:[#allocation17 + $0x30] sm:$0xff]  }
 0xee6   :  { %3822 = vmatmul.mubr.bf16.vlgmr.msra.gmra.mrb[28].mxu0 %v2709_v42  ;;  %3833 = vmatprep.subr.bf16.mxu1 %v4574_v38  ;;  %v4190_v42 = vld [vmem:[#allocation17 + $0x10] sm:$0xff]  }
 0xee7   :  { %3861 = vmatprep.mubr.msk.bf16.mxu0 %vm4575_vm0, %v4574_v38  ;;  %3846 = vmatpush3.bf16.msra.mxu0 %v4188_v24 }
 0xee8   :  { %3847 = vmatprep.subr.bf16.mxu0 %v4574_v38 }
 0xee9   :  { %3834 = vmatpush3.bf16.msra.mxu1 %v4184_v45  ;;  %v4195_v45 = vld [vmem:[#allocation17 + $0x38] sm:$0xff]  }
 0xeea   :  { %3835 = vmatprep.subr.bf16.mxu1 %v4574_v38 }
 0xeeb   :  { %3848 = vmatpush3.bf16.msra.mxu0 %v4189_v25 }
 0xeec   :  { %3849 = vmatprep.subr.bf16.mxu0 %v4574_v38 }
 0xeed   :  { %3836 = vmatpush3.bf16.msra.mxu1 %v4185_v46 }
 0xeee   :  { %3837 = vmatprep.subr.bf16.mxu1 %v4574_v38 }
 0xeef   :  { %3850 = vmatpush3.bf16.msra.mxu0 %v4190_v42 }
 0xef0   :  { %3851 = vmatprep.subr.bf16.mxu0 %v4574_v38 }
 0xef1   :  { %3838 = vmatpush3.bf16.msra.mxu1 %v4186_v47 }
 0xef2   :  { %3839 = vmatprep.subr.bf16.mxu1 %v4574_v38 }
 0xef3   :  { %3852 = vmatpush3.bf16.msra.mxu0 %v4191_v43 }
 0xef4   :  { %3853 = vmatprep.subr.bf16.mxu0 %v4574_v38 }
 0xef5   :  { %3840 = vmatpush3.bf16.msra.mxu1 %v4187_v48 }
 0xef6   :  { %3865 = vmatprep.subr.bf16.mxu1 %v4574_v38 }
 0xef7   :  { %3854 = vmatpush3.bf16.msra.mxu0 %v4192_v44 }
 0xef8   :  { %3855 = vmatprep.subr.bf16.mxu0 %v4574_v38 }
 0xefb   :  { %3856 = vmatpush3.bf16.msra.mxu0 %v4193_v4 }
 0xefc   :  { %3857 = vmatprep.subr.bf16.mxu0 %v4574_v38 }
 0xeff   :  { %3858 = vmatpush3.bf16.msra.mxu0 %v4194_v6 }
 0xf00   :  { %3859 = vmatprep.subr.bf16.mxu0 %v4574_v38 }
 0xf03   :  { %3860 = vmatpush3.bf16.msra.mxu0 %v4195_v45 }
 0xfb9   :  { %v2812_v54 = vpop.f32.mrb[28].mxu0 }
 0xfba   :  { %v2813_v55 = vadd.f32 %v2812_v54, %v2729_v53  ;;  %v3823_v57 = vpop.f32.mrb[29].mxu0  ;;  %v2975_v54 = vsub.s32 1, %v5075_v50 }
 0xfbb   :  { %v2815_v58 = vpop.f32.mrb[30].mxu0 }
 0xfbc   :  { %v2819_v59 = vmul.f32 %v2813_v55, %v2813_v55  ;;  %v2816_v60 = vadd.f32 %v2815_v58, %v2729_v53  ;;  %v3824_v61 = vpop.f32.mrb[31].mxu0  ;;  %v2976_v57 = vrot.slane %v5089_v15, %v2975_v54  ;;  %v3043_v25 = vrot.slane %v5081_v52, %v2975_v54 }
 0xfbe   :  { %v2821_v30 = vmul.f32 %v2819_v59, %v2813_v55  ;;  %v2820_v34 = vmul.f32 %v2816_v60, %v2816_v60 }
 0xfc0   :  { %v2823_v35 = vmul.f32 0.044715, %v2821_v30  ;;  %v2822_v62 = vmul.f32 %v2820_v34, %v2816_v60 }
 0xfc2   :  { %v2825_v63 = vadd.f32 %v2823_v35, %v2813_v55  ;;  %v2824_v1 = vmul.f32 0.044715, %v2822_v62 }
 0xfc4   :  { %v2827_v2 = vmul.f32 0.7978846, %v2825_v63  ;;  %v2826_v3 = vadd.f32 %v2824_v1, %v2816_v60  ;;  %v4252_v63 = vld [vmem:[#allocation2] sm:$0xff] }
 0xfc6   :  { %4236 = vtanh.f32 %v2827_v2  ;;  %v2828_v5 = vmul.f32 0.7978846, %v2826_v3 }
 0xfc8   :  { %4238 = vtanh.f32 %v2828_v5  ;;  %v4253_v5 = vld [vmem:[#allocation2 + $0x8] sm:$0xff] }
 0xfd0   :  { %v4237_v7 = vpop.eup %4236 }
 0xfd1   :  { %v2831_v8 = vadd.f32 1.0, %v4237_v7 }
 0xfd2   :  { %v4239_v9 = vpop.eup %4238 }
 0xfd3   :  { %v2833_v10 = vmul.f32 0.5, %v2831_v8  ;;  %v2832_v11 = vadd.f32 1.0, %v4239_v9  ;;  %v4196_v8 = vld [vmem:[#allocation19] sm:$0xff]   ;;  %v4197_v9 = vld [vmem:[#allocation19 + $0x8] sm:$0xff]  }
 0xfd5   :  { %v2834_v12 = vmul.f32 0.5, %v2832_v11  ;;  %v2835_v13 = vmul.f32 %v2833_v10, %v2813_v55  ;;  %v2981_v55 = vsub.s32 2, %v5075_v50  ;;  %v4198_v10 = vld [vmem:[#allocation19 + $0x10] sm:$0xff]   ;;  %v4199_v11 = vld [vmem:[#allocation19 + $0x18] sm:$0xff]  }
 0xfd7   :  { %v2836_v14 = vmul.f32 %v2834_v12, %v2816_v60  ;;  %v2982_v60 = vrot.slane %v5089_v15, %v2981_v55  ;;  %v4200_v12 = vld [vmem:[#allocation19 + $0x20] sm:$0xff]  }
 0xfd9   :  { %v2837_v56 = vpack.c.bf16 %v2836_v14, %v2835_v13  ;;  %v4201_v13 = vld [vmem:[#allocation19 + $0x28] sm:$0xff]   ;;  %v4202_v14 = vld [vmem:[#allocation19 + $0x30] sm:$0xff]  }
 0xfdb   :  { %3842 = vmatmul.mubr.bf16.vlgmr.msra.gmra.mrb[72].mxu1 %v2837_v56  ;;  %v4203_v56 = vld [vmem:[#allocation19 + $0x38] sm:$0xff]  }
 0xfdc   :  { %3881 = vmatprep.mubr.msk.bf16.mxu1 %vm4575_vm0, %v4574_v38  ;;  %3866 = vmatpush3.bf16.msra.mxu1 %v4196_v8 }
 0xfdd   :  { %3867 = vmatprep.subr.bf16.mxu1 %v4574_v38 }
 0xfe0   :  { %3868 = vmatpush3.bf16.msra.mxu1 %v4197_v9 }
 0xfe1   :  { %3869 = vmatprep.subr.bf16.mxu1 %v4574_v38 }
 0xfe4   :  { %3870 = vmatpush3.bf16.msra.mxu1 %v4198_v10 }
 0xfe5   :  { %3871 = vmatprep.subr.bf16.mxu1 %v4574_v38 }
 0xfe8   :  { %3872 = vmatpush3.bf16.msra.mxu1 %v4199_v11 }
 0xfe9   :  { %3873 = vmatprep.subr.bf16.mxu1 %v4574_v38 }
 0xfec   :  { %3874 = vmatpush3.bf16.msra.mxu1 %v4200_v12 }
 0xfed   :  { %3875 = vmatprep.subr.bf16.mxu1 %v4574_v38 }
 0xff0   :  { %3876 = vmatpush3.bf16.msra.mxu1 %v4201_v13 }
 0xff1   :  { %3877 = vmatprep.subr.bf16.mxu1 %v4574_v38 }
 0xff4   :  { %3878 = vmatpush3.bf16.msra.mxu1 %v4202_v14 }
 0xff5   :  { %3879 = vmatprep.subr.bf16.mxu1 %v4574_v38 }
 0xff8   :  { %3880 = vmatpush3.bf16.msra.mxu1 %v4203_v56 }
0x10ae   :  { %v2940_v17 = vpop.f32.mrb[72].mxu1 }
0x10af   :  { %v2941_v18 = vadd.f32 %v2940_v17, %v2857_v16  ;;  %v3843_v0 = vpop.f32.mrb[73].mxu1 }
0x10b0   :  { %v2943_v19 = vpop.f32.mrb[74].mxu1 }
0x10b1   :  { %v2944_v20 = vadd.f32 %v2943_v19, %v2857_v16  ;;  %v3844_v21 = vpop.f32.mrb[75].mxu1  ;;  %v2947_v22 = vadd.f32 %v2941_v18, %v5058_v37 }
0x10b3   :  { %2949 = vadd.xlane.f32.xlu0 %v2947_v22  ;;  %v2948_v23 = vadd.f32 %v2944_v20, %v5061_v41 }
0x10b5   :  { %2951 = vadd.xlane.f32.xlu1 %v2948_v23 }
0x1140   :  { %v2950_v27 = vpop.xlane.xlu0 %2949 }
0x1141   :  { %v2953_v31 = vmul.f32 0.03125, %v2950_v27 }
0x1142   :  { %v2952_v32 = vpop.xlane.xlu1 %2951 }
0x1143   :  { %v2955_v28 = vsub.f32 %v2947_v22, %v2953_v31  ;;  %v2954_v29 = vmul.f32 0.03125, %v2952_v32 }
0x1145   :  { %v2956_v36 = vsub.f32 %v2948_v23, %v2954_v29  ;;  %v2957_v37 = vmul.f32 %v5097_v33, %v2955_v28 }
0x1147   :  { %v2959_v39 = vmul.f32 %v2957_v37, %v2957_v37  ;;  %v2958_v40 = vmul.f32 %v5097_v33, %v2956_v36 }
0x1149   :  { %2961 = vadd.xlane.f32.xlu0 %v2959_v39  ;;  %v2960_v41 = vmul.f32 %v2958_v40, %v2958_v40 }
0x114b   :  { %2963 = vadd.xlane.f32.xlu1 %v2960_v41 }
0x11d6   :  { %v2962_v46 = vpop.xlane.xlu0 %2961 }
0x11d7   :  { %v2965_v47 = vmul.f32 0.03125, %v2962_v46 }
0x11d8   :  { %v2964_v48 = vpop.xlane.xlu1 %2963 }
0x11d9   :  { %v2967_v49 = vadd.f32 1e-05, %v2965_v47  ;;  %v2966_v51 = vmul.f32 0.03125, %v2964_v48 }
0x11db   :  { %4240 = vrsqrt.f32 %v2967_v49  ;;  %v2968_v53 = vadd.f32 1e-05, %v2966_v51 }
0x11dd   :  { %4242 = vrsqrt.f32 %v2968_v53 }
0x11e5   :  { %v4241_v58 = vpop.eup %4240 }
0x11e6   :  { %v2971_v59 = vmul.f32 %v4241_v58, %v2957_v37 }
0x11e7   :  { %v4243_v61 = vpop.eup %4242 }
0x11e8   :  { %v2977_v30 = vmul.f32 %v2976_v57, %v2971_v59  ;;  %v2972_v34 = vmul.f32 %v4243_v61, %v2958_v40  ;;  %v3019_v61 = vsub.s32 4, %v5075_v50 }
0x11ea   :  { %v2983_v35 = vadd.f32 %v2982_v60, %v2977_v30  ;;  %v2978_v62 = vmul.f32 %v2976_v57, %v2972_v34 }
0x11ec   :  { %v2985_v1 = vsub.f32 %v4252_v63, %v2983_v35  ;;  %v2984_v2 = vadd.f32 %v2982_v60, %v2978_v62  ;;  %v3013_v60 = vsub.s32 3, %v5075_v50  ;;  %v3020_v62 = vrot.slane %v5089_v15, %v3019_v61 }
0x11ee   :  { %2987 = vadd.xlane.f32.xlu0 %v2985_v1  ;;  %v3023_v3 = vpack.c.bf16 %v2984_v2, %v2983_v35  ;;  %v2986_v7 = vsub.f32 %v4253_v5, %v2984_v2  ;;  %v3014_v30 = vrot.slane %v5089_v15, %v3013_v60 }
0x11f0   :  { %3862 = vmatmul.mubr.bf16.vlgmr.msra.gmra.mrb[32].mxu0 %v3023_v3  ;;  %2989 = vadd.xlane.f32.xlu1 %v2986_v7 }
0x127b   :  { %v2988_v16 = vpop.xlane.xlu0 %2987 }
0x127c   :  { %v2991_v17 = vmul.f32 0.03125, %v2988_v16 }
0x127d   :  { %v2990_v18 = vpop.xlane.xlu1 %2989 }
0x127e   :  { %v2993_v0 = vsub.f32 %v2985_v1, %v2991_v17  ;;  %v2992_v19 = vmul.f32 0.03125, %v2990_v18 }
0x1280   :  { %v2994_v20 = vsub.f32 %v2986_v7, %v2992_v19  ;;  %v2995_v21 = vmul.f32 %v5097_v33, %v2993_v0 }
0x1282   :  { %v2997_v22 = vmul.f32 %v2995_v21, %v2995_v21  ;;  %v2996_v23 = vmul.f32 %v5097_v33, %v2994_v20 }
0x1284   :  { %2999 = vadd.xlane.f32.xlu0 %v2997_v22  ;;  %v2998_v24 = vmul.f32 %v2996_v23, %v2996_v23 }
0x1286   :  { %3001 = vadd.xlane.f32.xlu1 %v2998_v24 }
0x12c3   :  { %v3126_v26 = vpop.f32.mrb[32].mxu0 }
0x12c4   :  { %v3127_v38 = vadd.f32 %v3126_v26, %v3043_v25  ;;  %v3863_v27 = vpop.f32.mrb[33].mxu0 }
0x12c5   :  { %v3129_v31 = vpop.f32.mrb[34].mxu0 }
0x12c6   :  { %v3133_v32 = vmul.f32 %v3127_v38, %v3127_v38  ;;  %v3130_v28 = vadd.f32 %v3129_v31, %v3043_v25  ;;  %v3864_v29 = vpop.f32.mrb[35].mxu0 }
0x12c8   :  { %v3135_v36 = vmul.f32 %v3133_v32, %v3127_v38  ;;  %v3134_v37 = vmul.f32 %v3130_v28, %v3130_v28 }
0x12ca   :  { %v3137_v39 = vmul.f32 0.044715, %v3135_v36  ;;  %v3136_v40 = vmul.f32 %v3134_v37, %v3130_v28 }
0x12cc   :  { %v3139_v41 = vadd.f32 %v3137_v39, %v3127_v38  ;;  %v3138_v42 = vmul.f32 0.044715, %v3136_v40 }
0x12ce   :  { %v3141_v43 = vmul.f32 0.7978846, %v3139_v41  ;;  %v3140_v33 = vadd.f32 %v3138_v42, %v3130_v28 }
0x12d0   :  { %4244 = vtanh.f32 %v3141_v43  ;;  %v3142_v44 = vmul.f32 0.7978846, %v3140_v33 }
0x12d2   :  { %4246 = vtanh.f32 %v3142_v44 }
0x12da   :  { %v4245_v4 = vpop.eup %4244 }
0x12db   :  { %v3145_v52 = vadd.f32 1.0, %v4245_v4 }
0x12dc   :  { %v4247_v6 = vpop.eup %4246 }
0x12dd   :  { %v3147_v45 = vmul.f32 0.5, %v3145_v52  ;;  %v3146_v46 = vadd.f32 1.0, %v4247_v6 }
0x12df   :  { %v3148_v47 = vmul.f32 0.5, %v3146_v46  ;;  %v3149_v48 = vmul.f32 %v3147_v45, %v3127_v38 }
0x12e1   :  { %v3150_v49 = vmul.f32 %v3148_v47, %v3130_v28 }
0x12e3   :  { %v3151_v51 = vpack.c.bf16 %v3150_v49, %v3149_v48 }
0x12e5   :  { %3882 = vmatmul.mubr.bf16.vlgmr.msra.gmra.mrb[76].mxu1 %v3151_v51 }
0x1311   :  { %v3000_v53 = vpop.xlane.xlu0 %2999 }
0x1312   :  { %v3003_v54 = vmul.f32 0.03125, %v3000_v53 }
0x1313   :  { %v3002_v55 = vpop.xlane.xlu1 %3001 }
0x1314   :  { %v3005_v57 = vadd.f32 1e-05, %v3003_v54  ;;  %v3004_v58 = vmul.f32 0.03125, %v3002_v55 }
0x1316   :  { %4248 = vrsqrt.f32 %v3005_v57  ;;  %v3006_v59 = vadd.f32 1e-05, %v3004_v58 }
0x1318   :  { %4250 = vrsqrt.f32 %v3006_v59 }
0x1320   :  { %v4249_v34 = vpop.eup %4248 }
0x1321   :  { %v3009_v35 = vmul.f32 %v4249_v34, %v2995_v21 }
0x1322   :  { %v4251_v63 = vpop.eup %4250 }
0x1323   :  { %v3010_v1 = vmul.f32 %v4251_v63, %v2996_v23  ;;  %v3015_v2 = vmul.f32 %v3014_v30, %v3009_v35 }
0x1325   :  { %v3016_v3 = vmul.f32 %v3014_v30, %v3010_v1  ;;  %v3021_v5 = vadd.f32 %v3020_v62, %v3015_v2 }
0x1327   :  { %v3022_v7 = vadd.f32 %v3020_v62, %v3016_v3  ;;  %3266 = vst [vmem:[#allocation21] sm:$0xff] %v3021_v5 }
0x1329   :  { %3267 = vst [vmem:[#allocation21 + $0x8] sm:$0xff] %v3022_v7 }
0x132a   :  { %4507 = shalt.err (!%p4504_p8)
}
0x132b   :  { %s4508_s2 = scalar_lea.hbm %s5172_s15, 256 }
0x132c   :  { %p4509_p9 = scmp.ne.s32.totalorder %s5172_s15, %s4508_s2  ;;  %p4512_p10 = scmp.lt.u32.totalorder %s4508_s2, %s5172_s15 }
0x132e   :  { %p4514_p11 = pnand %p4512_p10, %p4509_p9 }
0x1330   :  { %4517 = shalt.err (!%p4514_p11)
}
0x1331   :  { %3291 = dma.vmem_to_hbm [thread:$0]  %s3286_s5, 256, %s5172_s15, [#allocation22], %s4566_s9, %s4566_s9, %s4567_s14  }
0x1332   :  { %v3516_v50 = vld [vmem:[%s5170_s13] ss:$0 sm:$0xff]  ;;  %s4577_s22 = smov [#allocation20]  }
0x1333   :  { %s3273_s23 = sshll.u32 %s4577_s22, 4  ;;  %s3274_s23 = int_to_ptr.vmem [resolvable:$true] %s3273_s23 }
0x1334   :  { %s4518_s24 = scalar_lea.vmem %s3274_s23, 256  ;;  %p4523_p13 = scmp.lt.s32.totalorder %s3274_s23, %s3274_s23 }
0x1335   :  { %p4519_p12 = scmp.ne.s32.totalorder %s3274_s23, %s4518_s24  ;;  %p4524_p0 = scmp.lt.s32.totalorder %s4518_s24, %s4518_s24 }
0x1337   :  { %p4525_p1 = por %p4524_p0, %p4523_p13 }
0x1339   :  { %p4526_p2 = pnand %p4525_p1, %p4519_p12 }
0x13b8   :  { %v3257_v15 = vpop.f32.mrb[76].mxu1 }
0x13b9   :  { %v3258_v8 = vadd.f32 %v3516_v50, %v3257_v15  ;;  %v3883_v9 = vpop.f32.mrb[77].mxu1 }
0x13ba   :  { %v3260_v10 = vpop.f32.mrb[78].mxu1 }
0x13bb   :  { %3264 = vst [vmem:[#allocation20] sm:$0xff] %v3258_v8  ;;  %v3261_v11 = vadd.f32 %v3516_v50, %v3260_v10  ;;  %v3884_v12 = vpop.f32.mrb[79].mxu1 }
0x13bd   :  { %3265 = vst [vmem:[#allocation20 + $0x8] sm:$0xff] %v3261_v11 }
0x13be   :  { %4529 = shalt.err (!%p4526_p2)
}
0x13bf   :  { %s5175_s25 = sld [smem:[#allocation31_spill]] }
0x13c5   :  { %s4530_s4 = scalar_lea.hbm %s5175_s25, 256 }
0x13c6   :  { %p4531_p3 = scmp.ne.s32.totalorder %s5175_s25, %s4530_s4  ;;  %p4534_p4 = scmp.lt.u32.totalorder %s4530_s4, %s5175_s25 }
0x13c8   :  { %p4536_p5 = pnand %p4534_p4, %p4531_p3 }
0x13ca   :  { %4539 = shalt.err (!%p4536_p5)
}
0x13cb   :  { %3279 = dma.vmem_to_hbm [thread:$0]  %s3274_s23, 256, %s5175_s25, [#allocation4], %s4566_s9, %s4566_s9, %s4567_s14  }
0x13cc   :  { %4552 = dma.done.wait [#allocation4], 256  }
0x13cd   :  { %4553 = vsyncadd [#allocation4], 4294967040 }
0x13ce   :  { %4554 = dma.done.wait [#allocation22], 256  }
0x13cf   :  { %4555 = vsyncadd [#allocation22], 4294967040 }
0x13d0   :  { %3298 = vsyncpa [#allocation3], 1 }
0x13d1   :  { %3299 = vsyncpa [#allocation6], 1 }
0x13d2   :  { %3300 = vsyncpa [#allocation9], 1 }
0x13d3   :  { %3301 = vsyncpa [#allocation12], 1 }
0x13d4   :  { %3302 = vsyncpa [#allocation15], 1 }
0x13d5   :  { %3303 = vsyncpa [#allocation18], 1 }
0x13d6   :  { %3304 = vsyncpa [#allocation4], 1 }
0x13d7   :  { %3305 = vsyncpa [#allocation22], 1 }

</bundles_post_ra>
